<compile_context>
chip_gen: v5e
topology: v5e:2x2
jax: 0.10.0
libtpu: 0.0.40
codegen_flags: <defaults>
</compile_context>

<pallas_src>
import math
import functools

import numpy as np
import jax
import jax.numpy as jnp
from jax import lax
from jax.experimental import pallas as pl
from jax.experimental.pallas import tpu as pltpu

HIDDEN = 128       # conv1 output channels (fixed by the iclr_block module)
ROW_CHUNK = 8      # sublane-sized row chunk -> bounds live vreg ranges


def _iclr_block_kernel(x_ref, w1_ref, b1_ref, w2_ref, b2_ref, o_ref,
                       xp_ref, hp_ref, *, H, W, Cin, Cout):
    """One batch image per grid step.

    x_ref : (H, W, Cin)        input block (batch dim squeezed)
    w1_ref: (9*Cin, 128)       conv1 weight, im2col rows in (dy, dx, cin) order
    b1_ref: (1, 128)
    w2_ref: (9, 128, Cout)     conv2 weight, one (128, Cout) tap per (dy, dx)
    b2_ref: (1, Cout)
    o_ref : (H, W, Cout)       output block
    xp_ref: (H+2, W+2, Cin)    VMEM scratch, zero-halo padded input
    hp_ref: (H+2, W+2, 128)    VMEM scratch, zero-halo padded hidden activation
    """
    f32 = jnp.float32
    n_chunks = H // ROW_CHUNK

    # Zero the padded scratch buffers (provides the conv halo).  Re-done every
    # grid step so there is NO cross-iteration scratch dependence -> the batch
    # axis is safe to mark "parallel" (v7x dual TensorCore).  ~60 vreg stores.
    xp_ref[...] = jnp.zeros_like(xp_ref)
    hp_ref[...] = jnp.zeros_like(hp_ref)

    # Stage the input (also the residual source) into the padded scratch.
    x = x_ref[...].astype(f32)                    # (H, W, Cin)
    xp_ref[1:H + 1, 1:W + 1, :] = x

    w1 = w1_ref[...]                              # (9*Cin, 128)  resident
    b1 = b1_ref[...]                              # (1, 128)
    b2 = b2_ref[...]                              # (1, Cout)

    # ---- conv1 (im2col matmul, K = 9*Cin) + bias + ReLU; hidden stays in VMEM
    def conv1_chunk(i, carry):
        y0 = i * ROW_CHUNK
        # Build im2col rows for ROW_CHUNK output rows: (ROW_CHUNK*W, 9*Cin).
        # Tap order (dy, dx, cin) matches the (3,3,Cin,128)->(9*Cin,128) reshape.
        pieces = [
            xp_ref[pl.ds(y0 + dy, ROW_CHUNK), dx:dx + W, :]
            .reshape(ROW_CHUNK * W, Cin)
            for dy in range(3) for dx in range(3)
        ]
        patches = jnp.concatenate(pieces, axis=-1)             # (RC*W, 9*Cin)
        h = jnp.dot(patches, w1, preferred_element_type=f32) + b1
        h = jnp.maximum(h, 0.0)                                # ReLU
        # TODO(synk): 'Tanh' / 'Leaky' activation variants of the module are not
        # wired up here (only the type == 'ReLU' branch).
        hp_ref[pl.ds(y0 + 1, ROW_CHUNK), 1:W + 1, :] = (
            h.reshape(ROW_CHUNK, W, HIDDEN))
        return carry

    lax.fori_loop(0, n_chunks, conv1_chunk, 0, unroll=True)

    # ---- conv2 (nine K=128 taps on the MXU) + bias + residual ---------------
    def conv2_chunk(i, carry):
        y0 = i * ROW_CHUNK
        acc = jnp.zeros((ROW_CHUNK * W, Cout), f32)
        for t in range(9):                        # static unroll over taps
            dy, dx = t // 3, t % 3
            tap = hp_ref[pl.ds(y0 + dy, ROW_CHUNK), dx:dx + W, :]
            acc = acc + jnp.dot(tap.reshape(ROW_CHUNK * W, HIDDEN), w2_ref[t],
                                preferred_element_type=f32)
        res = x_ref[pl.ds(y0, ROW_CHUNK), :, :].astype(f32)    # (RC, W, Cin)
        y = (acc + b2).reshape(ROW_CHUNK, W, Cout) + res
        # NOTE: Cout=4 -> 4/128-lane masked store; output is only 4 KiB/image so
        # this is negligible here.
        # TODO(synk): for large Cout, repack so the lane dim is >=128 wide.
        o_ref[pl.ds(y0, ROW_CHUNK), :, :] = y.astype(o_ref.dtype)
        return carry

    lax.fori_loop(0, n_chunks, conv2_chunk, 0, unroll=True)


def iclr_block_forward(x, w1, b1, w2, b2):
    """Fused forward of iclr_block(ninput, noutput, 'ReLU') on NHWC input."""
    N, H, W, Cin = x.shape
    Cout = w2.shape[-1]
    assert w1.shape == (3, 3, Cin, HIDDEN)
    assert w2.shape == (3, 3, HIDDEN, Cout)
    assert Cout == Cin, "residual add requires noutput == ninput"
    assert H % ROW_CHUNK == 0
    # TODO(synk): for large H/W add an H-tile grid axis with halo-aware blocks so
    # the (H+2, W+2, 128) hidden scratch always fits v7x's 64 MiB VMEM.

    w1r = w1.reshape(9 * Cin, HIDDEN)     # (dy, dx, cin)-major rows
    w2r = w2.reshape(9, HIDDEN, Cout)     # one (128, Cout) tap per (dy, dx)
    b1r = b1.reshape(1, HIDDEN)
    b2r = b2.reshape(1, Cout)

    kern = functools.partial(_iclr_block_kernel, H=H, W=W, Cin=Cin, Cout=Cout)

    return pl.pallas_call(
        kern,
        out_shape=jax.ShapeDtypeStruct((N, H, W, Cout), x.dtype),
        grid=(N,),
        in_specs=[
            pl.BlockSpec((None, H, W, Cin), lambda n: (n, 0, 0, 0)),   # x (batch-squeezed)
            pl.BlockSpec((9 * Cin, HIDDEN), lambda n: (0, 0)),         # w1 (VMEM-resident)
            pl.BlockSpec((1, HIDDEN), lambda n: (0, 0)),               # b1
            pl.BlockSpec((9, HIDDEN, Cout), lambda n: (0, 0, 0)),      # w2 (VMEM-resident)
            pl.BlockSpec((1, Cout), lambda n: (0, 0)),                 # b2
        ],
        out_specs=pl.BlockSpec((None, H, W, Cout), lambda n: (n, 0, 0, 0)),
        scratch_shapes=[
            pltpu.VMEM((H + 2, W + 2, Cin), jnp.float32),      # zero-padded input
            pltpu.VMEM((H + 2, W + 2, HIDDEN), jnp.float32),   # zero-padded hidden act
        ],
        compiler_params=pltpu.CompilerParams(
            # No cross-step scratch dependence -> batch axis can be sharded
            # across TensorCores (v7x) and software-pipelined elsewhere.
            dimension_semantics=("parallel",),
            # Working set (padded hidden scratch + double-buffered I/O blocks +
            # resident weights) is well under 1 MiB; a 32 MiB cap is safe on
            # v5e/v6e (128 MiB VMEM) and on v7x (64 MiB VMEM).
            vmem_limit_bytes=32 * 1024 * 1024,
        ),
    )(x, w1r, b1r, w2r, b2r)


# ----------------------------- parameter init --------------------------------
def orthogonal_init(key, shape, gain):
    """torch.nn.init.orthogonal_ equivalent: flatten dims after the first,
    orthogonalize via QR, scale by gain."""
    rows = shape[0]
    cols = int(np.prod(shape[1:]))
    flat_shape = (rows, cols) if rows >= cols else (cols, rows)
    a = jax.random.normal(key, flat_shape, dtype=jnp.float32)
    q, r = jnp.linalg.qr(a)
    q = q * jnp.sign(jnp.diag(r))
    if rows < cols:
        q = q.T
    return (gain * q).reshape(shape)


def make_iclr_block_params(key, ninput, noutput):
    """iclr_block(ninput, noutput, 'ReLU') parameters in HWIO layout."""
    k1, k2, k3, k4 = jax.random.split(key, 4)
    gain = math.sqrt(2.0)                                   # calculate_gain('relu')
    w1_oihw = orthogonal_init(k1, (HIDDEN, ninput, 3, 3), gain)
    w2_oihw = orthogonal_init(k2, (noutput, HIDDEN, 3, 3), gain)
    fan1 = ninput * 9
    fan2 = HIDDEN * 9
    b1 = jax.random.uniform(k3, (HIDDEN,), minval=-1.0 / math.sqrt(fan1),
                            maxval=1.0 / math.sqrt(fan1), dtype=jnp.float32)
    b2 = jax.random.uniform(k4, (noutput,), minval=-1.0 / math.sqrt(fan2),
                            maxval=1.0 / math.sqrt(fan2), dtype=jnp.float32)
    w1 = jnp.transpose(w1_oihw, (2, 3, 1, 0))               # OIHW -> HWIO
    w2 = jnp.transpose(w2_oihw, (2, 3, 1, 0))
    return w1, b1, w2, b2


if __name__ == "__main__":
    key = jax.random.PRNGKey(0)
    kp, kx = jax.random.split(key)

    N, H, W, C = 2, 16, 16, 4          # NHWC  ==  PyTorch NCHW (2, 4, 16, 16)
    w1, b1, w2, b2 = make_iclr_block_params(kp, ninput=C, noutput=C)
    x = jax.random.normal(kx, (N, H, W, C), dtype=jnp.float32)

    out = jax.jit(iclr_block_forward)(x, w1, b1, w2, b2)
    jax.block_until_ready(out)

    # Pure-JAX reference for correctness.
    def ref(x):
        dn = ('NHWC', 'HWIO', 'NHWC')
        h = lax.conv_general_dilated(x, w1, (1, 1), 'SAME', dimension_numbers=dn) + b1
        h = jnp.maximum(h, 0.0)
        y = lax.conv_general_dilated(h, w2, (1, 1), 'SAME', dimension_numbers=dn) + b2
        return y + x

    assert out.shape == (N, H, W, C)
    assert jnp.allclose(out, ref(x), atol=1e-4, rtol=1e-4)
    print("KERNEL_OK")
</pallas_src>

<mosaic_0001>
module attributes {stable_mosaic.version = 11 : i64} {
  func.func @_iclr_block_kernel(%arg0: i32, %arg1: memref<1x16x16x4xf32, #tpu.memory_space<vmem>>, %arg2: memref<36x128xf32, #tpu.memory_space<vmem>>, %arg3: memref<1x128xf32, #tpu.memory_space<vmem>>, %arg4: memref<9x128x4xf32, #tpu.memory_space<vmem>>, %arg5: memref<1x4xf32, #tpu.memory_space<vmem>>, %arg6: memref<1x16x16x4xf32, #tpu.memory_space<vmem>>, %arg7: memref<18x18x4xf32, #tpu.memory_space<vmem>>, %arg8: memref<18x18x128xf32, #tpu.memory_space<vmem>>) attributes {dimension_semantics = [#tpu.dimension_semantics<parallel>], iteration_bounds = array<i64: 2>, scalar_prefetch = 0 : i64, scratch_operands = 2 : i64, tpu.core_type = #tpu.core_type<tc>, window_params = [{transform_indices = @transform_0, window_bounds = array<i64: 1, 16, 16, 4>}, {pipeline_mode = #tpu.pipeline_mode<synchronous>, transform_indices = @transform_1, window_bounds = array<i64: 36, 128>}, {pipeline_mode = #tpu.pipeline_mode<synchronous>, transform_indices = @transform_2, window_bounds = array<i64: 1, 128>}, {pipeline_mode = #tpu.pipeline_mode<synchronous>, transform_indices = @transform_3, window_bounds = array<i64: 9, 128, 4>}, {pipeline_mode = #tpu.pipeline_mode<synchronous>, transform_indices = @transform_4, window_bounds = array<i64: 1, 4>}, {transform_indices = @transform_5, window_bounds = array<i64: 1, 16, 16, 4>}]} {
    %cst = arith.constant 0.000000e+00 : f32
    %0 = vector.broadcast %cst : f32 to vector<18x18x4xf32>
    %c0 = arith.constant 0 : index
    %c0_0 = arith.constant 0 : index
    %c0_1 = arith.constant 0 : index
    %1 = vector.load %arg7[%c0, %c0_0, %c0_1] : memref<18x18x4xf32, #tpu.memory_space<vmem>>, vector<18x18x4xf32>
    tpu.vector_store %arg7[%c0, %c0_0, %c0_1], %0 {strides = array<i32>} : memref<18x18x4xf32, #tpu.memory_space<vmem>>, vector<18x18x4xf32>,
    %cst_2 = arith.constant 0.000000e+00 : f32
    %2 = vector.broadcast %cst_2 : f32 to vector<18x18x128xf32>
    %c0_3 = arith.constant 0 : index
    %c0_4 = arith.constant 0 : index
    %c0_5 = arith.constant 0 : index
    %3 = vector.load %arg8[%c0_3, %c0_4, %c0_5] : memref<18x18x128xf32, #tpu.memory_space<vmem>>, vector<18x18x128xf32>
    tpu.vector_store %arg8[%c0_3, %c0_4, %c0_5], %2 {strides = array<i32>} : memref<18x18x128xf32, #tpu.memory_space<vmem>>, vector<18x18x128xf32>,
    %c0_6 = arith.constant 0 : index
    %c0_7 = arith.constant 0 : index
    %c0_8 = arith.constant 0 : index
    %c0_9 = arith.constant 0 : index
    %4 = vector.load %arg1[%c0_6, %c0_7, %c0_8, %c0_9] : memref<1x16x16x4xf32, #tpu.memory_space<vmem>>, vector<1x16x16x4xf32>
    %5 = vector.shape_cast %4 : vector<1x16x16x4xf32> to vector<16x16x4xf32>
    %c1 = arith.constant 1 : index
    %c1_10 = arith.constant 1 : index
    %c0_11 = arith.constant 0 : index
    %6 = vector.load %arg7[%c1, %c1_10, %c0_11] : memref<18x18x4xf32, #tpu.memory_space<vmem>>, vector<16x16x4xf32>
    tpu.vector_store %arg7[%c1, %c1_10, %c0_11], %5 {strides = array<i32>} : memref<18x18x4xf32, #tpu.memory_space<vmem>>, vector<16x16x4xf32>,
    %c0_12 = arith.constant 0 : index
    %c0_13 = arith.constant 0 : index
    %7 = vector.load %arg2[%c0_12, %c0_13] : memref<36x128xf32, #tpu.memory_space<vmem>>, vector<36x128xf32>
    %c0_14 = arith.constant 0 : index
    %c0_15 = arith.constant 0 : index
    %8 = vector.load %arg3[%c0_14, %c0_15] : memref<1x128xf32, #tpu.memory_space<vmem>>, vector<1x128xf32>
    %c0_16 = arith.constant 0 : index
    %c0_17 = arith.constant 0 : index
    %9 = vector.load %arg5[%c0_16, %c0_17] : memref<1x4xf32, #tpu.memory_space<vmem>>, vector<1x4xf32>
    %c0_i32 = arith.constant 0 : i32
    %c8_i32 = arith.constant 8 : i32
    %10 = arith.muli %c0_i32, %c8_i32 : i32
    %c0_i32_18 = arith.constant 0 : i32
    %11 = arith.addi %10, %c0_i32_18 : i32
    %12 = arith.index_cast %11 : i32 to index
    %c0_19 = arith.constant 0 : index
    %c0_20 = arith.constant 0 : index
    %13 = vector.load %arg7[%12, %c0_19, %c0_20] : memref<18x18x4xf32, #tpu.memory_space<vmem>>, vector<8x16x4xf32>
    %14 = vector.shape_cast %13 : vector<8x16x4xf32> to vector<128x4xf32>
    %c0_i32_21 = arith.constant 0 : i32
    %15 = arith.addi %10, %c0_i32_21 : i32
    %16 = arith.index_cast %15 : i32 to index
    %c1_22 = arith.constant 1 : index
    %c0_23 = arith.constant 0 : index
    %17 = vector.load %arg7[%16, %c1_22, %c0_23] : memref<18x18x4xf32, #tpu.memory_space<vmem>>, vector<8x16x4xf32>
    %18 = vector.shape_cast %17 : vector<8x16x4xf32> to vector<128x4xf32>
    %c0_i32_24 = arith.constant 0 : i32
    %19 = arith.addi %10, %c0_i32_24 : i32
    %20 = arith.index_cast %19 : i32 to index
    %c2 = arith.constant 2 : index
    %c0_25 = arith.constant 0 : index
    %21 = vector.load %arg7[%20, %c2, %c0_25] : memref<18x18x4xf32, #tpu.memory_space<vmem>>, vector<8x16x4xf32>
    %22 = vector.shape_cast %21 : vector<8x16x4xf32> to vector<128x4xf32>
    %c1_i32 = arith.constant 1 : i32
    %23 = arith.addi %10, %c1_i32 : i32
    %24 = arith.index_cast %23 : i32 to index
    %c0_26 = arith.constant 0 : index
    %c0_27 = arith.constant 0 : index
    %25 = vector.load %arg7[%24, %c0_26, %c0_27] : memref<18x18x4xf32, #tpu.memory_space<vmem>>, vector<8x16x4xf32>
    %26 = vector.shape_cast %25 : vector<8x16x4xf32> to vector<128x4xf32>
    %c1_i32_28 = arith.constant 1 : i32
    %27 = arith.addi %10, %c1_i32_28 : i32
    %28 = arith.index_cast %27 : i32 to index
    %c1_29 = arith.constant 1 : index
    %c0_30 = arith.constant 0 : index
    %29 = vector.load %arg7[%28, %c1_29, %c0_30] : memref<18x18x4xf32, #tpu.memory_space<vmem>>, vector<8x16x4xf32>
    %30 = vector.shape_cast %29 : vector<8x16x4xf32> to vector<128x4xf32>
    %c1_i32_31 = arith.constant 1 : i32
    %31 = arith.addi %10, %c1_i32_31 : i32
    %32 = arith.index_cast %31 : i32 to index
    %c2_32 = arith.constant 2 : index
    %c0_33 = arith.constant 0 : index
    %33 = vector.load %arg7[%32, %c2_32, %c0_33] : memref<18x18x4xf32, #tpu.memory_space<vmem>>, vector<8x16x4xf32>
    %34 = vector.shape_cast %33 : vector<8x16x4xf32> to vector<128x4xf32>
    %c2_i32 = arith.constant 2 : i32
    %35 = arith.addi %10, %c2_i32 : i32
    %36 = arith.index_cast %35 : i32 to index
    %c0_34 = arith.constant 0 : index
    %c0_35 = arith.constant 0 : index
    %37 = vector.load %arg7[%36, %c0_34, %c0_35] : memref<18x18x4xf32, #tpu.memory_space<vmem>>, vector<8x16x4xf32>
    %38 = vector.shape_cast %37 : vector<8x16x4xf32> to vector<128x4xf32>
    %c2_i32_36 = arith.constant 2 : i32
    %39 = arith.addi %10, %c2_i32_36 : i32
    %40 = arith.index_cast %39 : i32 to index
    %c1_37 = arith.constant 1 : index
    %c0_38 = arith.constant 0 : index
    %41 = vector.load %arg7[%40, %c1_37, %c0_38] : memref<18x18x4xf32, #tpu.memory_space<vmem>>, vector<8x16x4xf32>
    %42 = vector.shape_cast %41 : vector<8x16x4xf32> to vector<128x4xf32>
    %c2_i32_39 = arith.constant 2 : i32
    %43 = arith.addi %10, %c2_i32_39 : i32
    %44 = arith.index_cast %43 : i32 to index
    %c2_40 = arith.constant 2 : index
    %c0_41 = arith.constant 0 : index
    %45 = vector.load %arg7[%44, %c2_40, %c0_41] : memref<18x18x4xf32, #tpu.memory_space<vmem>>, vector<8x16x4xf32>
    %46 = vector.shape_cast %45 : vector<8x16x4xf32> to vector<128x4xf32>
    %47 = tpu.concatenate %14, %18, %22, %26, %30, %34, %38, %42, %46 in 1 : vector<128x4xf32>, vector<128x4xf32>, vector<128x4xf32>, vector<128x4xf32>, vector<128x4xf32>, vector<128x4xf32>, vector<128x4xf32>, vector<128x4xf32>, vector<128x4xf32> -> vector<128x36xf32>
    %cst_42 = arith.constant dense<0.000000e+00> : vector<128x128xf32>
    %48 = tpu.matmul %47, %7, %cst_42 {dimension_numbers = #tpu.dot_dimension_numbers<[1], [0], [0], [1], [0, 0, 1, 1], [], []>} : vector<128x36xf32>, vector<36x128xf32>, vector<128x128xf32> -> vector<128x128xf32>
    %49 = vector.broadcast %8 : vector<1x128xf32> to vector<128x128xf32>
    %50 = arith.addf %48, %49 : vector<128x128xf32>
    %cst_43 = arith.constant 0.000000e+00 : f32
    %51 = vector.broadcast %cst_43 : f32 to vector<128x128xf32>
    %52 = arith.maximumf %50, %51 : vector<128x128xf32>
    %53 = vector.shape_cast %52 : vector<128x128xf32> to vector<8x16x128xf32>
    %c1_i32_44 = arith.constant 1 : i32
    %54 = arith.addi %10, %c1_i32_44 : i32
    %55 = arith.index_cast %54 : i32 to index
    %c1_45 = arith.constant 1 : index
    %c0_46 = arith.constant 0 : index
    %56 = vector.load %arg8[%55, %c1_45, %c0_46] : memref<18x18x128xf32, #tpu.memory_space<vmem>>, vector<8x16x128xf32>
    tpu.vector_store %arg8[%55, %c1_45, %c0_46], %53 {strides = array<i32>} : memref<18x18x128xf32, #tpu.memory_space<vmem>>, vector<8x16x128xf32>,
    %c1_i32_47 = arith.constant 1 : i32
    %c8_i32_48 = arith.constant 8 : i32
    %57 = arith.muli %c1_i32_47, %c8_i32_48 : i32
    %c0_i32_49 = arith.constant 0 : i32
    %58 = arith.addi %57, %c0_i32_49 : i32
    %59 = arith.index_cast %58 : i32 to index
    %c0_50 = arith.constant 0 : index
    %c0_51 = arith.constant 0 : index
    %60 = vector.load %arg7[%59, %c0_50, %c0_51] : memref<18x18x4xf32, #tpu.memory_space<vmem>>, vector<8x16x4xf32>
    %61 = vector.shape_cast %60 : vector<8x16x4xf32> to vector<128x4xf32>
    %c0_i32_52 = arith.constant 0 : i32
    %62 = arith.addi %57, %c0_i32_52 : i32
    %63 = arith.index_cast %62 : i32 to index
    %c1_53 = arith.constant 1 : index
    %c0_54 = arith.constant 0 : index
    %64 = vector.load %arg7[%63, %c1_53, %c0_54] : memref<18x18x4xf32, #tpu.memory_space<vmem>>, vector<8x16x4xf32>
    %65 = vector.shape_cast %64 : vector<8x16x4xf32> to vector<128x4xf32>
    %c0_i32_55 = arith.constant 0 : i32
    %66 = arith.addi %57, %c0_i32_55 : i32
    %67 = arith.index_cast %66 : i32 to index
    %c2_56 = arith.constant 2 : index
    %c0_57 = arith.constant 0 : index
    %68 = vector.load %arg7[%67, %c2_56, %c0_57] : memref<18x18x4xf32, #tpu.memory_space<vmem>>, vector<8x16x4xf32>
    %69 = vector.shape_cast %68 : vector<8x16x4xf32> to vector<128x4xf32>
    %c1_i32_58 = arith.constant 1 : i32
    %70 = arith.addi %57, %c1_i32_58 : i32
    %71 = arith.index_cast %70 : i32 to index
    %c0_59 = arith.constant 0 : index
    %c0_60 = arith.constant 0 : index
    %72 = vector.load %arg7[%71, %c0_59, %c0_60] : memref<18x18x4xf32, #tpu.memory_space<vmem>>, vector<8x16x4xf32>
    %73 = vector.shape_cast %72 : vector<8x16x4xf32> to vector<128x4xf32>
    %c1_i32_61 = arith.constant 1 : i32
    %74 = arith.addi %57, %c1_i32_61 : i32
    %75 = arith.index_cast %74 : i32 to index
    %c1_62 = arith.constant 1 : index
    %c0_63 = arith.constant 0 : index
    %76 = vector.load %arg7[%75, %c1_62, %c0_63] : memref<18x18x4xf32, #tpu.memory_space<vmem>>, vector<8x16x4xf32>
    %77 = vector.shape_cast %76 : vector<8x16x4xf32> to vector<128x4xf32>
    %c1_i32_64 = arith.constant 1 : i32
    %78 = arith.addi %57, %c1_i32_64 : i32
    %79 = arith.index_cast %78 : i32 to index
    %c2_65 = arith.constant 2 : index
    %c0_66 = arith.constant 0 : index
    %80 = vector.load %arg7[%79, %c2_65, %c0_66] : memref<18x18x4xf32, #tpu.memory_space<vmem>>, vector<8x16x4xf32>
    %81 = vector.shape_cast %80 : vector<8x16x4xf32> to vector<128x4xf32>
    %c2_i32_67 = arith.constant 2 : i32
    %82 = arith.addi %57, %c2_i32_67 : i32
    %83 = arith.index_cast %82 : i32 to index
    %c0_68 = arith.constant 0 : index
    %c0_69 = arith.constant 0 : index
    %84 = vector.load %arg7[%83, %c0_68, %c0_69] : memref<18x18x4xf32, #tpu.memory_space<vmem>>, vector<8x16x4xf32>
    %85 = vector.shape_cast %84 : vector<8x16x4xf32> to vector<128x4xf32>
    %c2_i32_70 = arith.constant 2 : i32
    %86 = arith.addi %57, %c2_i32_70 : i32
    %87 = arith.index_cast %86 : i32 to index
    %c1_71 = arith.constant 1 : index
    %c0_72 = arith.constant 0 : index
    %88 = vector.load %arg7[%87, %c1_71, %c0_72] : memref<18x18x4xf32, #tpu.memory_space<vmem>>, vector<8x16x4xf32>
    %89 = vector.shape_cast %88 : vector<8x16x4xf32> to vector<128x4xf32>
    %c2_i32_73 = arith.constant 2 : i32
    %90 = arith.addi %57, %c2_i32_73 : i32
    %91 = arith.index_cast %90 : i32 to index
    %c2_74 = arith.constant 2 : index
    %c0_75 = arith.constant 0 : index
    %92 = vector.load %arg7[%91, %c2_74, %c0_75] : memref<18x18x4xf32, #tpu.memory_space<vmem>>, vector<8x16x4xf32>
    %93 = vector.shape_cast %92 : vector<8x16x4xf32> to vector<128x4xf32>
    %94 = tpu.concatenate %61, %65, %69, %73, %77, %81, %85, %89, %93 in 1 : vector<128x4xf32>, vector<128x4xf32>, vector<128x4xf32>, vector<128x4xf32>, vector<128x4xf32>, vector<128x4xf32>, vector<128x4xf32>, vector<128x4xf32>, vector<128x4xf32> -> vector<128x36xf32>
    %cst_76 = arith.constant dense<0.000000e+00> : vector<128x128xf32>
    %95 = tpu.matmul %94, %7, %cst_76 {dimension_numbers = #tpu.dot_dimension_numbers<[1], [0], [0], [1], [0, 0, 1, 1], [], []>} : vector<128x36xf32>, vector<36x128xf32>, vector<128x128xf32> -> vector<128x128xf32>
    %96 = vector.broadcast %8 : vector<1x128xf32> to vector<128x128xf32>
    %97 = arith.addf %95, %96 : vector<128x128xf32>
    %cst_77 = arith.constant 0.000000e+00 : f32
    %98 = vector.broadcast %cst_77 : f32 to vector<128x128xf32>
    %99 = arith.maximumf %97, %98 : vector<128x128xf32>
    %100 = vector.shape_cast %99 : vector<128x128xf32> to vector<8x16x128xf32>
    %c1_i32_78 = arith.constant 1 : i32
    %101 = arith.addi %57, %c1_i32_78 : i32
    %102 = arith.index_cast %101 : i32 to index
    %c1_79 = arith.constant 1 : index
    %c0_80 = arith.constant 0 : index
    %103 = vector.load %arg8[%102, %c1_79, %c0_80] : memref<18x18x128xf32, #tpu.memory_space<vmem>>, vector<8x16x128xf32>
    tpu.vector_store %arg8[%102, %c1_79, %c0_80], %100 {strides = array<i32>} : memref<18x18x128xf32, #tpu.memory_space<vmem>>, vector<8x16x128xf32>,
    %c2_i32_81 = arith.constant 2 : i32
    %c0_i32_82 = arith.constant 0 : i32
    %c8_i32_83 = arith.constant 8 : i32
    %104 = arith.muli %c0_i32_82, %c8_i32_83 : i32
    %cst_84 = arith.constant 0.000000e+00 : f32
    %105 = vector.broadcast %cst_84 : f32 to vector<128x4xf32>
    %c0_i32_85 = arith.constant 0 : i32
    %106 = arith.addi %104, %c0_i32_85 : i32
    %107 = arith.index_cast %106 : i32 to index
    %c0_86 = arith.constant 0 : index
    %c0_87 = arith.constant 0 : index
    %108 = vector.load %arg8[%107, %c0_86, %c0_87] : memref<18x18x128xf32, #tpu.memory_space<vmem>>, vector<8x16x128xf32>
    %109 = vector.shape_cast %108 : vector<8x16x128xf32> to vector<128x128xf32>
    %c0_88 = arith.constant 0 : index
    %c0_89 = arith.constant 0 : index
    %c0_90 = arith.constant 0 : index
    %110 = vector.load %arg4[%c0_88, %c0_89, %c0_90] : memref<9x128x4xf32, #tpu.memory_space<vmem>>, vector<1x128x4xf32>
    %111 = vector.shape_cast %110 : vector<1x128x4xf32> to vector<128x4xf32>
    %cst_91 = arith.constant dense<0.000000e+00> : vector<128x4xf32>
    %112 = tpu.matmul %109, %111, %cst_91 {dimension_numbers = #tpu.dot_dimension_numbers<[1], [0], [0], [1], [0, 0, 1, 1], [], []>} : vector<128x128xf32>, vector<128x4xf32>, vector<128x4xf32> -> vector<128x4xf32>
    %113 = arith.addf %105, %112 : vector<128x4xf32>
    %c0_i32_92 = arith.constant 0 : i32
    %114 = arith.addi %104, %c0_i32_92 : i32
    %115 = arith.index_cast %114 : i32 to index
    %c1_93 = arith.constant 1 : index
    %c0_94 = arith.constant 0 : index
    %116 = vector.load %arg8[%115, %c1_93, %c0_94] : memref<18x18x128xf32, #tpu.memory_space<vmem>>, vector<8x16x128xf32>
    %117 = vector.shape_cast %116 : vector<8x16x128xf32> to vector<128x128xf32>
    %c1_95 = arith.constant 1 : index
    %c0_96 = arith.constant 0 : index
    %c0_97 = arith.constant 0 : index
    %118 = vector.load %arg4[%c1_95, %c0_96, %c0_97] : memref<9x128x4xf32, #tpu.memory_space<vmem>>, vector<1x128x4xf32>
    %119 = vector.shape_cast %118 : vector<1x128x4xf32> to vector<128x4xf32>
    %cst_98 = arith.constant dense<0.000000e+00> : vector<128x4xf32>
    %120 = tpu.matmul %117, %119, %cst_98 {dimension_numbers = #tpu.dot_dimension_numbers<[1], [0], [0], [1], [0, 0, 1, 1], [], []>} : vector<128x128xf32>, vector<128x4xf32>, vector<128x4xf32> -> vector<128x4xf32>
    %121 = arith.addf %113, %120 : vector<128x4xf32>
    %c0_i32_99 = arith.constant 0 : i32
    %122 = arith.addi %104, %c0_i32_99 : i32
    %123 = arith.index_cast %122 : i32 to index
    %c2_100 = arith.constant 2 : index
    %c0_101 = arith.constant 0 : index
    %124 = vector.load %arg8[%123, %c2_100, %c0_101] : memref<18x18x128xf32, #tpu.memory_space<vmem>>, vector<8x16x128xf32>
    %125 = vector.shape_cast %124 : vector<8x16x128xf32> to vector<128x128xf32>
    %c2_102 = arith.constant 2 : index
    %c0_103 = arith.constant 0 : index
    %c0_104 = arith.constant 0 : index
    %126 = vector.load %arg4[%c2_102, %c0_103, %c0_104] : memref<9x128x4xf32, #tpu.memory_space<vmem>>, vector<1x128x4xf32>
    %127 = vector.shape_cast %126 : vector<1x128x4xf32> to vector<128x4xf32>
    %cst_105 = arith.constant dense<0.000000e+00> : vector<128x4xf32>
    %128 = tpu.matmul %125, %127, %cst_105 {dimension_numbers = #tpu.dot_dimension_numbers<[1], [0], [0], [1], [0, 0, 1, 1], [], []>} : vector<128x128xf32>, vector<128x4xf32>, vector<128x4xf32> -> vector<128x4xf32>
    %129 = arith.addf %121, %128 : vector<128x4xf32>
    %c1_i32_106 = arith.constant 1 : i32
    %130 = arith.addi %104, %c1_i32_106 : i32
    %131 = arith.index_cast %130 : i32 to index
    %c0_107 = arith.constant 0 : index
    %c0_108 = arith.constant 0 : index
    %132 = vector.load %arg8[%131, %c0_107, %c0_108] : memref<18x18x128xf32, #tpu.memory_space<vmem>>, vector<8x16x128xf32>
    %133 = vector.shape_cast %132 : vector<8x16x128xf32> to vector<128x128xf32>
    %c3 = arith.constant 3 : index
    %c0_109 = arith.constant 0 : index
    %c0_110 = arith.constant 0 : index
    %134 = vector.load %arg4[%c3, %c0_109, %c0_110] : memref<9x128x4xf32, #tpu.memory_space<vmem>>, vector<1x128x4xf32>
    %135 = vector.shape_cast %134 : vector<1x128x4xf32> to vector<128x4xf32>
    %cst_111 = arith.constant dense<0.000000e+00> : vector<128x4xf32>
    %136 = tpu.matmul %133, %135, %cst_111 {dimension_numbers = #tpu.dot_dimension_numbers<[1], [0], [0], [1], [0, 0, 1, 1], [], []>} : vector<128x128xf32>, vector<128x4xf32>, vector<128x4xf32> -> vector<128x4xf32>
    %137 = arith.addf %129, %136 : vector<128x4xf32>
    %c1_i32_112 = arith.constant 1 : i32
    %138 = arith.addi %104, %c1_i32_112 : i32
    %139 = arith.index_cast %138 : i32 to index
    %c1_113 = arith.constant 1 : index
    %c0_114 = arith.constant 0 : index
    %140 = vector.load %arg8[%139, %c1_113, %c0_114] : memref<18x18x128xf32, #tpu.memory_space<vmem>>, vector<8x16x128xf32>
    %141 = vector.shape_cast %140 : vector<8x16x128xf32> to vector<128x128xf32>
    %c4 = arith.constant 4 : index
    %c0_115 = arith.constant 0 : index
    %c0_116 = arith.constant 0 : index
    %142 = vector.load %arg4[%c4, %c0_115, %c0_116] : memref<9x128x4xf32, #tpu.memory_space<vmem>>, vector<1x128x4xf32>
    %143 = vector.shape_cast %142 : vector<1x128x4xf32> to vector<128x4xf32>
    %cst_117 = arith.constant dense<0.000000e+00> : vector<128x4xf32>
    %144 = tpu.matmul %141, %143, %cst_117 {dimension_numbers = #tpu.dot_dimension_numbers<[1], [0], [0], [1], [0, 0, 1, 1], [], []>} : vector<128x128xf32>, vector<128x4xf32>, vector<128x4xf32> -> vector<128x4xf32>
    %145 = arith.addf %137, %144 : vector<128x4xf32>
    %c1_i32_118 = arith.constant 1 : i32
    %146 = arith.addi %104, %c1_i32_118 : i32
    %147 = arith.index_cast %146 : i32 to index
    %c2_119 = arith.constant 2 : index
    %c0_120 = arith.constant 0 : index
    %148 = vector.load %arg8[%147, %c2_119, %c0_120] : memref<18x18x128xf32, #tpu.memory_space<vmem>>, vector<8x16x128xf32>
    %149 = vector.shape_cast %148 : vector<8x16x128xf32> to vector<128x128xf32>
    %c5 = arith.constant 5 : index
    %c0_121 = arith.constant 0 : index
    %c0_122 = arith.constant 0 : index
    %150 = vector.load %arg4[%c5, %c0_121, %c0_122] : memref<9x128x4xf32, #tpu.memory_space<vmem>>, vector<1x128x4xf32>
    %151 = vector.shape_cast %150 : vector<1x128x4xf32> to vector<128x4xf32>
    %cst_123 = arith.constant dense<0.000000e+00> : vector<128x4xf32>
    %152 = tpu.matmul %149, %151, %cst_123 {dimension_numbers = #tpu.dot_dimension_numbers<[1], [0], [0], [1], [0, 0, 1, 1], [], []>} : vector<128x128xf32>, vector<128x4xf32>, vector<128x4xf32> -> vector<128x4xf32>
    %153 = arith.addf %145, %152 : vector<128x4xf32>
    %c2_i32_124 = arith.constant 2 : i32
    %154 = arith.addi %104, %c2_i32_124 : i32
    %155 = arith.index_cast %154 : i32 to index
    %c0_125 = arith.constant 0 : index
    %c0_126 = arith.constant 0 : index
    %156 = vector.load %arg8[%155, %c0_125, %c0_126] : memref<18x18x128xf32, #tpu.memory_space<vmem>>, vector<8x16x128xf32>
    %157 = vector.shape_cast %156 : vector<8x16x128xf32> to vector<128x128xf32>
    %c6 = arith.constant 6 : index
    %c0_127 = arith.constant 0 : index
    %c0_128 = arith.constant 0 : index
    %158 = vector.load %arg4[%c6, %c0_127, %c0_128] : memref<9x128x4xf32, #tpu.memory_space<vmem>>, vector<1x128x4xf32>
    %159 = vector.shape_cast %158 : vector<1x128x4xf32> to vector<128x4xf32>
    %cst_129 = arith.constant dense<0.000000e+00> : vector<128x4xf32>
    %160 = tpu.matmul %157, %159, %cst_129 {dimension_numbers = #tpu.dot_dimension_numbers<[1], [0], [0], [1], [0, 0, 1, 1], [], []>} : vector<128x128xf32>, vector<128x4xf32>, vector<128x4xf32> -> vector<128x4xf32>
    %161 = arith.addf %153, %160 : vector<128x4xf32>
    %c2_i32_130 = arith.constant 2 : i32
    %162 = arith.addi %104, %c2_i32_130 : i32
    %163 = arith.index_cast %162 : i32 to index
    %c1_131 = arith.constant 1 : index
    %c0_132 = arith.constant 0 : index
    %164 = vector.load %arg8[%163, %c1_131, %c0_132] : memref<18x18x128xf32, #tpu.memory_space<vmem>>, vector<8x16x128xf32>
    %165 = vector.shape_cast %164 : vector<8x16x128xf32> to vector<128x128xf32>
    %c7 = arith.constant 7 : index
    %c0_133 = arith.constant 0 : index
    %c0_134 = arith.constant 0 : index
    %166 = vector.load %arg4[%c7, %c0_133, %c0_134] : memref<9x128x4xf32, #tpu.memory_space<vmem>>, vector<1x128x4xf32>
    %167 = vector.shape_cast %166 : vector<1x128x4xf32> to vector<128x4xf32>
    %cst_135 = arith.constant dense<0.000000e+00> : vector<128x4xf32>
    %168 = tpu.matmul %165, %167, %cst_135 {dimension_numbers = #tpu.dot_dimension_numbers<[1], [0], [0], [1], [0, 0, 1, 1], [], []>} : vector<128x128xf32>, vector<128x4xf32>, vector<128x4xf32> -> vector<128x4xf32>
    %169 = arith.addf %161, %168 : vector<128x4xf32>
    %c2_i32_136 = arith.constant 2 : i32
    %170 = arith.addi %104, %c2_i32_136 : i32
    %171 = arith.index_cast %170 : i32 to index
    %c2_137 = arith.constant 2 : index
    %c0_138 = arith.constant 0 : index
    %172 = vector.load %arg8[%171, %c2_137, %c0_138] : memref<18x18x128xf32, #tpu.memory_space<vmem>>, vector<8x16x128xf32>
    %173 = vector.shape_cast %172 : vector<8x16x128xf32> to vector<128x128xf32>
    %c8 = arith.constant 8 : index
    %c0_139 = arith.constant 0 : index
    %c0_140 = arith.constant 0 : index
    %174 = vector.load %arg4[%c8, %c0_139, %c0_140] : memref<9x128x4xf32, #tpu.memory_space<vmem>>, vector<1x128x4xf32>
    %175 = vector.shape_cast %174 : vector<1x128x4xf32> to vector<128x4xf32>
    %cst_141 = arith.constant dense<0.000000e+00> : vector<128x4xf32>
    %176 = tpu.matmul %173, %175, %cst_141 {dimension_numbers = #tpu.dot_dimension_numbers<[1], [0], [0], [1], [0, 0, 1, 1], [], []>} : vector<128x128xf32>, vector<128x4xf32>, vector<128x4xf32> -> vector<128x4xf32>
    %177 = arith.addf %169, %176 : vector<128x4xf32>
    %c0_142 = arith.constant 0 : index
    %178 = arith.index_cast %104 : i32 to index
    %c0_143 = arith.constant 0 : index
    %c0_144 = arith.constant 0 : index
    %179 = vector.load %arg1[%c0_142, %178, %c0_143, %c0_144] : memref<1x16x16x4xf32, #tpu.memory_space<vmem>>, vector<1x8x16x4xf32>
    %180 = vector.shape_cast %179 : vector<1x8x16x4xf32> to vector<8x16x4xf32>
    %181 = vector.broadcast %9 : vector<1x4xf32> to vector<128x4xf32>
    %182 = arith.addf %177, %181 : vector<128x4xf32>
    %183 = vector.shape_cast %182 : vector<128x4xf32> to vector<8x16x4xf32>
    %184 = arith.addf %183, %180 : vector<8x16x4xf32>
    %c0_145 = arith.constant 0 : index
    %185 = arith.index_cast %104 : i32 to index
    %c0_146 = arith.constant 0 : index
    %c0_147 = arith.constant 0 : index
    %186 = vector.load %arg6[%c0_145, %185, %c0_146, %c0_147] : memref<1x16x16x4xf32, #tpu.memory_space<vmem>>, vector<1x8x16x4xf32>
    %187 = vector.shape_cast %186 : vector<1x8x16x4xf32> to vector<8x16x4xf32>
    %188 = vector.shape_cast %184 : vector<8x16x4xf32> to vector<1x8x16x4xf32>
    tpu.vector_store %arg6[%c0_145, %185, %c0_146, %c0_147], %188 {strides = array<i32>} : memref<1x16x16x4xf32, #tpu.memory_space<vmem>>, vector<1x8x16x4xf32>,
    %c1_i32_148 = arith.constant 1 : i32
    %c8_i32_149 = arith.constant 8 : i32
    %189 = arith.muli %c1_i32_148, %c8_i32_149 : i32
    %cst_150 = arith.constant 0.000000e+00 : f32
    %190 = vector.broadcast %cst_150 : f32 to vector<128x4xf32>
    %c0_i32_151 = arith.constant 0 : i32
    %191 = arith.addi %189, %c0_i32_151 : i32
    %192 = arith.index_cast %191 : i32 to index
    %c0_152 = arith.constant 0 : index
    %c0_153 = arith.constant 0 : index
    %193 = vector.load %arg8[%192, %c0_152, %c0_153] : memref<18x18x128xf32, #tpu.memory_space<vmem>>, vector<8x16x128xf32>
    %194 = vector.shape_cast %193 : vector<8x16x128xf32> to vector<128x128xf32>
    %c0_154 = arith.constant 0 : index
    %c0_155 = arith.constant 0 : index
    %c0_156 = arith.constant 0 : index
    %195 = vector.load %arg4[%c0_154, %c0_155, %c0_156] : memref<9x128x4xf32, #tpu.memory_space<vmem>>, vector<1x128x4xf32>
    %196 = vector.shape_cast %195 : vector<1x128x4xf32> to vector<128x4xf32>
    %cst_157 = arith.constant dense<0.000000e+00> : vector<128x4xf32>
    %197 = tpu.matmul %194, %196, %cst_157 {dimension_numbers = #tpu.dot_dimension_numbers<[1], [0], [0], [1], [0, 0, 1, 1], [], []>} : vector<128x128xf32>, vector<128x4xf32>, vector<128x4xf32> -> vector<128x4xf32>
    %198 = arith.addf %190, %197 : vector<128x4xf32>
    %c0_i32_158 = arith.constant 0 : i32
    %199 = arith.addi %189, %c0_i32_158 : i32
    %200 = arith.index_cast %199 : i32 to index
    %c1_159 = arith.constant 1 : index
    %c0_160 = arith.constant 0 : index
    %201 = vector.load %arg8[%200, %c1_159, %c0_160] : memref<18x18x128xf32, #tpu.memory_space<vmem>>, vector<8x16x128xf32>
    %202 = vector.shape_cast %201 : vector<8x16x128xf32> to vector<128x128xf32>
    %c1_161 = arith.constant 1 : index
    %c0_162 = arith.constant 0 : index
    %c0_163 = arith.constant 0 : index
    %203 = vector.load %arg4[%c1_161, %c0_162, %c0_163] : memref<9x128x4xf32, #tpu.memory_space<vmem>>, vector<1x128x4xf32>
    %204 = vector.shape_cast %203 : vector<1x128x4xf32> to vector<128x4xf32>
    %cst_164 = arith.constant dense<0.000000e+00> : vector<128x4xf32>
    %205 = tpu.matmul %202, %204, %cst_164 {dimension_numbers = #tpu.dot_dimension_numbers<[1], [0], [0], [1], [0, 0, 1, 1], [], []>} : vector<128x128xf32>, vector<128x4xf32>, vector<128x4xf32> -> vector<128x4xf32>
    %206 = arith.addf %198, %205 : vector<128x4xf32>
    %c0_i32_165 = arith.constant 0 : i32
    %207 = arith.addi %189, %c0_i32_165 : i32
    %208 = arith.index_cast %207 : i32 to index
    %c2_166 = arith.constant 2 : index
    %c0_167 = arith.constant 0 : index
    %209 = vector.load %arg8[%208, %c2_166, %c0_167] : memref<18x18x128xf32, #tpu.memory_space<vmem>>, vector<8x16x128xf32>
    %210 = vector.shape_cast %209 : vector<8x16x128xf32> to vector<128x128xf32>
    %c2_168 = arith.constant 2 : index
    %c0_169 = arith.constant 0 : index
    %c0_170 = arith.constant 0 : index
    %211 = vector.load %arg4[%c2_168, %c0_169, %c0_170] : memref<9x128x4xf32, #tpu.memory_space<vmem>>, vector<1x128x4xf32>
    %212 = vector.shape_cast %211 : vector<1x128x4xf32> to vector<128x4xf32>
    %cst_171 = arith.constant dense<0.000000e+00> : vector<128x4xf32>
    %213 = tpu.matmul %210, %212, %cst_171 {dimension_numbers = #tpu.dot_dimension_numbers<[1], [0], [0], [1], [0, 0, 1, 1], [], []>} : vector<128x128xf32>, vector<128x4xf32>, vector<128x4xf32> -> vector<128x4xf32>
    %214 = arith.addf %206, %213 : vector<128x4xf32>
    %c1_i32_172 = arith.constant 1 : i32
    %215 = arith.addi %189, %c1_i32_172 : i32
    %216 = arith.index_cast %215 : i32 to index
    %c0_173 = arith.constant 0 : index
    %c0_174 = arith.constant 0 : index
    %217 = vector.load %arg8[%216, %c0_173, %c0_174] : memref<18x18x128xf32, #tpu.memory_space<vmem>>, vector<8x16x128xf32>
    %218 = vector.shape_cast %217 : vector<8x16x128xf32> to vector<128x128xf32>
    %c3_175 = arith.constant 3 : index
    %c0_176 = arith.constant 0 : index
    %c0_177 = arith.constant 0 : index
    %219 = vector.load %arg4[%c3_175, %c0_176, %c0_177] : memref<9x128x4xf32, #tpu.memory_space<vmem>>, vector<1x128x4xf32>
    %220 = vector.shape_cast %219 : vector<1x128x4xf32> to vector<128x4xf32>
    %cst_178 = arith.constant dense<0.000000e+00> : vector<128x4xf32>
    %221 = tpu.matmul %218, %220, %cst_178 {dimension_numbers = #tpu.dot_dimension_numbers<[1], [0], [0], [1], [0, 0, 1, 1], [], []>} : vector<128x128xf32>, vector<128x4xf32>, vector<128x4xf32> -> vector<128x4xf32>
    %222 = arith.addf %214, %221 : vector<128x4xf32>
    %c1_i32_179 = arith.constant 1 : i32
    %223 = arith.addi %189, %c1_i32_179 : i32
    %224 = arith.index_cast %223 : i32 to index
    %c1_180 = arith.constant 1 : index
    %c0_181 = arith.constant 0 : index
    %225 = vector.load %arg8[%224, %c1_180, %c0_181] : memref<18x18x128xf32, #tpu.memory_space<vmem>>, vector<8x16x128xf32>
    %226 = vector.shape_cast %225 : vector<8x16x128xf32> to vector<128x128xf32>
    %c4_182 = arith.constant 4 : index
    %c0_183 = arith.constant 0 : index
    %c0_184 = arith.constant 0 : index
    %227 = vector.load %arg4[%c4_182, %c0_183, %c0_184] : memref<9x128x4xf32, #tpu.memory_space<vmem>>, vector<1x128x4xf32>
    %228 = vector.shape_cast %227 : vector<1x128x4xf32> to vector<128x4xf32>
    %cst_185 = arith.constant dense<0.000000e+00> : vector<128x4xf32>
    %229 = tpu.matmul %226, %228, %cst_185 {dimension_numbers = #tpu.dot_dimension_numbers<[1], [0], [0], [1], [0, 0, 1, 1], [], []>} : vector<128x128xf32>, vector<128x4xf32>, vector<128x4xf32> -> vector<128x4xf32>
    %230 = arith.addf %222, %229 : vector<128x4xf32>
    %c1_i32_186 = arith.constant 1 : i32
    %231 = arith.addi %189, %c1_i32_186 : i32
    %232 = arith.index_cast %231 : i32 to index
    %c2_187 = arith.constant 2 : index
    %c0_188 = arith.constant 0 : index
    %233 = vector.load %arg8[%232, %c2_187, %c0_188] : memref<18x18x128xf32, #tpu.memory_space<vmem>>, vector<8x16x128xf32>
    %234 = vector.shape_cast %233 : vector<8x16x128xf32> to vector<128x128xf32>
    %c5_189 = arith.constant 5 : index
    %c0_190 = arith.constant 0 : index
    %c0_191 = arith.constant 0 : index
    %235 = vector.load %arg4[%c5_189, %c0_190, %c0_191] : memref<9x128x4xf32, #tpu.memory_space<vmem>>, vector<1x128x4xf32>
    %236 = vector.shape_cast %235 : vector<1x128x4xf32> to vector<128x4xf32>
    %cst_192 = arith.constant dense<0.000000e+00> : vector<128x4xf32>
    %237 = tpu.matmul %234, %236, %cst_192 {dimension_numbers = #tpu.dot_dimension_numbers<[1], [0], [0], [1], [0, 0, 1, 1], [], []>} : vector<128x128xf32>, vector<128x4xf32>, vector<128x4xf32> -> vector<128x4xf32>
    %238 = arith.addf %230, %237 : vector<128x4xf32>
    %c2_i32_193 = arith.constant 2 : i32
    %239 = arith.addi %189, %c2_i32_193 : i32
    %240 = arith.index_cast %239 : i32 to index
    %c0_194 = arith.constant 0 : index
    %c0_195 = arith.constant 0 : index
    %241 = vector.load %arg8[%240, %c0_194, %c0_195] : memref<18x18x128xf32, #tpu.memory_space<vmem>>, vector<8x16x128xf32>
    %242 = vector.shape_cast %241 : vector<8x16x128xf32> to vector<128x128xf32>
    %c6_196 = arith.constant 6 : index
    %c0_197 = arith.constant 0 : index
    %c0_198 = arith.constant 0 : index
    %243 = vector.load %arg4[%c6_196, %c0_197, %c0_198] : memref<9x128x4xf32, #tpu.memory_space<vmem>>, vector<1x128x4xf32>
    %244 = vector.shape_cast %243 : vector<1x128x4xf32> to vector<128x4xf32>
    %cst_199 = arith.constant dense<0.000000e+00> : vector<128x4xf32>
    %245 = tpu.matmul %242, %244, %cst_199 {dimension_numbers = #tpu.dot_dimension_numbers<[1], [0], [0], [1], [0, 0, 1, 1], [], []>} : vector<128x128xf32>, vector<128x4xf32>, vector<128x4xf32> -> vector<128x4xf32>
    %246 = arith.addf %238, %245 : vector<128x4xf32>
    %c2_i32_200 = arith.constant 2 : i32
    %247 = arith.addi %189, %c2_i32_200 : i32
    %248 = arith.index_cast %247 : i32 to index
    %c1_201 = arith.constant 1 : index
    %c0_202 = arith.constant 0 : index
    %249 = vector.load %arg8[%248, %c1_201, %c0_202] : memref<18x18x128xf32, #tpu.memory_space<vmem>>, vector<8x16x128xf32>
    %250 = vector.shape_cast %249 : vector<8x16x128xf32> to vector<128x128xf32>
    %c7_203 = arith.constant 7 : index
    %c0_204 = arith.constant 0 : index
    %c0_205 = arith.constant 0 : index
    %251 = vector.load %arg4[%c7_203, %c0_204, %c0_205] : memref<9x128x4xf32, #tpu.memory_space<vmem>>, vector<1x128x4xf32>
    %252 = vector.shape_cast %251 : vector<1x128x4xf32> to vector<128x4xf32>
    %cst_206 = arith.constant dense<0.000000e+00> : vector<128x4xf32>
    %253 = tpu.matmul %250, %252, %cst_206 {dimension_numbers = #tpu.dot_dimension_numbers<[1], [0], [0], [1], [0, 0, 1, 1], [], []>} : vector<128x128xf32>, vector<128x4xf32>, vector<128x4xf32> -> vector<128x4xf32>
    %254 = arith.addf %246, %253 : vector<128x4xf32>
    %c2_i32_207 = arith.constant 2 : i32
    %255 = arith.addi %189, %c2_i32_207 : i32
    %256 = arith.index_cast %255 : i32 to index
    %c2_208 = arith.constant 2 : index
    %c0_209 = arith.constant 0 : index
    %257 = vector.load %arg8[%256, %c2_208, %c0_209] : memref<18x18x128xf32, #tpu.memory_space<vmem>>, vector<8x16x128xf32>
    %258 = vector.shape_cast %257 : vector<8x16x128xf32> to vector<128x128xf32>
    %c8_210 = arith.constant 8 : index
    %c0_211 = arith.constant 0 : index
    %c0_212 = arith.constant 0 : index
    %259 = vector.load %arg4[%c8_210, %c0_211, %c0_212] : memref<9x128x4xf32, #tpu.memory_space<vmem>>, vector<1x128x4xf32>
    %260 = vector.shape_cast %259 : vector<1x128x4xf32> to vector<128x4xf32>
    %cst_213 = arith.constant dense<0.000000e+00> : vector<128x4xf32>
    %261 = tpu.matmul %258, %260, %cst_213 {dimension_numbers = #tpu.dot_dimension_numbers<[1], [0], [0], [1], [0, 0, 1, 1], [], []>} : vector<128x128xf32>, vector<128x4xf32>, vector<128x4xf32> -> vector<128x4xf32>
    %262 = arith.addf %254, %261 : vector<128x4xf32>
    %c0_214 = arith.constant 0 : index
    %263 = arith.index_cast %189 : i32 to index
    %c0_215 = arith.constant 0 : index
    %c0_216 = arith.constant 0 : index
    %264 = vector.load %arg1[%c0_214, %263, %c0_215, %c0_216] : memref<1x16x16x4xf32, #tpu.memory_space<vmem>>, vector<1x8x16x4xf32>
    %265 = vector.shape_cast %264 : vector<1x8x16x4xf32> to vector<8x16x4xf32>
    %266 = vector.broadcast %9 : vector<1x4xf32> to vector<128x4xf32>
    %267 = arith.addf %262, %266 : vector<128x4xf32>
    %268 = vector.shape_cast %267 : vector<128x4xf32> to vector<8x16x4xf32>
    %269 = arith.addf %268, %265 : vector<8x16x4xf32>
    %c0_217 = arith.constant 0 : index
    %270 = arith.index_cast %189 : i32 to index
    %c0_218 = arith.constant 0 : index
    %c0_219 = arith.constant 0 : index
    %271 = vector.load %arg6[%c0_217, %270, %c0_218, %c0_219] : memref<1x16x16x4xf32, #tpu.memory_space<vmem>>, vector<1x8x16x4xf32>
    %272 = vector.shape_cast %271 : vector<1x8x16x4xf32> to vector<8x16x4xf32>
    %273 = vector.shape_cast %269 : vector<8x16x4xf32> to vector<1x8x16x4xf32>
    tpu.vector_store %arg6[%c0_217, %270, %c0_218, %c0_219], %273 {strides = array<i32>} : memref<1x16x16x4xf32, #tpu.memory_space<vmem>>, vector<1x8x16x4xf32>,
    %c2_i32_220 = arith.constant 2 : i32
    return
  }
  func.func @transform_0(%arg0: i32) -> (i32, i32, i32, i32) {
    %c0_i32 = arith.constant 0 : i32
    %c0_i32_0 = arith.constant 0 : i32
    %c0_i32_1 = arith.constant 0 : i32
    %c0_i32_2 = arith.constant 0 : i32
    return %arg0, %c0_i32, %c0_i32_0, %c0_i32_1 : i32, i32, i32, i32
  }
  func.func @transform_1(%arg0: i32) -> (i32, i32) {
    %c0_i32 = arith.constant 0 : i32
    %c0_i32_0 = arith.constant 0 : i32
    %c0_i32_1 = arith.constant 0 : i32
    return %c0_i32, %c0_i32_0 : i32, i32
  }
  func.func @transform_2(%arg0: i32) -> (i32, i32) {
    %c0_i32 = arith.constant 0 : i32
    %c0_i32_0 = arith.constant 0 : i32
    %c0_i32_1 = arith.constant 0 : i32
    return %c0_i32, %c0_i32_0 : i32, i32
  }
  func.func @transform_3(%arg0: i32) -> (i32, i32, i32) {
    %c0_i32 = arith.constant 0 : i32
    %c0_i32_0 = arith.constant 0 : i32
    %c0_i32_1 = arith.constant 0 : i32
    %c0_i32_2 = arith.constant 0 : i32
    return %c0_i32, %c0_i32_0, %c0_i32_1 : i32, i32, i32
  }
  func.func @transform_4(%arg0: i32) -> (i32, i32) {
    %c0_i32 = arith.constant 0 : i32
    %c0_i32_0 = arith.constant 0 : i32
    %c0_i32_1 = arith.constant 0 : i32
    return %c0_i32, %c0_i32_0 : i32, i32
  }
  func.func @transform_5(%arg0: i32) -> (i32, i32, i32, i32) {
    %c0_i32 = arith.constant 0 : i32
    %c0_i32_0 = arith.constant 0 : i32
    %c0_i32_1 = arith.constant 0 : i32
    %c0_i32_2 = arith.constant 0 : i32
    return %arg0, %c0_i32, %c0_i32_0, %c0_i32_1 : i32, i32, i32, i32
  }
}

</mosaic_0001>

<bundles_post_ra>
// kernel: iclr_block_forward.1
= control target key start
LH: loop header
LB: loop body
LE: loop exit
PB: predicated region body
PF: predicated region fallthrough
CT: control target
= control target key end

     0   :  { %s4892_s18 = smov 0   ;;  %s8167_s0 = inlined_call_operand.vmem [shape: f32[2,16,16,4], index: 0, kind: input, shape index: {}]   ;;  %s8168_s1 = inlined_call_operand.vmem [shape: f32[36,128], index: 1, kind: input, shape index: {}]   ;;  %s8169_s2 = inlined_call_operand.vmem [shape: f32[1,128], index: 2, kind: input, shape index: {}]   ;;  %s8170_s3 = inlined_call_operand.vmem [shape: f32[9,128,4], index: 3, kind: input, shape index: {}]   ;;  %s8171_s4 = inlined_call_operand.vmem [shape: f32[1,4], index: 4, kind: input, shape index: {}]   ;;  %s8172_s5 = inlined_call_operand.vmem [shape: f32[2,16,16,4], index: 5, kind: output, shape index: {}]  }
   0x1 LB: > { %s4455_s19 = sadd.s32 4294967295, %s4851_s18   ;;  %p4459_p0 = scmp.ge.s32.totalorder %s4851_s18, 1  ;;  %s4851_s18 = sphi %s4892_s18, %s15_s18  }
   0x2   : > { %p187_p1 = scmp.lt.s32.totalorder %s4851_s18, 3 }
   0x4   : > { %p188_p2 = pnand %p4459_p0, %p187_p1 }
   0x6   : > { %191 = sbr.rel (%p188_p2) target bundleno = 1553 (0x611), region = 40 }
   0xb   : > { %vm225_vm0 = vcmask 31744   ;;  %v4853_v0 = vmov 0.0   ;;  %s4854_s20 = smov 4   ;;  %s4855_s21 = smov 8   ;;  %vm228_vm1 = vcmask 25600   ;;  %vm1251_vm2 = vcmask 1043456  }
   0xc   : > { %226 = vst.msk [vmem:[#allocation2] sm:$0xff] %vm225_vm0, %v4853_v0  ;;  %p215_p3 = scmp.lt.s32.totalorder %s4455_s19, 1  ;;  %s4856_s26 = smov 12   ;;  %v404_v32 = vld [vmem:[%s8168_s1 + $0x20] sm:$0xf]  ;;  %v403_v34 = vld [vmem:[%s8168_s1 + $0x18] sm:$0xff] }
   0xd   : > { %227 = vst.msk [vmem:[#allocation2 + $0x8] sm:$0xff] %vm225_vm0, %v4853_v0  ;;  %s4857_s27 = smov 28   ;;  %s4858_s28 = smov 16   ;;  %4464 = vmatpush.msk.msra.mxu0 %vm1251_vm2, %v404_v32  ;;  %4481 = vmatpush.msk.msra.mxu1 %vm1251_vm2, %v404_v32  ;;  %v402_v36 = vld [vmem:[%s8168_s1 + $0x10] sm:$0xff]  ;;  %v401_v37 = vld [vmem:[%s8168_s1 + $0x8] sm:$0xff]  ;;  %v400_v38 = vld [vmem:[%s8168_s1] sm:$0xff] }
   0xe   : > { %230 = vst.msk [vmem:[#allocation2 + $0x18] sm:$0xff] %vm225_vm0, %v4853_v0  ;;  %s8365_s19 = smov (!%p215_p3, %s4455_s19), 1  ;;  %s4859_s29 = smov 32   ;;  %vm1080_vm3 = vcmask 64512   ;;  %vm1097_vm4 = vcmask 97280   ;;  %vm1114_vm5 = vcmask 130048  }
   0xf   : > { %231 = vst.msk [vmem:[#allocation2 + $0x20] sm:$0xff] %vm225_vm0, %v4853_v0  ;;  %s4788_s22 = sshll.u32 %s8365_s19, 8  ;;  %s4860_s30 = smov 20   ;;  %1267 = vmatpush.msra.mxu0 %v403_v34  ;;  %2200 = vmatpush.msra.mxu1 %v403_v34  ;;  %vm1131_vm6 = vcmask 162816   ;;  %vm1148_vm7 = vcmask 195584   ;;  %vm1165_vm8 = vcmask 228352  }
  0x10   : > { %233 = vst.msk [vmem:[#allocation2 + $0x30] sm:$0xff] %vm225_vm0, %v4853_v0  ;;  %s5035_s25 = scalar_lea.vmem %s8167_s0, %s4788_s22  ;;  %s4861_s6 = smov 24   ;;  %vm1182_vm9 = vcmask 261120   ;;  %vm1202_vm10 = vcmask 293888  }
  0x11   : > { %234 = vst.msk [vmem:[#allocation2 + $0x38] sm:$0xff] %vm225_vm0, %v4853_v0  ;;  %v335_v3 = vld [vmem:[%s5035_s25] sm:$0xff]  ;;  %v337_v4 = vld [vmem:[%s5035_s25 + $0x10] sm:$0xff]  ;;  %v338_v5 = vld [vmem:[%s5035_s25 + $0x18] sm:$0xff]  ;;  %1268 = vmatpush.msra.mxu0 %v402_v36  ;;  %2201 = vmatpush.msra.mxu1 %v402_v36 }
  0x12   : > { %236 = vst.msk [vmem:[#allocation2 + $0x48] sm:$0xff] %vm225_vm0, %v4853_v0  ;;  %v336_v10 = vld [vmem:[%s5035_s25 + $0x8] sm:$0xff]  ;;  %v339_v11 = vld [vmem:[%s5035_s25 + $0x20] sm:$0xff]  ;;  %v341_v25 = vld [vmem:[%s5035_s25 + $0x30] sm:$0xff] }
  0x13   : > { %237 = vst.msk [vmem:[#allocation2 + $0x50] sm:$0xff] %vm225_vm0, %v4853_v0  ;;  %v340_v20 = vld [vmem:[%s5035_s25 + $0x28] sm:$0xff]  ;;  %v342_v26 = vld [vmem:[%s5035_s25 + $0x38] sm:$0xff]  ;;  %v343_v39 = vld [vmem:[%s5035_s25 + $0x40] sm:$0xff]  ;;  %1269 = vmatpush.msra.mxu0 %v401_v37  ;;  %2202 = vmatpush.msra.mxu1 %v401_v37 }
  0x14   : > { %v423_v1 = vld [vmem:[#allocation2 + $0x1] sm:$0xff]  ;;  %239 = vst.msk [vmem:[#allocation2 + $0x60] sm:$0xff] %vm225_vm0, %v4853_v0 }
  0x15   : > { %568 = vrot.lane.b32.xlu0 %v423_v1, %s4854_s20  ;;  %240 = vst.msk [vmem:[#allocation2 + $0x68] sm:$0xff] %vm225_vm0, %v4853_v0  ;;  %v439_v2 = vld [vmem:[#allocation2 + $0x2] sm:$0xff]  ;;  %1270 = vmatpush.msra.mxu0 %v400_v38 }
  0x16   : > { %242 = vst.msk [vmem:[#allocation2 + $0x78] sm:$0xff] %vm225_vm0, %v4853_v0  ;;  %2203 = vmatpush.msra.mxu1 %v400_v38  ;;  %v344_v41 = vld [vmem:[%s5035_s25 + $0x48] sm:$0xff]  ;;  %v407_v46 = vld [vmem:[#allocation2] sm:$0xff] }
  0x17   : > { %243 = vst.msk [vmem:[#allocation2 + $0x80] sm:$0xff] %vm225_vm0, %v4853_v0  ;;  %v408_v63 = vld [vmem:[#allocation2 + $0x8] sm:$0xff] }
  0x18   : > { %245 = vst.msk [vmem:[#allocation2 + $0x90] sm:$0xff] %vm225_vm0, %v4853_v0 }
  0x19   : > { %246 = vst.msk [vmem:[#allocation2 + $0x98] sm:$0xff] %vm225_vm0, %v4853_v0 }
  0x1a   : > { %248 = vst.msk [vmem:[#allocation2 + $0xa8] sm:$0xff] %vm225_vm0, %v4853_v0 }
  0x1b   : > { %249 = vst.msk [vmem:[#allocation2 + $0xb0] sm:$0xff] %vm225_vm0, %v4853_v0 }
  0x1c   : > { %251 = vst.msk [vmem:[#allocation2 + $0xc0] sm:$0xff] %vm225_vm0, %v4853_v0 }
  0x1d   : > { %252 = vst.msk [vmem:[#allocation2 + $0xc8] sm:$0xff] %vm225_vm0, %v4853_v0  ;;  %632 = vrot.lane.b32.xlu0 %v439_v2, %s4855_s21 }
  0x1e   : > { %254 = vst.msk [vmem:[#allocation2 + $0xd8] sm:$0xff] %vm225_vm0, %v4853_v0 }
  0x1f   : > { %255 = vst.msk [vmem:[#allocation2 + $0xe0] sm:$0xff] %vm225_vm0, %v4853_v0 }
  0x20   : > { %257 = vst.msk [vmem:[#allocation2 + $0xf0] sm:$0xff] %vm225_vm0, %v4853_v0 }
  0x21   : > { %258 = vst.msk [vmem:[#allocation2 + $0xf8] sm:$0xff] %vm225_vm0, %v4853_v0 }
  0x22   : > { %260 = vst.msk [vmem:[#allocation2 + $0x108] sm:$0xff] %vm225_vm0, %v4853_v0 }
  0x23   : > { %261 = vst.msk [vmem:[#allocation2 + $0x110] sm:$0xff] %vm225_vm0, %v4853_v0 }
  0x24   : > { %263 = vst.msk [vmem:[#allocation2 + $0x120] sm:$0xff] %vm225_vm0, %v4853_v0 }
  0x25   : > { %264 = vst.msk [vmem:[#allocation2 + $0x128] sm:$0xff] %vm225_vm0, %v4853_v0 }
  0x26   : > { %266 = vst.msk [vmem:[#allocation2 + $0x138] sm:$0xff] %vm225_vm0, %v4853_v0 }
  0x27   : > { %267 = vst.msk [vmem:[#allocation2 + $0x140] sm:$0xff] %vm225_vm0, %v4853_v0 }
  0x28   : > { %269 = vst.msk [vmem:[#allocation2 + $0x150] sm:$0xff] %vm225_vm0, %v4853_v0 }
  0x29   : > { %270 = vst.msk [vmem:[#allocation2 + $0x158] sm:$0xff] %vm225_vm0, %v4853_v0 }
  0x2a   : > { %272 = vst.msk [vmem:[#allocation2 + $0x168] sm:$0xff] %vm225_vm0, %v4853_v0 }
  0x2b   : > { %273 = vst.msk [vmem:[#allocation2 + $0x170] sm:$0xff] %vm225_vm0, %v4853_v0 }
  0x2c   : > { %275 = vst.msk [vmem:[#allocation2 + $0x180] sm:$0xff] %vm225_vm0, %v4853_v0 }
  0x2d   : > { %276 = vst.msk [vmem:[#allocation2 + $0x188] sm:$0xff] %vm225_vm0, %v4853_v0 }
  0x2e   : > { %278 = vst.msk [vmem:[#allocation2 + $0x198] sm:$0xff] %vm225_vm0, %v4853_v0 }
  0x2f   : > { %279 = vst.msk [vmem:[#allocation2 + $0x1a0] sm:$0xff] %vm225_vm0, %v4853_v0 }
  0x30   : > { %281 = vst [vmem:[#allocation3] sm:$0xff] %v4853_v0 }
  0x31   : > { %282 = vst [vmem:[#allocation3 + $0x8] sm:$0xff] %v4853_v0 }
  0x32   : > { %283 = vst [vmem:[#allocation3 + $0x10] sm:$0x3] %v4853_v0 }
  0x33   : > { %284 = vst [vmem:[#allocation3 + $0x18] sm:$0xff] %v4853_v0 }
  0x34   : > { %285 = vst [vmem:[#allocation3 + $0x20] sm:$0xff] %v4853_v0 }
  0x35   : > { %286 = vst [vmem:[#allocation3 + $0x28] sm:$0x3] %v4853_v0 }
  0x36   : > { %287 = vst [vmem:[#allocation3 + $0x30] sm:$0xff] %v4853_v0 }
  0x37   : > { %288 = vst [vmem:[#allocation3 + $0x38] sm:$0xff] %v4853_v0 }
  0x38   : > { %289 = vst [vmem:[#allocation3 + $0x40] sm:$0x3] %v4853_v0 }
  0x39   : > { %290 = vst [vmem:[#allocation3 + $0x48] sm:$0xff] %v4853_v0 }
  0x3a   : > { %291 = vst [vmem:[#allocation3 + $0x50] sm:$0xff] %v4853_v0 }
  0x3b   : > { %292 = vst [vmem:[#allocation3 + $0x58] sm:$0x3] %v4853_v0 }
  0x3c   : > { %293 = vst [vmem:[#allocation3 + $0x60] sm:$0xff] %v4853_v0 }
  0x3d   : > { %294 = vst [vmem:[#allocation3 + $0x68] sm:$0xff] %v4853_v0 }
  0x3e   : > { %295 = vst [vmem:[#allocation3 + $0x70] sm:$0x3] %v4853_v0 }
  0x3f   : > { %296 = vst [vmem:[#allocation3 + $0x78] sm:$0xff] %v4853_v0 }
  0x40   : > { %297 = vst [vmem:[#allocation3 + $0x80] sm:$0xff] %v4853_v0 }
  0x41   : > { %298 = vst [vmem:[#allocation3 + $0x88] sm:$0x3] %v4853_v0 }
  0x42   : > { %299 = vst [vmem:[#allocation3 + $0x90] sm:$0xff] %v4853_v0 }
  0x43   : > { %300 = vst [vmem:[#allocation3 + $0x98] sm:$0xff] %v4853_v0 }
  0x44   : > { %301 = vst [vmem:[#allocation3 + $0xa0] sm:$0x3] %v4853_v0 }
  0x45   : > { %302 = vst [vmem:[#allocation3 + $0xa8] sm:$0xff] %v4853_v0 }
  0x46   : > { %303 = vst [vmem:[#allocation3 + $0xb0] sm:$0xff] %v4853_v0 }
  0x47   : > { %304 = vst [vmem:[#allocation3 + $0xb8] sm:$0x3] %v4853_v0 }
  0x48   : > { %305 = vst [vmem:[#allocation3 + $0xc0] sm:$0xff] %v4853_v0 }
  0x49   : > { %306 = vst [vmem:[#allocation3 + $0xc8] sm:$0xff] %v4853_v0 }
  0x4a   : > { %307 = vst [vmem:[#allocation3 + $0xd0] sm:$0x3] %v4853_v0 }
  0x4b   : > { %308 = vst [vmem:[#allocation3 + $0xd8] sm:$0xff] %v4853_v0 }
  0x4c   : > { %309 = vst [vmem:[#allocation3 + $0xe0] sm:$0xff] %v4853_v0 }
  0x4d   : > { %310 = vst [vmem:[#allocation3 + $0xe8] sm:$0x3] %v4853_v0 }
  0x4e   : > { %311 = vst [vmem:[#allocation3 + $0xf0] sm:$0xff] %v4853_v0 }
  0x4f   : > { %312 = vst [vmem:[#allocation3 + $0xf8] sm:$0xff] %v4853_v0 }
  0x50   : > { %313 = vst [vmem:[#allocation3 + $0x100] sm:$0x3] %v4853_v0 }
  0x51   : > { %314 = vst [vmem:[#allocation3 + $0x108] sm:$0xff] %v4853_v0 }
  0x52   : > { %315 = vst [vmem:[#allocation3 + $0x110] sm:$0xff] %v4853_v0 }
  0x53   : > { %316 = vst [vmem:[#allocation3 + $0x118] sm:$0x3] %v4853_v0 }
  0x54   : > { %317 = vst [vmem:[#allocation3 + $0x120] sm:$0xff] %v4853_v0 }
  0x55   : > { %318 = vst [vmem:[#allocation3 + $0x128] sm:$0xff] %v4853_v0 }
  0x56   : > { %319 = vst [vmem:[#allocation3 + $0x130] sm:$0x3] %v4853_v0 }
  0x57   : > { %320 = vst [vmem:[#allocation3 + $0x138] sm:$0xff] %v4853_v0 }
  0x58   : > { %321 = vst [vmem:[#allocation3 + $0x140] sm:$0xff] %v4853_v0 }
  0x59   : > { %322 = vst [vmem:[#allocation3 + $0x148] sm:$0x3] %v4853_v0 }
  0x5a   : > { %323 = vst [vmem:[#allocation3 + $0x150] sm:$0xff] %v4853_v0 }
  0x5b   : > { %324 = vst [vmem:[#allocation3 + $0x158] sm:$0xff] %v4853_v0 }
  0x5c   : > { %325 = vst [vmem:[#allocation3 + $0x160] sm:$0x3] %v4853_v0 }
  0x5d   : > { %326 = vst [vmem:[#allocation3 + $0x168] sm:$0xff] %v4853_v0 }
  0x5e   : > { %327 = vst [vmem:[#allocation3 + $0x170] sm:$0xff] %v4853_v0 }
  0x5f   : > { %328 = vst [vmem:[#allocation3 + $0x178] sm:$0x3] %v4853_v0 }
  0x60   : > { %329 = vst [vmem:[#allocation3 + $0x180] sm:$0xff] %v4853_v0 }
  0x61   : > { %330 = vst [vmem:[#allocation3 + $0x188] sm:$0xff] %v4853_v0 }
  0x62   : > { %331 = vst [vmem:[#allocation3 + $0x190] sm:$0x3] %v4853_v0 }
  0x63   : > { %332 = vst [vmem:[#allocation3 + $0x198] sm:$0xff] %v4853_v0 }
  0x64   : > { %333 = vst [vmem:[#allocation3 + $0x1a0] sm:$0xff] %v4853_v0 }
  0x65   : > { %334 = vst [vmem:[#allocation3 + $0x1a8] sm:$0x3] %v4853_v0 }
  0x66   : > { %368 = vst.msk [vmem:[#allocation2 + $0x19] sm:$0xff] %vm225_vm0, %v335_v3 }
  0x67   : > { %370 = vst.msk [vmem:[#allocation2 + $0x31] sm:$0xff] %vm225_vm0, %v337_v4 }
  0x68   : > { %235 = vst.msk [vmem:[#allocation2 + $0x40] sm:$0x3] %vm228_vm1, %v4853_v0 }
  0x69   : > { %371 = vst.msk [vmem:[#allocation2 + $0x39] sm:$0xff] %vm225_vm0, %v338_v5 }
  0x6a   : > { %229 = vst.msk [vmem:[#allocation2 + $0x10] sm:$0x3] %vm228_vm1, %v4853_v0 }
  0x6b   : > { %232 = vst.msk [vmem:[#allocation2 + $0x28] sm:$0x3] %vm228_vm1, %v4853_v0 }
  0x6c   : > { %238 = vst.msk [vmem:[#allocation2 + $0x58] sm:$0x3] %vm228_vm1, %v4853_v0 }
  0x6d   : > { %v5056_v6 = vld [vmem:[#allocation2 + $0x18] sm:$0xff]  ;;  %241 = vst.msk [vmem:[#allocation2 + $0x70] sm:$0x3] %vm228_vm1, %v4853_v0 }
  0x6e   : > { %696 = vrot.lane.b32.xlu1 %v5056_v6, %s4856_s26  ;;  %v5062_v7 = vld [vmem:[#allocation2 + $0x31] sm:$0xff]  ;;  %244 = vst.msk [vmem:[#allocation2 + $0x88] sm:$0x3] %vm228_vm1, %v4853_v0  ;;  %v471_v8 = vld [vmem:[#allocation2 + $0x19] sm:$0xff] }
  0x6f   : > { %952 = vrot.lane.b32.xlu0 %v5062_v7, %s4857_s27  ;;  %247 = vst.msk [vmem:[#allocation2 + $0xa0] sm:$0x3] %vm228_vm1, %v4853_v0  ;;  %v5105_v16 = vld [vmem:[#allocation2 + $0x30] sm:$0xff] }
  0x70   : > { %250 = vst.msk [vmem:[#allocation2 + $0xb8] sm:$0x3] %vm228_vm1, %v4853_v0  ;;  %v536_v12 = vld [vmem:[#allocation2 + $0x32] sm:$0xff]  ;;  %v5107_v17 = vld [vmem:[#allocation2 + $0x3a] sm:$0xff] }
  0x71   : > { %253 = vst.msk [vmem:[#allocation2 + $0xd0] sm:$0x3] %vm228_vm1, %v4853_v0  ;;  %v440_v9 = vld [vmem:[#allocation2 + $0xa] sm:$0xff]  ;;  %v5111_v18 = vld [vmem:[#allocation2 + $0x38] sm:$0xff] }
  0x72   : > { %256 = vst.msk [vmem:[#allocation2 + $0xe8] sm:$0x3] %vm228_vm1, %v4853_v0  ;;  %v424_v19 = vld [vmem:[#allocation2 + $0x9] sm:$0xff]  ;;  %v521_v23 = vld [vmem:[#allocation2 + $0x39] sm:$0xff] }
  0x73   : > { %259 = vst.msk [vmem:[#allocation2 + $0x100] sm:$0x3] %vm228_vm1, %v4853_v0 }
  0x74   : > { %262 = vst.msk [vmem:[#allocation2 + $0x118] sm:$0x3] %vm228_vm1, %v4853_v0 }
  0x75   : > { %265 = vst.msk [vmem:[#allocation2 + $0x130] sm:$0x3] %vm228_vm1, %v4853_v0 }
  0x76   : > { %760 = vrot.lane.b32.xlu1 %v471_v8, %s4858_s28  ;;  %268 = vst.msk [vmem:[#allocation2 + $0x148] sm:$0x3] %vm228_vm1, %v4853_v0 }
  0x77   : > { %271 = vst.msk [vmem:[#allocation2 + $0x160] sm:$0x3] %vm228_vm1, %v4853_v0  ;;  %634 = vrot.lane.b32.xlu0 %v440_v9, %s4855_s21 }
  0x78   : > { %274 = vst.msk [vmem:[#allocation2 + $0x178] sm:$0x3] %vm228_vm1, %v4853_v0 }
  0x79   : > { %277 = vst.msk [vmem:[#allocation2 + $0x190] sm:$0x3] %vm228_vm1, %v4853_v0 }
  0x7a   : > { %280 = vst.msk [vmem:[#allocation2 + $0x1a8] sm:$0x3] %vm228_vm1, %v4853_v0 }
  0x7b   : > { %369 = vst.msk [vmem:[#allocation2 + $0x21] sm:$0xff] %vm225_vm0, %v336_v10 }
  0x7c   : > { %372 = vst.msk [vmem:[#allocation2 + $0x49] sm:$0xff] %vm225_vm0, %v339_v11 }
  0x7d   : > { %373 = vst.msk [vmem:[#allocation2 + $0x51] sm:$0xff] %vm225_vm0, %v340_v20 }
  0x7e   : > { %1016 = vrot.lane.b32.xlu1 %v536_v12, %s4859_s29  ;;  %374 = vst.msk [vmem:[#allocation2 + $0x61] sm:$0xff] %vm225_vm0, %v341_v25 }
  0x7f   : > { %375 = vst.msk [vmem:[#allocation2 + $0x69] sm:$0xff] %vm225_vm0, %v342_v26 }
  0x80   : > { %376 = vst.msk [vmem:[#allocation2 + $0x79] sm:$0xff] %vm225_vm0, %v343_v39  ;;  %v346_v39 = vld [vmem:[%s5035_s25 + $0x58] sm:$0xff] }
  0x81   : > { %377 = vst.msk [vmem:[#allocation2 + $0x81] sm:$0xff] %vm225_vm0, %v344_v41 }
  0x82   : > { %v487_v13 = vld [vmem:[#allocation2 + $0x1a] sm:$0xff]  ;;  %v488_v14 = vld [vmem:[#allocation2 + $0x22] sm:$0xff]  ;;  %379 = vst.msk [vmem:[#allocation2 + $0x99] sm:$0xff] %vm225_vm0, %v346_v39 }
  0x83   : > { %824 = vrot.lane.b32.xlu2 %v487_v13, %s4860_s30  ;;  %v5100_v15 = vld [vmem:[#allocation2 + $0x20] sm:$0xff]  ;;  %826 = vrot.lane.b32.xlu0 %v488_v14, %s4860_s30  ;;  %v5123_v22 = vld [vmem:[#allocation2 + $0x48] sm:$0xff] }
  0x84   : > { %v472_v21 = vld [vmem:[#allocation2 + $0x21] sm:$0xff]  ;;  %v5131_v24 = vld [vmem:[#allocation2 + $0x49] sm:$0xff]  ;;  %v5143_v27 = vld [vmem:[#allocation2 + $0x51] sm:$0xff] }
  0x85   : > { %v5150_v28 = vld [vmem:[#allocation2 + $0x4a] sm:$0xff]  ;;  %v5154_v29 = vld [vmem:[#allocation2 + $0x52] sm:$0xff]  ;;  %v5174_v33 = vld [vmem:[#allocation2 + $0x60] sm:$0xff] }
  0x86   : > { %698 = vrot.lane.b32.xlu1 %v5100_v15, %s4856_s26  ;;  %v5165_v30 = vld [vmem:[#allocation2 + $0x50] sm:$0xff]  ;;  %v5167_v31 = vld [vmem:[#allocation2 + $0x62] sm:$0xff] }
  0x87   : > { %v569_v35 = vpop.permute.xlu0 %568  ;;  %v5200_v42 = vld [vmem:[#allocation2 + $0x68] sm:$0xff]  ;;  %v5232_v61 = vld [vmem:[#allocation2 + $0x79] sm:$0xff] }
  0x88   : > { %v5209_v45 = vld [vmem:[#allocation2 + $0x61] sm:$0xff]  ;;  %v5213_v48 = vld [vmem:[#allocation2 + $0x69] sm:$0xff]  ;;  %v1064_v49 = vsel %vm225_vm0, %v407_v46, %v569_v35  ;;  %v5269_v26 = vld [vmem:[#allocation2 + $0x78] sm:$0xff] }
  0x89   : > { %v5243_v5 = vld [vmem:[#allocation2 + $0x6a] sm:$0xff]  ;;  %v5251_v10 = vld [vmem:[#allocation2 + $0x7a] sm:$0xff] }
  0x8a   : > { %v5277_v32 = vld [vmem:[#allocation2 + $0x80] sm:$0xff] }
  0x8b   : > { %888 = vrot.lane.b32.xlu2 %v5105_v16, %s4861_s6  ;;  %1018 = vrot.lane.b32.xlu0 %v5107_v17, %s4859_s29 }
  0x8e   : > { %890 = vrot.lane.b32.xlu1 %v5111_v18, %s4861_s6 }
  0x8f   : > { %v633_v40 = vpop.permute.xlu0 %632 }
  0x90   : > { %v1081_v50 = vsel %vm1080_vm3, %v1064_v49, %v633_v40 }
  0x93   : > { %570 = vrot.lane.b32.xlu2 %v424_v19, %s4854_s20  ;;  %700 = vrot.lane.b32.xlu0 %v5105_v16, %s4856_s26 }
  0x96   : > { %572 = vrot.lane.b32.xlu1 %v471_v8, %s4854_s20  ;;  %v345_v8 = vld [vmem:[%s5035_s25 + $0x50] sm:$0xff] }
  0x97   : > { %378 = vst.msk [vmem:[#allocation2 + $0x91] sm:$0xff] %vm225_vm0, %v345_v8 }
  0x9b   : > { %762 = vrot.lane.b32.xlu2 %v472_v21, %s4858_s28  ;;  %892 = vrot.lane.b32.xlu0 %v5123_v22, %s4861_s6 }
  0x9e   : > { %764 = vrot.lane.b32.xlu1 %v5062_v7, %s4858_s28  ;;  %v5297_v49 = vld [vmem:[#allocation2 + $0x90] sm:$0xff] }
  0xa3   : > { %954 = vrot.lane.b32.xlu2 %v521_v23, %s4857_s27  ;;  %574 = vrot.lane.b32.xlu0 %v472_v21, %s4854_s20 }
  0xa6   : > { %956 = vrot.lane.b32.xlu1 %v5131_v24, %s4857_s27 }
  0xab   : > { %636 = vrot.lane.b32.xlu2 %v487_v13, %s4855_s21  ;;  %766 = vrot.lane.b32.xlu0 %v521_v23, %s4858_s28 }
  0xae   : > { %638 = vrot.lane.b32.xlu1 %v488_v14, %s4855_s21 }
  0xb3   : > { %828 = vrot.lane.b32.xlu2 %v536_v12, %s4860_s30  ;;  %958 = vrot.lane.b32.xlu0 %v5143_v27, %s4857_s27 }
  0xb6   : > { %830 = vrot.lane.b32.xlu1 %v5107_v17, %s4860_s30 }
  0xbb   : > { %1020 = vrot.lane.b32.xlu2 %v5150_v28, %s4859_s29  ;;  %640 = vrot.lane.b32.xlu0 %v536_v12, %s4855_s21 }
  0xbe   : > { %1022 = vrot.lane.b32.xlu1 %v5154_v29, %s4859_s29 }
  0xc3   : > { %702 = vrot.lane.b32.xlu2 %v5111_v18, %s4856_s26  ;;  %832 = vrot.lane.b32.xlu0 %v5150_v28, %s4860_s30 }
  0xc6   : > { %704 = vrot.lane.b32.xlu1 %v5123_v22, %s4856_s26 }
  0xcb   : > { %894 = vrot.lane.b32.xlu2 %v5165_v30, %s4861_s6  ;;  %1024 = vrot.lane.b32.xlu0 %v5167_v31, %s4859_s29 }
  0xce   : > { %896 = vrot.lane.b32.xlu1 %v5174_v33, %s4861_s6 }
  0xd3   : > { %576 = vrot.lane.b32.xlu2 %v5062_v7, %s4854_s20  ;;  %706 = vrot.lane.b32.xlu0 %v5165_v30, %s4856_s26 }
  0xd6   : > { %578 = vrot.lane.b32.xlu1 %v521_v23, %s4854_s20 }
  0xdb   : > { %768 = vrot.lane.b32.xlu2 %v5131_v24, %s4858_s28  ;;  %898 = vrot.lane.b32.xlu0 %v5200_v42, %s4861_s6 }
  0xdd   : > { %v825_v43 = vpop.permute.xlu2 %824 }
  0xde   : > { %770 = vrot.lane.b32.xlu1 %v5143_v27, %s4858_s28 }
  0xe0   : > { %v697_v44 = vpop.permute.xlu1 %696 }
  0xe1   : > { %v953_v47 = vpop.permute.xlu0 %952  ;;  %v1098_v52 = vsel %vm1097_vm4, %v1081_v50, %v697_v44 }
  0xe3   : > { %960 = vrot.lane.b32.xlu2 %v5209_v45, %s4857_s27  ;;  %580 = vrot.lane.b32.xlu0 %v5131_v24, %s4854_s20 }
  0xe5   : > { %v889_v51 = vpop.permute.xlu2 %888 }
  0xe6   : > { %962 = vrot.lane.b32.xlu1 %v5213_v48, %s4857_s27 }
  0xe8   : > { %v761_v53 = vpop.permute.xlu1 %760 }
  0xe9   : > { %v1115_v54 = vsel %vm1114_vm5, %v1098_v52, %v761_v53  ;;  %v635_v56 = vpop.permute.xlu0 %634  ;;  %v5307_v52 = vld [vmem:[#allocation2 + $0x81] sm:$0xff] }
  0xea   : > { %v1132_v55 = vsel %vm1131_vm6, %v1115_v54, %v825_v43 }
  0xeb   : > { %642 = vrot.lane.b32.xlu2 %v5107_v17, %s4855_s21  ;;  %772 = vrot.lane.b32.xlu0 %v5209_v45, %s4858_s28  ;;  %v1149_v57 = vsel %vm1148_vm7, %v1132_v55, %v889_v51  ;;  %v5314_v55 = vld [vmem:[#allocation2 + $0x91] sm:$0xff] }
  0xec   : > { %v1166_v59 = vsel %vm1165_vm8, %v1149_v57, %v953_v47 }
  0xed   : > { %v571_v58 = vpop.permute.xlu2 %570 }
  0xee   : > { %644 = vrot.lane.b32.xlu1 %v5150_v28, %s4855_s21  ;;  %v1065_v3 = vsel %vm225_vm0, %v408_v63, %v571_v58  ;;  %v5271_v28 = vld [vmem:[#allocation2 + $0x82] sm:$0xff] }
  0xef   : > { %v1082_v7 = vsel %vm1080_vm3, %v1065_v3, %v635_v56  ;;  %v348_v63 = vld [vmem:[%s5035_s25 + $0x68] sm:$0xff]  ;;  %v4510_v3 = vld [vmem:[%s8170_s3 + $0xe0] sm:$0xff] }
  0xf0   : > { %v1017_v60 = vpop.permute.xlu1 %1016  ;;  %381 = vst.msk [vmem:[#allocation2 + $0xb1] sm:$0xff] %vm225_vm0, %v348_v63 }
  0xf1   : > { %v1183_v62 = vsel %vm1182_vm9, %v1166_v59, %v1017_v60  ;;  %v347_v59 = vld [vmem:[%s5035_s25 + $0x60] sm:$0xff] }
  0xf2   : > { %4465 = vmatmul.msk.f32.vlgmr.msra.gmra.mxu0 %vm1202_vm10, %v1183_v62  ;;  %380 = vst.msk [vmem:[#allocation2 + $0xa9] sm:$0xff] %vm225_vm0, %v347_v59  ;;  %v4499_v59 = vld [vmem:[%s8170_s3 + $0x88] sm:$0xff] }
  0xf3   : > { %834 = vrot.lane.b32.xlu2 %v5154_v29, %s4860_s30  ;;  %964 = vrot.lane.b32.xlu0 %v5232_v61, %s4857_s27 }
  0xf5   : > { %v763_v1 = vpop.permute.xlu2 %762  ;;  %v827_v2 = vpop.permute.xlu0 %826 }
  0xf6   : > { %836 = vrot.lane.b32.xlu1 %v5167_v31, %s4860_s30 }
  0xf8   : > { %v699_v4 = vpop.permute.xlu1 %698 }
  0xf9   : > { %v1099_v9 = vsel %vm1097_vm4, %v1082_v7, %v699_v4 }
  0xfa   : > { %v1116_v11 = vsel %vm1114_vm5, %v1099_v9, %v763_v1  ;;  %v2317_v9 = vld [vmem:[%s8170_s3 + $0x78] sm:$0xff] }
  0xfb   : > { %1026 = vrot.lane.b32.xlu2 %v5243_v5, %s4859_s29  ;;  %646 = vrot.lane.b32.xlu0 %v5154_v29, %s4855_s21  ;;  %v1133_v14 = vsel %vm1131_vm6, %v1116_v11, %v827_v2  ;;  %v4511_v2 = vld [vmem:[%s8170_s3 + $0xe8] sm:$0xff]  ;;  %v4509_v11 = vld [vmem:[%s8170_s3 + $0xd8] sm:$0xff] }
  0xfc   : > { %2416 = vmatpush.msra.mxu3 %v2317_v9  ;;  %v5463_v9 = vld [vmem:[#allocation2 + $0xaa] sm:$0xff] }
  0xfd   : > { %v955_v12 = vpop.permute.xlu2 %954  ;;  %v1019_v13 = vpop.permute.xlu0 %1018 }
  0xfe   : > { %1028 = vrot.lane.b32.xlu1 %v5251_v10, %s4859_s29 }
 0x100   : > { %v891_v17 = vpop.permute.xlu1 %890 }
 0x101   : > { %v1150_v19 = vsel %vm1148_vm7, %v1133_v14, %v891_v17  ;;  %v4508_v14 = vld [vmem:[%s8170_s3 + $0xd0] sm:$0xff]  ;;  %v5360_v17 = vld [vmem:[#allocation2 + $0x99] sm:$0xff] }
 0x102   : > { %v1167_v20 = vsel %vm1165_vm8, %v1150_v19, %v955_v12  ;;  %v2315_v19 = vld [vmem:[%s8170_s3 + $0x68] sm:$0xff] }
 0x103   : > { %708 = vrot.lane.b32.xlu2 %v5174_v33, %s4856_s26  ;;  %v1184_v21 = vsel %vm1182_vm9, %v1167_v20, %v1019_v13  ;;  %838 = vrot.lane.b32.xlu0 %v5243_v5, %s4860_s30  ;;  %v4507_v20 = vld [vmem:[%s8170_s3 + $0xc8] sm:$0xff] }
 0x104   : > { %4466 = vmatmul.msk.f32.gmra.mxu0 %vm1202_vm10, %v1184_v21  ;;  %v2314_v21 = vld [vmem:[%s8170_s3 + $0x60] sm:$0xff] }
 0x105   : > { %v637_v23 = vpop.permute.xlu2 %636  ;;  %v701_v24 = vpop.permute.xlu0 %700 }
 0x106   : > { %710 = vrot.lane.b32.xlu1 %v5200_v42, %s4856_s26 }
 0x108   : > { %v573_v25 = vpop.permute.xlu1 %572 }
 0x109   : > { %v1066_v29 = vsel %vm225_vm0, %v5056_v6, %v573_v25 }
 0x10a   : > { %v1083_v36 = vsel %vm1080_vm3, %v1066_v29, %v637_v23  ;;  %v4506_v23 = vld [vmem:[%s8170_s3 + $0xc0] sm:$0xff]  ;;  %v2313_v29 = vld [vmem:[%s8170_s3 + $0x58] sm:$0xff] }
 0x10b   : > { %900 = vrot.lane.b32.xlu2 %v5269_v26, %s4861_s6  ;;  %1030 = vrot.lane.b32.xlu0 %v5271_v28, %s4859_s29  ;;  %v1100_v38 = vsel %vm1097_vm4, %v1083_v36, %v701_v24  ;;  %v4505_v36 = vld [vmem:[%s8170_s3 + $0xb8] sm:$0xff] }
 0x10d   : > { %v829_v34 = vpop.permute.xlu2 %828  ;;  %v893_v35 = vpop.permute.xlu0 %892 }
 0x10e   : > { %902 = vrot.lane.b32.xlu1 %v5277_v32, %s4861_s6 }
 0x110   : > { %v765_v37 = vpop.permute.xlu1 %764 }
 0x111   : > { %v1117_v6 = vsel %vm1114_vm5, %v1100_v38, %v765_v37  ;;  %v5392_v38 = vld [vmem:[#allocation2 + $0x92] sm:$0xff] }
 0x112   : > { %v1134_v40 = vsel %vm1131_vm6, %v1117_v6, %v829_v34  ;;  %v2311_v6 = vld [vmem:[%s8170_s3 + $0x48] sm:$0xff] }
 0x113   : > { %582 = vrot.lane.b32.xlu2 %v5143_v27, %s4854_s20  ;;  %712 = vrot.lane.b32.xlu0 %v5269_v26, %s4856_s26  ;;  %v1151_v44 = vsel %vm1148_vm7, %v1134_v40, %v893_v35  ;;  %v2312_v35 = vld [vmem:[%s8170_s3 + $0x50] sm:$0xff] }
 0x115   : > { %v1021_v41 = vpop.permute.xlu2 %1020  ;;  %v575_v43 = vpop.permute.xlu0 %574 }
 0x116   : > { %584 = vrot.lane.b32.xlu1 %v5209_v45, %s4854_s20  ;;  %v1067_v53 = vsel %vm225_vm0, %v5100_v15, %v575_v43  ;;  %v4513_v15 = vld [vmem:[%s8170_s3 + $0xf8] sm:$0xff] }
 0x117   : > { %2351 = vmatpush.msra.mxu2 %v4513_v15  ;;  %v5407_v43 = vld [vmem:[#allocation2 + $0x9a] sm:$0xff] }
 0x118   : > { %v957_v46 = vpop.permute.xlu1 %956 }
 0x119   : > { %v1168_v47 = vsel %vm1165_vm8, %v1151_v44, %v957_v46  ;;  %v2310_v44 = vld [vmem:[%s8170_s3 + $0x40] sm:$0xff] }
 0x11a   : > { %v1185_v50 = vsel %vm1182_vm9, %v1168_v47, %v1021_v41  ;;  %v4503_v41 = vld [vmem:[%s8170_s3 + $0xa8] sm:$0xff]  ;;  %v4502_v46 = vld [vmem:[%s8170_s3 + $0xa0] sm:$0xff] }
 0x11b   : > { %774 = vrot.lane.b32.xlu2 %v5213_v48, %s4858_s28  ;;  %4467 = vmatmul.msk.f32.gmra.mxu0 %vm1202_vm10, %v1185_v50 }
 0x11c   : > { %904 = vrot.lane.b32.xlu0 %v5297_v49, %s4861_s6 }
 0x11d   : > { %v703_v27 = vpop.permute.xlu2 %702  ;;  %v767_v45 = vpop.permute.xlu0 %766 }
 0x11e   : > { %776 = vrot.lane.b32.xlu1 %v5232_v61, %s4858_s28 }
 0x120   : > { %v639_v51 = vpop.permute.xlu1 %638 }
 0x121   : > { %v1084_v54 = vsel %vm1080_vm3, %v1067_v53, %v639_v51  ;;  %v4501_v51 = vld [vmem:[%s8170_s3 + $0x98] sm:$0xff] }
 0x122   : > { %v1101_v58 = vsel %vm1097_vm4, %v1084_v54, %v703_v27 }
 0x123   : > { %966 = vrot.lane.b32.xlu2 %v5307_v52, %s4857_s27  ;;  %v1118_v62 = vsel %vm1114_vm5, %v1101_v58, %v767_v45  ;;  %v2309_v45 = vld [vmem:[%s8170_s3 + $0x38] sm:$0xff]  ;;  %v2307_v58 = vld [vmem:[%s8170_s3 + $0x28] sm:$0xff] }
 0x124   : > { %586 = vrot.lane.b32.xlu0 %v5213_v48, %s4854_s20  ;;  %v4512_v48 = vld [vmem:[%s8170_s3 + $0xf0] sm:$0xff] }
 0x125   : > { %v895_v56 = vpop.permute.xlu2 %894  ;;  %v959_v57 = vpop.permute.xlu0 %958  ;;  %2352 = vmatpush.msra.mxu2 %v4512_v48  ;;  %v2306_v48 = vld [vmem:[%s8170_s3 + $0x20] sm:$0xff] }
 0x126   : > { %968 = vrot.lane.b32.xlu1 %v5314_v55, %s4857_s27 }
 0x127   : > { %2353 = vmatpush.msra.mxu2 %v4511_v2  ;;  %v2305_v2 = vld [vmem:[%s8170_s3 + $0x18] sm:$0xff] }
 0x128   : > { %v831_v60 = vpop.permute.xlu1 %830 }
 0x129   : > { %v1135_v1 = vsel %vm1131_vm6, %v1118_v62, %v831_v60  ;;  %2354 = vmatpush.msra.mxu2 %v4510_v3  ;;  %v4498_v62 = vld [vmem:[%s8170_s3 + $0x80] sm:$0xff]  ;;  %v2318_v3 = vld [vmem:[#allocation3 + $0x1] sm:$0xff] }
 0x12a   : > { %v1152_v4 = vsel %vm1148_vm7, %v1135_v1, %v895_v56  ;;  %v4500_v56 = vld [vmem:[%s8170_s3 + $0x90] sm:$0xff] }
 0x12b   : > { %648 = vrot.lane.b32.xlu2 %v5167_v31, %s4855_s21  ;;  %v2316_v31 = vld [vmem:[%s8170_s3 + $0x70] sm:$0xff]  ;;  %2355 = vmatpush.msra.mxu2 %v4509_v11  ;;  %v1169_v12 = vsel %vm1165_vm8, %v1152_v4, %v959_v57 }
 0x12c   : > { %778 = vrot.lane.b32.xlu0 %v5307_v52, %s4858_s28  ;;  %2417 = vmatpush.msra.mxu3 %v2316_v31  ;;  %v2304_v4 = vld [vmem:[%s8170_s3 + $0x10] sm:$0xff]  ;;  %v2303_v31 = vld [vmem:[%s8170_s3 + $0x8] sm:$0xff] }
 0x12d   : > { %v577_v7 = vpop.permute.xlu2 %576  ;;  %v641_v8 = vpop.permute.xlu0 %640  ;;  %2356 = vmatpush.msra.mxu2 %v4508_v14 }
 0x12e   : > { %650 = vrot.lane.b32.xlu1 %v5243_v5, %s4855_s21  ;;  %2418 = vmatpush.msra.mxu3 %v2315_v19  ;;  %v1068_v34 = vsel %vm225_vm0, %v5105_v16, %v577_v7  ;;  %v4504_v16 = vld [vmem:[%s8170_s3 + $0xb0] sm:$0xff]  ;;  %v2319_v19 = vld [vmem:[#allocation3 + $0x9] sm:$0xff] }
 0x12f   : > { %2357 = vmatpush.msra.mxu2 %v4507_v20  ;;  %v1085_v39 = vsel %vm1080_vm3, %v1068_v34, %v641_v8  ;;  %v5461_v8 = vld [vmem:[#allocation2 + $0x98] sm:$0xff] }
 0x130   : > { %v1023_v13 = vpop.permute.xlu1 %1022  ;;  %2419 = vmatpush.msra.mxu3 %v2314_v21 }
 0x131   : > { %v1186_v5 = vsel %vm1182_vm9, %v1169_v12, %v1023_v13  ;;  %2358 = vmatpush.msra.mxu2 %v4506_v23  ;;  %v5472_v12 = vld [vmem:[#allocation2 + $0xa8] sm:$0xff]  ;;  %v2302_v13 = vld [vmem:[%s8170_s3] sm:$0xff]  ;;  %v349_v23 = vld [vmem:[%s5035_s25 + $0x70] sm:$0xff] }
 0x132   : > { %4468 = vmatmul.msk.f32.gmra.mxu0 %vm1202_vm10, %v1186_v5  ;;  %2420 = vmatpush.msra.mxu3 %v2313_v29  ;;  %382 = vst.msk [vmem:[#allocation2 + $0xc1] sm:$0xff] %vm225_vm0, %v349_v23 }
 0x133   : > { %840 = vrot.lane.b32.xlu2 %v5251_v10, %s4860_s30  ;;  %2359 = vmatpush.msra.mxu2 %v4505_v36 }
 0x134   : > { %970 = vrot.lane.b32.xlu0 %v5360_v17, %s4857_s27  ;;  %2421 = vmatpush.msra.mxu3 %v2312_v35  ;;  %v350_v35 = vld [vmem:[%s5035_s25 + $0x78] sm:$0xff] }
 0x135   : > { %v769_v24 = vpop.permute.xlu2 %768  ;;  %v833_v25 = vpop.permute.xlu0 %832  ;;  %2360 = vmatpush.msra.mxu2 %v4504_v16  ;;  %383 = vst.msk [vmem:[#allocation2 + $0xc9] sm:$0xff] %vm225_vm0, %v350_v35  ;;  %v5499_v16 = vld [vmem:[#allocation2 + $0xb0] sm:$0xff] }
 0x136   : > { %842 = vrot.lane.b32.xlu1 %v5271_v28, %s4860_s30  ;;  %2422 = vmatpush.msra.mxu3 %v2311_v6 }
 0x137   : > { %2361 = vmatpush.msra.mxu2 %v4503_v41 }
 0x138   : > { %v705_v37 = vpop.permute.xlu1 %704  ;;  %2423 = vmatpush.msra.mxu3 %v2310_v44 }
 0x139   : > { %v1102_v40 = vsel %vm1097_vm4, %v1085_v39, %v705_v37  ;;  %2362 = vmatpush.msra.mxu2 %v4502_v46  ;;  %v5513_v46 = vld [vmem:[#allocation2 + $0xb1] sm:$0xff] }
 0x13a   : > { %v1119_v47 = vsel %vm1114_vm5, %v1102_v40, %v769_v24  ;;  %2424 = vmatpush.msra.mxu3 %v2309_v45  ;;  %v530_v40 = vld [vmem:[#allocation2 + $0xa9] sm:$0xff] }
 0x13b   : > { %1032 = vrot.lane.b32.xlu2 %v5392_v38, %s4859_s29  ;;  %2363 = vmatpush.msra.mxu2 %v4501_v51  ;;  %v1136_v53 = vsel %vm1131_vm6, %v1119_v47, %v833_v25 }
 0x13c   : > { %652 = vrot.lane.b32.xlu0 %v5251_v10, %s4855_s21  ;;  %v2308_v10 = vld [vmem:[%s8170_s3 + $0x30] sm:$0xff] }
 0x13d   : > { %v961_v50 = vpop.permute.xlu2 %960  ;;  %v1025_v27 = vpop.permute.xlu0 %1024  ;;  %2425 = vmatpush.msra.mxu3 %v2308_v10  ;;  %2364 = vmatpush.msra.mxu2 %v4500_v56  ;;  %v5574_v35 = vld [vmem:[#allocation2 + $0xca] sm:$0xff] }
 0x13e   : > { %1034 = vrot.lane.b32.xlu1 %v5407_v43, %s4859_s29 }
 0x13f   : > { %2426 = vmatpush.msra.mxu3 %v2307_v58  ;;  %2365 = vmatpush.msra.mxu2 %v4499_v59  ;;  %v5536_v59 = vld [vmem:[#allocation2 + $0xc1] sm:$0xff] }
 0x140   : > { %v897_v54 = vpop.permute.xlu1 %896 }
 0x141   : > { %v1153_v57 = vsel %vm1148_vm7, %v1136_v53, %v897_v54  ;;  %2427 = vmatpush.msra.mxu3 %v2306_v48  ;;  %2366 = vmatpush.msra.mxu2 %v4498_v62 }
 0x142   : > { %v1170_v15 = vsel %vm1165_vm8, %v1153_v57, %v961_v50  ;;  %2367 = vmatmul.f32.vlgmr.msra.gmra.mxu2 %v2318_v3 }
 0x143   : > { %714 = vrot.lane.b32.xlu2 %v5277_v32, %s4856_s26  ;;  %v1187_v60 = vsel %vm1182_vm9, %v1170_v15, %v1025_v27  ;;  %2428 = vmatpush.msra.mxu3 %v2305_v2  ;;  %v547_v2 = vld [vmem:[#allocation2 + $0xb2] sm:$0xff] }
 0x144   : > { %4469 = vmatmul.msk.f32.gmra.mxu0 %vm1202_vm10, %v1187_v60  ;;  %844 = vrot.lane.b32.xlu0 %v5392_v38, %s4860_s30  ;;  %v351_v60 = vld [vmem:[%s5035_s25 + $0x80] sm:$0xff] }
 0x145   : > { %v643_v63 = vpop.permute.xlu2 %642  ;;  %v707_v1 = vpop.permute.xlu0 %706  ;;  %2429 = vmatpush.msra.mxu3 %v2304_v4  ;;  %384 = vst.msk [vmem:[#allocation2 + $0xd9] sm:$0xff] %vm225_vm0, %v351_v60  ;;  %v353_v4 = vld [vmem:[%s5035_s25 + $0x90] sm:$0xff] }
 0x146   : > { %716 = vrot.lane.b32.xlu1 %v5297_v49, %s4856_s26  ;;  %386 = vst.msk [vmem:[#allocation2 + $0xf1] sm:$0xff] %vm225_vm0, %v353_v4  ;;  %v356_v4 = vld [vmem:[%s5035_s25 + $0xa8] sm:$0xff] }
 0x147   : > { %2430 = vmatpush.msra.mxu3 %v2303_v31  ;;  %389 = vst.msk [vmem:[#allocation2 + $0x111] sm:$0xff] %vm225_vm0, %v356_v4 }
 0x148   : > { %v579_v7 = vpop.permute.xlu1 %578 }
 0x149   : > { %v1069_v11 = vsel %vm225_vm0, %v5111_v18, %v579_v7  ;;  %2431 = vmatpush.msra.mxu3 %v2302_v13 }
 0x14a   : > { %v1086_v18 = vsel %vm1080_vm3, %v1069_v11, %v643_v63  ;;  %2432 = vmatmul.f32.vlgmr.msra.gmra.mxu3 %v4853_v0  ;;  %2370 = vmatmul.f32.gmra.mxu2 %v2319_v19  ;;  %v5554_v11 = vld [vmem:[#allocation2 + $0xc2] sm:$0xff] }
 0x14b   : > { %906 = vrot.lane.b32.xlu2 %v5461_v8, %s4861_s6  ;;  %v1103_v21 = vsel %vm1097_vm4, %v1086_v18, %v707_v1 }
 0x14c   : > { %1036 = vrot.lane.b32.xlu0 %v5463_v9, %s4859_s29 }
 0x14d   : > { %v835_v14 = vpop.permute.xlu2 %834  ;;  %v899_v5 = vpop.permute.xlu0 %898  ;;  %v5621_v60 = vld [vmem:[#allocation2 + $0xf1] sm:$0xff] }
 0x14e   : > { %908 = vrot.lane.b32.xlu1 %v5472_v12, %s4861_s6 }
 0x150   : > { %v771_v20 = vpop.permute.xlu1 %770 }
 0x151   : > { %v1120_v24 = vsel %vm1114_vm5, %v1103_v21, %v771_v20 }
 0x152   : > { %v1137_v25 = vsel %vm1131_vm6, %v1120_v24, %v835_v14  ;;  %2435 = vmatmul.f32.gmra.mxu3 %v4853_v0 }
 0x153   : > { %588 = vrot.lane.b32.xlu2 %v5232_v61, %s4854_s20  ;;  %v1154_v36 = vsel %vm1148_vm7, %v1137_v25, %v899_v5 }
 0x154   : > { %718 = vrot.lane.b32.xlu0 %v5461_v8, %s4856_s26 }
 0x155   : > { %v1027_v29 = vpop.permute.xlu2 %1026  ;;  %v581_v34 = vpop.permute.xlu0 %580 }
 0x156   : > { %590 = vrot.lane.b32.xlu1 %v5307_v52, %s4854_s20  ;;  %v1070_v41 = vsel %vm225_vm0, %v5123_v22, %v581_v34  ;;  %v5572_v34 = vld [vmem:[#allocation2 + $0xc0] sm:$0xff] }
 0x158   : > { %v963_v37 = vpop.permute.xlu1 %962 }
 0x159   : > { %v1171_v61 = vsel %vm1165_vm8, %v1154_v36, %v963_v37  ;;  %v5582_v37 = vld [vmem:[#allocation2 + $0xc8] sm:$0xff] }
 0x15a   : > { %v1188_v39 = vsel %vm1182_vm9, %v1171_v61, %v1027_v29 }
 0x15b   : > { %780 = vrot.lane.b32.xlu2 %v5314_v55, %s4858_s28  ;;  %4470 = vmatmul.msk.f32.gmra.mxu0 %vm1202_vm10, %v1188_v39 }
 0x15c   : > { %910 = vrot.lane.b32.xlu0 %v5499_v16, %s4861_s6 }
 0x15d   : > { %v709_v0 = vpop.permute.xlu2 %708  ;;  %v773_v52 = vpop.permute.xlu0 %772 }
 0x15e   : > { %782 = vrot.lane.b32.xlu1 %v5360_v17, %s4858_s28 }
 0x160   : > { %v645_v6 = vpop.permute.xlu1 %644 }
 0x161   : > { %v1087_v44 = vsel %vm1080_vm3, %v1070_v41, %v645_v6  ;;  %v5590_v6 = vld [vmem:[#allocation2 + $0xd8] sm:$0xff] }
 0x162   : > { %v1104_v27 = vsel %vm1097_vm4, %v1087_v44, %v709_v0 }
 0x163   : > { %972 = vrot.lane.b32.xlu2 %v530_v40, %s4857_s27  ;;  %v1121_v22 = vsel %vm1114_vm5, %v1104_v27, %v773_v52 }
 0x164   : > { %592 = vrot.lane.b32.xlu0 %v5314_v55, %s4854_s20  ;;  %v5527_v55 = vld [vmem:[%s8169_s2] ss:$0 sm:$0xff] }
 0x165   : > { %v901_v47 = vpop.permute.xlu2 %900  ;;  %v965_v50 = vpop.permute.xlu0 %964 }
 0x166   : > { %974 = vrot.lane.b32.xlu1 %v5513_v46, %s4857_s27 }
 0x168   : > { %v837_v45 = vpop.permute.xlu1 %836 }
 0x169   : > { %v1138_v10 = vsel %vm1131_vm6, %v1121_v22, %v837_v45 }
 0x16a   : > { %v1155_v51 = vsel %vm1148_vm7, %v1138_v10, %v901_v47 }
 0x16b   : > { %654 = vrot.lane.b32.xlu2 %v5271_v28, %s4855_s21  ;;  %v1172_v57 = vsel %vm1165_vm8, %v1155_v51, %v965_v50 }
 0x16c   : > { %784 = vrot.lane.b32.xlu0 %v530_v40, %s4858_s28  ;;  %v354_v40 = vld [vmem:[%s5035_s25 + $0x98] sm:$0xff] }
 0x16d   : > { %v583_v53 = vpop.permute.xlu2 %582  ;;  %v647_v54 = vpop.permute.xlu0 %646  ;;  %387 = vst.msk [vmem:[#allocation2 + $0xf9] sm:$0xff] %vm225_vm0, %v354_v40 }
 0x16e   : > { %656 = vrot.lane.b32.xlu1 %v5392_v38, %s4855_s21  ;;  %v1071_v63 = vsel %vm225_vm0, %v5165_v30, %v583_v53  ;;  %v5605_v53 = vld [vmem:[#allocation2 + $0xf0] sm:$0xff] }
 0x16f   : > { %v1272_v56 = vpop.f32.mrf.mxu0  ;;  %v1088_v3 = vsel %vm1080_vm3, %v1071_v63, %v647_v54 }
 0x170   : > { %v1273_v58 = vadd.f32 %v5527_v55, %v1272_v56  ;;  %v1029_v28 = vpop.permute.xlu1 %1028  ;;  %v5611_v56 = vld [vmem:[#allocation2 + $0xd9] sm:$0xff] }
 0x171   : > { %v1189_v15 = vsel %vm1182_vm9, %v1172_v57, %v1029_v28 }
 0x172   : > { %v1320_v48 = vmax.f32 %v1273_v58, 0.0  ;;  %4471 = vmatmul.msk.f32.gmra.mxu0 %vm1202_vm10, %v1189_v15  ;;  %v533_v15 = vld [vmem:[#allocation2 + $0xc9] sm:$0xff] }
 0x173   : > { %846 = vrot.lane.b32.xlu2 %v5407_v43, %s4860_s30 }
 0x174   : > { %1337 = vst [vmem:[#allocation3 + $0x19] sm:$0xff] %v1320_v48  ;;  %976 = vrot.lane.b32.xlu0 %v5536_v59, %s4857_s27  ;;  %2373 = vmatmul.f32.gmra.mxu2 %v1320_v48 }
 0x175   : > { %v775_v38 = vpop.permute.xlu2 %774  ;;  %v839_v62 = vpop.permute.xlu0 %838 }
 0x176   : > { %848 = vrot.lane.b32.xlu1 %v5463_v9, %s4860_s30 }
 0x178   : > { %v711_v1 = vpop.permute.xlu1 %710 }
 0x179   : > { %v1105_v7 = vsel %vm1097_vm4, %v1088_v3, %v711_v1  ;;  %v355_v1 = vld [vmem:[%s5035_s25 + $0xa0] sm:$0xff] }
 0x17a   : > { %v1122_v30 = vsel %vm1114_vm5, %v1105_v7, %v775_v38  ;;  %388 = vst.msk [vmem:[#allocation2 + $0x109] sm:$0xff] %vm225_vm0, %v355_v1 }
 0x17b   : > { %1038 = vrot.lane.b32.xlu2 %v547_v2, %s4859_s29  ;;  %v2288_v31 = vld [vmem:[#allocation3 + $0x18] sm:$0xff]  ;;  %v1139_v14 = vsel %vm1131_vm6, %v1122_v30, %v839_v62 }
 0x17c   : > { %2438 = vmatmul.f32.gmra.mxu3 %v2288_v31  ;;  %658 = vrot.lane.b32.xlu0 %v5407_v43, %s4855_s21 }
 0x17d   : > { %v967_v9 = vpop.permute.xlu2 %966  ;;  %v1031_v13 = vpop.permute.xlu0 %1030 }
 0x17e   : > { %1040 = vrot.lane.b32.xlu1 %v5554_v11, %s4859_s29 }
 0x180   : > { %v903_v5 = vpop.permute.xlu1 %902 }
 0x181   : > { %v1156_v19 = vsel %vm1148_vm7, %v1139_v14, %v903_v5  ;;  %v1275_v18 = vpop.f32.mrf.mxu0 }
 0x182   : > { %v1276_v20 = vadd.f32 %v5527_v55, %v1275_v18  ;;  %v1173_v21 = vsel %vm1165_vm8, %v1156_v19, %v967_v9 }
 0x183   : > { %720 = vrot.lane.b32.xlu2 %v5472_v12, %s4856_s26  ;;  %v1190_v43 = vsel %vm1182_vm9, %v1173_v21, %v1031_v13  ;;  %v352_v12 = vld [vmem:[%s5035_s25 + $0x88] sm:$0xff] }
 0x184   : > { %v1321_v23 = vmax.f32 %v1276_v20, 0.0  ;;  %4472 = vmatmul.msk.f32.gmra.mxu0 %vm1202_vm10, %v1190_v43  ;;  %850 = vrot.lane.b32.xlu0 %v547_v2, %s4860_s30  ;;  %385 = vst.msk [vmem:[#allocation2 + $0xe1] sm:$0xff] %vm225_vm0, %v352_v12 }
 0x185   : > { %v649_v24 = vpop.permute.xlu2 %648  ;;  %v713_v25 = vpop.permute.xlu0 %712 }
 0x186   : > { %1338 = vst [vmem:[#allocation3 + $0x21] sm:$0xff] %v1321_v23  ;;  %722 = vrot.lane.b32.xlu1 %v5499_v16, %s4856_s26  ;;  %2376 = vmatmul.f32.gmra.mxu2 %v1321_v23 }
 0x188   : > { %v585_v29 = vpop.permute.xlu1 %584 }
 0x189   : > { %v1072_v36 = vsel %vm225_vm0, %v5174_v33, %v585_v29 }
 0x18a   : > { %v1089_v39 = vsel %vm1080_vm3, %v1072_v36, %v649_v24 }
 0x18b   : > { %912 = vrot.lane.b32.xlu2 %v5572_v34, %s4861_s6  ;;  %v1106_v33 = vsel %vm1097_vm4, %v1089_v39, %v713_v25  ;;  %v5630_v3 = vld [vmem:[#allocation2 + $0xe1] sm:$0xff] }
 0x18c   : > { %1042 = vrot.lane.b32.xlu0 %v5574_v35, %s4859_s29  ;;  %v1435_v18 = vld [vmem:[#allocation2 + $0xda] sm:$0xff]  ;;  %v5649_v43 = vld [vmem:[#allocation2 + $0xe2] sm:$0xff] }
 0x18d   : > { %v841_v61 = vpop.permute.xlu2 %840  ;;  %v2289_v16 = vld [vmem:[#allocation3 + $0x20] sm:$0xff]  ;;  %v5670_v40 = vld [vmem:[#allocation2 + $0xe0] sm:$0xff] }
 0x18e   : > { %2441 = vmatmul.f32.gmra.mxu3 %v2289_v16  ;;  %914 = vrot.lane.b32.xlu1 %v5582_v37, %s4861_s6  ;;  %v905_v0 = vpop.permute.xlu0 %904  ;;  %v5663_v16 = vld [vmem:[#allocation2 + $0xfa] sm:$0xff] }
 0x190   : > { %v777_v52 = vpop.permute.xlu1 %776 }
 0x191   : > { %v1123_v41 = vsel %vm1114_vm5, %v1106_v33, %v777_v52 }
 0x192   : > { %v1140_v44 = vsel %vm1131_vm6, %v1123_v41, %v841_v61 }
 0x193   : > { %594 = vrot.lane.b32.xlu2 %v5360_v17, %s4854_s20  ;;  %v1157_v27 = vsel %vm1148_vm7, %v1140_v44, %v905_v0 }
 0x194   : > { %1644 = vrot.lane.b32.xlu0 %v5590_v6, %s4856_s26 }
 0x195   : > { %v1033_v47 = vpop.permute.xlu2 %1032 }
 0x196   : > { %1516 = vrot.lane.b32.xlu1 %v5536_v59, %s4854_s20  ;;  %v587_v50 = vpop.permute.xlu0 %586 }
 0x198   : > { %v969_v45 = vpop.permute.xlu1 %968  ;;  %v1278_v22 = vpop.f32.mrf.mxu0 }
 0x199   : > { %v1174_v10 = vsel %vm1165_vm8, %v1157_v27, %v969_v45  ;;  %v1279_v51 = vadd.f32 %v5527_v55, %v1278_v22 }
 0x19a   : > { %v1191_v17 = vsel %vm1182_vm9, %v1174_v10, %v1033_v47 }
 0x19b   : > { %v1322_v54 = vmax.f32 %v1279_v51, 0.0  ;;  %786 = vrot.lane.b32.xlu2 %v5513_v46, %s4858_s28  ;;  %4473 = vmatmul.msk.f32.gmra.mxu0 %vm1202_vm10, %v1191_v17  ;;  %v1073_v46 = vsel %vm225_vm0, %v5200_v42, %v587_v50  ;;  %v5683_v17 = vld [vmem:[#allocation2 + $0xf8] sm:$0xff] }
 0x19c   : > { %1836 = vrot.lane.b32.xlu0 %v5605_v53, %s4861_s6 }
 0x19d   : > { %1339 = vst [vmem:[#allocation3 + $0x31] sm:$0xff] %v1322_v54  ;;  %v715_v57 = vpop.permute.xlu2 %714  ;;  %2379 = vmatmul.f32.gmra.mxu2 %v1322_v54  ;;  %v5685_v54 = vld [vmem:[#allocation2 + $0x10a] sm:$0xff] }
 0x19e   : > { %1708 = vrot.lane.b32.xlu1 %v5611_v56, %s4858_s28  ;;  %v779_v58 = vpop.permute.xlu0 %778 }
 0x1a0   : > { %v651_v28 = vpop.permute.xlu1 %650 }
 0x1a1   : > { %v1090_v59 = vsel %vm1080_vm3, %v1073_v46, %v651_v28 }
 0x1a2   : > { %v1107_v62 = vsel %vm1097_vm4, %v1090_v59, %v715_v57 }
 0x1a3   : > { %978 = vrot.lane.b32.xlu2 %v533_v15, %s4857_s27  ;;  %v1124_v2 = vsel %vm1114_vm5, %v1107_v62, %v779_v58  ;;  %v5691_v58 = vld [vmem:[#allocation2 + $0x108] sm:$0xff] }
 0x1a4   : > { %v2290_v48 = vld [vmem:[#allocation3 + $0x30] sm:$0xff]  ;;  %1518 = vrot.lane.b32.xlu0 %v533_v15, %s4854_s20 }
 0x1a5   : > { %v907_v38 = vpop.permute.xlu2 %906  ;;  %2444 = vmatmul.f32.gmra.mxu3 %v2290_v48 }
 0x1a6   : > { %1900 = vrot.lane.b32.xlu1 %v5621_v60, %s4857_s27  ;;  %v971_v63 = vpop.permute.xlu0 %970 }
 0x1a8   : > { %v843_v42 = vpop.permute.xlu1 %842 }
 0x1a9   : > { %v1141_v7 = vsel %vm1131_vm6, %v1124_v2, %v843_v42  ;;  %v358_v2 = vld [vmem:[%s5035_s25 + $0xb8] sm:$0xff] }
 0x1aa   : > { %v1158_v31 = vsel %vm1148_vm7, %v1141_v7, %v907_v38  ;;  %v357_v38 = vld [vmem:[%s5035_s25 + $0xb0] sm:$0xff]  ;;  %391 = vst.msk [vmem:[#allocation2 + $0x129] sm:$0xff] %vm225_vm0, %v358_v2 }
 0x1ab   : > { %1580 = vrot.lane.b32.xlu2 %v5554_v11, %s4855_s21  ;;  %v1175_v14 = vsel %vm1165_vm8, %v1158_v31, %v971_v63  ;;  %v5645_v11 = vld [vmem:[#allocation2 + $0xf9] sm:$0xff]  ;;  %390 = vst.msk [vmem:[#allocation2 + $0x121] sm:$0xff] %vm225_vm0, %v357_v38 }
 0x1ac   : > { %1710 = vrot.lane.b32.xlu0 %v5630_v3, %s4858_s28 }
 0x1ad   : > { %v589_v30 = vpop.permute.xlu2 %588 }
 0x1ae   : > { %1582 = vrot.lane.b32.xlu1 %v5574_v35, %s4855_s21  ;;  %v653_v9 = vpop.permute.xlu0 %652  ;;  %v1074_v24 = vsel %vm225_vm0, %v5269_v26, %v589_v30  ;;  %v5657_v35 = vld [vmem:[#allocation2 + $0xf2] sm:$0xff] }
 0x1af   : > { %v1281_v13 = vpop.f32.mrf.mxu0  ;;  %v1091_v12 = vsel %vm1080_vm3, %v1074_v24, %v653_v9  ;;  %v5714_v9 = vld [vmem:[#allocation2 + $0x110] sm:$0xff] }
 0x1b0   : > { %v1282_v5 = vadd.f32 %v5527_v55, %v1281_v13  ;;  %v1035_v19 = vpop.permute.xlu1 %1034 }
 0x1b1   : > { %v1192_v20 = vsel %vm1182_vm9, %v1175_v14, %v1035_v19 }
 0x1b2   : > { %v1323_v21 = vmax.f32 %v1282_v5, 0.0  ;;  %4474 = vmatmul.msk.f32.gmra.mxu0 %vm1202_vm10, %v1192_v20 }
 0x1b3   : > { %1772 = vrot.lane.b32.xlu2 %v1435_v18, %s4860_s30 }
 0x1b4   : > { %1340 = vst [vmem:[#allocation3 + $0x39] sm:$0xff] %v1323_v21  ;;  %1902 = vrot.lane.b32.xlu0 %v5645_v11, %s4857_s27  ;;  %2382 = vmatmul.f32.gmra.mxu2 %v1323_v21 }
 0x1b5   : > { %v781_v23 = vpop.permute.xlu2 %780 }
 0x1b6   : > { %1774 = vrot.lane.b32.xlu1 %v5649_v43, %s4860_s30  ;;  %v845_v25 = vpop.permute.xlu0 %844 }
 0x1b8   : > { %v717_v29 = vpop.permute.xlu1 %716 }
 0x1b9   : > { %v1108_v36 = vsel %vm1097_vm4, %v1091_v12, %v717_v29 }
 0x1ba   : > { %v1125_v26 = vsel %vm1114_vm5, %v1108_v36, %v781_v23  ;;  %v5731_v23 = vld [vmem:[#allocation2 + $0x111] sm:$0xff] }
 0x1bb   : > { %1964 = vrot.lane.b32.xlu2 %v5657_v35, %s4859_s29  ;;  %v2291_v61 = vld [vmem:[#allocation3 + $0x38] sm:$0xff]  ;;  %v1142_v52 = vsel %vm1131_vm6, %v1125_v26, %v845_v25 }
 0x1bc   : > { %2447 = vmatmul.f32.gmra.mxu3 %v2291_v61  ;;  %1584 = vrot.lane.b32.xlu0 %v1435_v18, %s4855_s21  ;;  %v5724_v18 = vld [vmem:[#allocation2 + $0x109] sm:$0xff] }
 0x1bd   : > { %v973_v39 = vpop.permute.xlu2 %972 }
 0x1be   : > { %1966 = vrot.lane.b32.xlu1 %v5663_v16, %s4859_s29  ;;  %v1037_v0 = vpop.permute.xlu0 %1036 }
 0x1c0   : > { %v909_v33 = vpop.permute.xlu1 %908 }
 0x1c1   : > { %v1159_v41 = vsel %vm1148_vm7, %v1142_v52, %v909_v33  ;;  %v1284_v44 = vpop.f32.mrf.mxu0 }
 0x1c2   : > { %v1285_v47 = vadd.f32 %v5527_v55, %v1284_v44  ;;  %v1176_v50 = vsel %vm1165_vm8, %v1159_v41, %v973_v39 }
 0x1c3   : > { %1646 = vrot.lane.b32.xlu2 %v5670_v40, %s4856_s26  ;;  %v1193_v27 = vsel %vm1182_vm9, %v1176_v50, %v1037_v0 }
 0x1c4   : > { %v1324_v45 = vmax.f32 %v1285_v47, 0.0  ;;  %4475 = vmatmul.msk.f32.gmra.mxu0 %vm1202_vm10, %v1193_v27  ;;  %1776 = vrot.lane.b32.xlu0 %v5657_v35, %s4860_s30 }
 0x1c5   : > { %v655_v22 = vpop.permute.xlu2 %654 }
 0x1c6   : > { %1341 = vst [vmem:[#allocation3 + $0x49] sm:$0xff] %v1324_v45  ;;  %1648 = vrot.lane.b32.xlu1 %v5605_v53, %s4856_s26  ;;  %v719_v10 = vpop.permute.xlu0 %718  ;;  %2385 = vmatmul.f32.gmra.mxu2 %v1324_v45 }
 0x1c8   : > { %v591_v51 = vpop.permute.xlu1 %590 }
 0x1c9   : > { %v1075_v57 = vsel %vm225_vm0, %v5277_v32, %v591_v51  ;;  %v359_v51 = vld [vmem:[%s5035_s25 + $0xc0] sm:$0xff] }
 0x1ca   : > { %v1092_v46 = vsel %vm1080_vm3, %v1075_v57, %v655_v22  ;;  %v5761_v22 = vld [vmem:[#allocation2 + $0x112] sm:$0xff]  ;;  %392 = vst.msk [vmem:[#allocation2 + $0x139] sm:$0xff] %vm225_vm0, %v359_v51 }
 0x1cb   : > { %1838 = vrot.lane.b32.xlu2 %v5683_v17, %s4861_s6  ;;  %v1109_v32 = vsel %vm1097_vm4, %v1092_v46, %v719_v10 }
 0x1cc   : > { %1968 = vrot.lane.b32.xlu0 %v5685_v54, %s4859_s29 }
 0x1cd   : > { %v847_v28 = vpop.permute.xlu2 %846  ;;  %v2292_v15 = vld [vmem:[#allocation3 + $0x48] sm:$0xff] }
 0x1ce   : > { %1840 = vrot.lane.b32.xlu1 %v5691_v58, %s4861_s6  ;;  %2450 = vmatmul.f32.gmra.mxu3 %v2292_v15  ;;  %v911_v59 = vpop.permute.xlu0 %910  ;;  %v5769_v15 = vld [vmem:[#allocation2 + $0x122] sm:$0xff] }
 0x1d0   : > { %v783_v48 = vpop.permute.xlu1 %782 }
 0x1d1   : > { %v1126_v62 = vsel %vm1114_vm5, %v1109_v32, %v783_v48 }
 0x1d2   : > { %v1143_v63 = vsel %vm1131_vm6, %v1126_v62, %v847_v28 }
 0x1d3   : > { %1520 = vrot.lane.b32.xlu2 %v5611_v56, %s4854_s20  ;;  %v1160_v4 = vsel %vm1148_vm7, %v1143_v63, %v911_v59 }
 0x1d4   : > { %1650 = vrot.lane.b32.xlu0 %v5683_v17, %s4856_s26 }
 0x1d5   : > { %v1039_v1 = vpop.permute.xlu2 %1038 }
 0x1d6   : > { %1522 = vrot.lane.b32.xlu1 %v5630_v3, %s4854_s20  ;;  %v593_v42 = vpop.permute.xlu0 %592 }
 0x1d7   : > { %v1076_v20 = vsel %vm225_vm0, %v5297_v49, %v593_v42 }
 0x1d8   : > { %v975_v7 = vpop.permute.xlu1 %974  ;;  %v1287_v31 = vpop.f32.mrf.mxu0 }
 0x1d9   : > { %v1177_v30 = vsel %vm1165_vm8, %v1160_v4, %v975_v7  ;;  %v1288_v56 = vadd.f32 %v5527_v55, %v1287_v31  ;;  %v5788_v31 = vld [vmem:[#allocation2 + $0x120] sm:$0xff] }
 0x1da   : > { %v1194_v13 = vsel %vm1182_vm9, %v1177_v30, %v1039_v1  ;;  %v5790_v30 = vld [vmem:[#allocation2 + $0x12a] sm:$0xff] }
 0x1db   : > { %v1325_v14 = vmax.f32 %v1288_v56, 0.0  ;;  %1712 = vrot.lane.b32.xlu2 %v5621_v60, %s4858_s28  ;;  %4476 = vmatmul.msk.f32.gmra.mxu0 %vm1202_vm10, %v1194_v13  ;;  %v5796_v13 = vld [vmem:[#allocation2 + $0x128] sm:$0xff] }
 0x1dc   : > { %1842 = vrot.lane.b32.xlu0 %v5714_v9, %s4861_s6 }
 0x1dd   : > { %1342 = vst [vmem:[#allocation3 + $0x51] sm:$0xff] %v1325_v14  ;;  %v721_v3 = vpop.permute.xlu2 %720  ;;  %2388 = vmatmul.f32.gmra.mxu2 %v1325_v14 }
 0x1de   : > { %1714 = vrot.lane.b32.xlu1 %v5645_v11, %s4858_s28  ;;  %v785_v5 = vpop.permute.xlu0 %784 }
 0x1e0   : > { %v657_v19 = vpop.permute.xlu1 %656 }
 0x1e1   : > { %v1093_v21 = vsel %vm1080_vm3, %v1076_v20, %v657_v19 }
 0x1e2   : > { %v1110_v29 = vsel %vm1097_vm4, %v1093_v21, %v721_v3  ;;  %v360_v21 = vld [vmem:[%s5035_s25 + $0xc8] sm:$0xff] }
 0x1e3   : > { %1904 = vrot.lane.b32.xlu2 %v5724_v18, %s4857_s27  ;;  %v1127_v36 = vsel %vm1114_vm5, %v1110_v29, %v785_v5  ;;  %393 = vst.msk [vmem:[#allocation2 + $0x141] sm:$0xff] %vm225_vm0, %v360_v21 }
 0x1e4   : > { %v2293_v24 = vld [vmem:[#allocation3 + $0x50] sm:$0xff]  ;;  %1524 = vrot.lane.b32.xlu0 %v5621_v60, %s4854_s20 }
 0x1e5   : > { %v913_v25 = vpop.permute.xlu2 %912  ;;  %2453 = vmatmul.f32.gmra.mxu3 %v2293_v24 }
 0x1e6   : > { %1906 = vrot.lane.b32.xlu1 %v5731_v23, %s4857_s27  ;;  %v977_v12 = vpop.permute.xlu0 %976 }
 0x1e8   : > { %v849_v49 = vpop.permute.xlu1 %848 }
 0x1e9   : > { %v1144_v61 = vsel %vm1131_vm6, %v1127_v36, %v849_v49 }
 0x1ea   : > { %v1161_v60 = vsel %vm1148_vm7, %v1144_v61, %v913_v25 }
 0x1eb   : > { %1586 = vrot.lane.b32.xlu2 %v5649_v43, %s4855_s21  ;;  %v1178_v52 = vsel %vm1165_vm8, %v1161_v60, %v977_v12  ;;  %v5750_v43 = vld [vmem:[#allocation2 + $0x121] sm:$0xff] }
 0x1ec   : > { %1716 = vrot.lane.b32.xlu0 %v5724_v18, %s4858_s28 }
 0x1ed   : > { %v595_v26 = vpop.permute.xlu2 %594 }
 0x1ee   : > { %1588 = vrot.lane.b32.xlu1 %v5657_v35, %s4855_s21  ;;  %v659_v39 = vpop.permute.xlu0 %658  ;;  %v1077_v50 = vsel %vm225_vm0, %v5461_v8, %v595_v26 }
 0x1ef   : > { %v1290_v0 = vpop.f32.mrf.mxu0  ;;  %v1094_v10 = vsel %vm1080_vm3, %v1077_v50, %v659_v39  ;;  %v5817_v39 = vld [vmem:[#allocation2 + $0x138] sm:$0xff] }
 0x1f0   : > { %v1291_v33 = vadd.f32 %v5527_v55, %v1290_v0  ;;  %v1041_v41 = vpop.permute.xlu1 %1040 }
 0x1f1   : > { %v1195_v44 = vsel %vm1182_vm9, %v1178_v52, %v1041_v41  ;;  %v5831_v41 = vld [vmem:[#allocation2 + $0x129] sm:$0xff] }
 0x1f2   : > { %v1326_v47 = vmax.f32 %v1291_v33, 0.0  ;;  %4477 = vmatmul.msk.f32.gmra.mxu0 %vm1202_vm10, %v1195_v44 }
 0x1f3   : > { %1778 = vrot.lane.b32.xlu2 %v5663_v16, %s4860_s30 }
 0x1f4   : > { %1343 = vst [vmem:[#allocation3 + $0x61] sm:$0xff] %v1326_v47  ;;  %1908 = vrot.lane.b32.xlu0 %v5750_v43, %s4857_s27  ;;  %2391 = vmatmul.f32.gmra.mxu2 %v1326_v47 }
 0x1f5   : > { %v787_v35 = vpop.permute.xlu2 %786 }
 0x1f6   : > { %1780 = vrot.lane.b32.xlu1 %v5685_v54, %s4860_s30  ;;  %v851_v27 = vpop.permute.xlu0 %850 }
 0x1f8   : > { %v723_v45 = vpop.permute.xlu1 %722 }
 0x1f9   : > { %v1111_v57 = vsel %vm1097_vm4, %v1094_v10, %v723_v45 }
 0x1fa   : > { %v1128_v8 = vsel %vm1114_vm5, %v1111_v57, %v787_v35  ;;  %v5838_v35 = vld [vmem:[#allocation2 + $0x139] sm:$0xff] }
 0x1fb   : > { %1970 = vrot.lane.b32.xlu2 %v5761_v22, %s4859_s29  ;;  %v2294_v28 = vld [vmem:[#allocation3 + $0x60] sm:$0xff]  ;;  %v1145_v48 = vsel %vm1131_vm6, %v1128_v8, %v851_v27 }
 0x1fc   : > { %2456 = vmatmul.f32.gmra.mxu3 %v2294_v28  ;;  %1590 = vrot.lane.b32.xlu0 %v5663_v16, %s4855_s21  ;;  %v362_v28 = vld [vmem:[%s5035_s25 + $0xd8] sm:$0xff] }
 0x1fd   : > { %v979_v46 = vpop.permute.xlu2 %978  ;;  %395 = vst.msk [vmem:[#allocation2 + $0x159] sm:$0xff] %vm225_vm0, %v362_v28 }
 0x1fe   : > { %1972 = vrot.lane.b32.xlu1 %v5769_v15, %s4859_s29  ;;  %v1043_v59 = vpop.permute.xlu0 %1042 }
 0x200   : > { %v915_v32 = vpop.permute.xlu1 %914 }
 0x201   : > { %v1162_v38 = vsel %vm1148_vm7, %v1145_v48, %v915_v32  ;;  %v1293_v62 = vpop.f32.mrf.mxu0 }
 0x202   : > { %v1294_v63 = vadd.f32 %v5527_v55, %v1293_v62  ;;  %v1179_v1 = vsel %vm1165_vm8, %v1162_v38, %v979_v46 }
 0x203   : > { %1652 = vrot.lane.b32.xlu2 %v5691_v58, %s4856_s26  ;;  %v1196_v16 = vsel %vm1182_vm9, %v1179_v1, %v1043_v59  ;;  %v5861_v1 = vld [vmem:[#allocation2 + $0x141] sm:$0xff] }
 0x204   : > { %v1327_v42 = vmax.f32 %v1294_v63, 0.0  ;;  %4478 = vmatmul.msk.f32.gmra.mxu0 %vm1202_vm10, %v1196_v16  ;;  %1782 = vrot.lane.b32.xlu0 %v5761_v22, %s4860_s30 }
 0x205   : > { %v1581_v2 = vpop.permute.xlu2 %1580 }
 0x206   : > { %1344 = vst [vmem:[#allocation3 + $0x69] sm:$0xff] %v1327_v42  ;;  %1654 = vrot.lane.b32.xlu1 %v5714_v9, %s4856_s26  ;;  %v1645_v4 = vpop.permute.xlu0 %1644  ;;  %2394 = vmatmul.f32.gmra.mxu2 %v1327_v42 }
 0x208   : > { %v1517_v7 = vpop.permute.xlu1 %1516 }
 0x209   : > { %v2012_v56 = vsel %vm225_vm0, %v5572_v34, %v1517_v7 }
 0x20a   : > { %v2028_v5 = vsel %vm1080_vm3, %v2012_v56, %v1581_v2 }
 0x20b   : > { %1844 = vrot.lane.b32.xlu2 %v5788_v31, %s4861_s6  ;;  %v2044_v34 = vsel %vm1097_vm4, %v2028_v5, %v1645_v4  ;;  %v5876_v4 = vld [vmem:[#allocation2 + $0x13a] sm:$0xff] }
 0x20c   : > { %1974 = vrot.lane.b32.xlu0 %v5790_v30, %s4859_s29 }
 0x20d   : > { %v1773_v14 = vpop.permute.xlu2 %1772  ;;  %v2295_v3 = vld [vmem:[#allocation3 + $0x68] sm:$0xff] }
 0x20e   : > { %1846 = vrot.lane.b32.xlu1 %v5796_v13, %s4861_s6  ;;  %2459 = vmatmul.f32.gmra.mxu3 %v2295_v3  ;;  %v1837_v19 = vpop.permute.xlu0 %1836  ;;  %v5882_v3 = vld [vmem:[#allocation2 + $0x142] sm:$0xff] }
 0x210   : > { %v1709_v20 = vpop.permute.xlu1 %1708 }
 0x211   : > { %v2060_v24 = vsel %vm1114_vm5, %v2044_v34, %v1709_v20 }
 0x212   : > { %v2076_v25 = vsel %vm1131_vm6, %v2060_v24, %v1773_v14 }
 0x213   : > { %1526 = vrot.lane.b32.xlu2 %v5645_v11, %s4854_s20  ;;  %v2092_v49 = vsel %vm1148_vm7, %v2076_v25, %v1837_v19 }
 0x214   : > { %1656 = vrot.lane.b32.xlu0 %v5788_v31, %s4856_s26 }
 0x215   : > { %v1965_v29 = vpop.permute.xlu2 %1964 }
 0x216   : > { %1528 = vrot.lane.b32.xlu1 %v5724_v18, %s4854_s20  ;;  %v1519_v12 = vpop.permute.xlu0 %1518 }
 0x217   : > { %v2013_v44 = vsel %vm225_vm0, %v5582_v37, %v1519_v12  ;;  %v361_v37 = vld [vmem:[%s5035_s25 + $0xd0] sm:$0xff] }
 0x218   : > { %v1901_v36 = vpop.permute.xlu1 %1900  ;;  %v1296_v61 = vpop.f32.mrf.mxu0  ;;  %394 = vst.msk [vmem:[#allocation2 + $0x151] sm:$0xff] %vm225_vm0, %v361_v37  ;;  %v4560_v37 = vld [vmem:[%s8170_s3 + $0x270] sm:$0xff] }
 0x219   : > { %v2108_v60 = vsel %vm1165_vm8, %v2092_v49, %v1901_v36  ;;  %v1297_v26 = vadd.f32 %v5527_v55, %v1296_v61 }
 0x21a   : > { %v2124_v11 = vsel %vm1182_vm9, %v2108_v60, %v1965_v29  ;;  %v5905_v60 = vld [vmem:[#allocation2 + $0x140] sm:$0xff] }
 0x21b   : > { %v5820_v0 = vmax.f32 %v1297_v26, 0.0  ;;  %1718 = vrot.lane.b32.xlu2 %v5731_v23, %s4858_s28  ;;  %4482 = vmatmul.msk.f32.vlgmr.msra.gmra.mxu1 %vm1202_vm10, %v2124_v11 }
 0x21c   : > { %1848 = vrot.lane.b32.xlu0 %v5817_v39, %s4861_s6 }
 0x21d   : > { %1345 = vst [vmem:[#allocation3 + $0x79] sm:$0xff] %v5820_v0  ;;  %v1647_v18 = vpop.permute.xlu2 %1646  ;;  %2397 = vmatmul.f32.gmra.mxu2 %v5820_v0 }
 0x21e   : > { %1720 = vrot.lane.b32.xlu1 %v5750_v43, %s4858_s28  ;;  %v1711_v52 = vpop.permute.xlu0 %1710 }
 0x21f   : > { %v5907_v26 = vld [vmem:[#allocation2 + $0x152] sm:$0xff] }
 0x220   : > { %v1583_v33 = vpop.permute.xlu1 %1582 }
 0x221   : > { %v2029_v47 = vsel %vm1080_vm3, %v2013_v44, %v1583_v33 }
 0x222   : > { %v2045_v45 = vsel %vm1097_vm4, %v2029_v47, %v1647_v18  ;;  %v5913_v18 = vld [vmem:[#allocation2 + $0x150] sm:$0xff] }
 0x223   : > { %1910 = vrot.lane.b32.xlu2 %v5831_v41, %s4857_s27  ;;  %v2061_v57 = vsel %vm1114_vm5, %v2045_v45, %v1711_v52  ;;  %v363_v45 = vld [vmem:[%s5035_s25 + $0xe0] sm:$0xff] }
 0x224   : > { %v2296_v50 = vld [vmem:[#allocation3 + $0x78] sm:$0xff]  ;;  %1530 = vrot.lane.b32.xlu0 %v5731_v23, %s4854_s20  ;;  %396 = vst.msk [vmem:[#allocation2 + $0x169] sm:$0xff] %vm225_vm0, %v363_v45  ;;  %v4550_v45 = vld [vmem:[%s8170_s3 + $0x220] sm:$0xff] }
 0x225   : > { %v1839_v27 = vpop.permute.xlu2 %1838  ;;  %2462 = vmatmul.f32.gmra.mxu3 %v2296_v50 }
 0x226   : > { %1912 = vrot.lane.b32.xlu1 %v5838_v35, %s4857_s27  ;;  %v1903_v10 = vpop.permute.xlu0 %1902 }
 0x228   : > { %v1775_v51 = vpop.permute.xlu1 %1774 }
 0x229   : > { %v2077_v8 = vsel %vm1131_vm6, %v2061_v57, %v1775_v51  ;;  %v4559_v51 = vld [vmem:[%s8170_s3 + $0x268] sm:$0xff] }
 0x22a   : > { %v2093_v23 = vsel %vm1148_vm7, %v2077_v8, %v1839_v27 }
 0x22b   : > { %1592 = vrot.lane.b32.xlu2 %v5685_v54, %s4855_s21  ;;  %v2109_v32 = vsel %vm1165_vm8, %v2093_v23, %v1903_v10  ;;  %v4558_v23 = vld [vmem:[%s8170_s3 + $0x260] sm:$0xff] }
 0x22c   : > { %1722 = vrot.lane.b32.xlu0 %v5831_v41, %s4858_s28 }
 0x22d   : > { %v1521_v46 = vpop.permute.xlu2 %1520 }
 0x22e   : > { %1594 = vrot.lane.b32.xlu1 %v5761_v22, %s4855_s21  ;;  %v1585_v59 = vpop.permute.xlu0 %1584  ;;  %v2014_v16 = vsel %vm225_vm0, %v5590_v6, %v1521_v46  ;;  %v364_v46 = vld [vmem:[%s5035_s25 + $0xe8] sm:$0xff] }
 0x22f   : > { %v1299_v48 = vpop.f32.mrf.mxu0  ;;  %v2030_v7 = vsel %vm1080_vm3, %v2014_v16, %v1585_v59  ;;  %397 = vst.msk [vmem:[#allocation2 + $0x171] sm:$0xff] %vm225_vm0, %v364_v46 }
 0x230   : > { %v1300_v38 = vadd.f32 %v5527_v55, %v1299_v48  ;;  %v1967_v62 = vpop.permute.xlu1 %1966 }
 0x231   : > { %v2125_v63 = vsel %vm1182_vm9, %v2109_v32, %v1967_v62 }
 0x232   : > { %v5863_v54 = vmax.f32 %v1300_v38, 0.0  ;;  %4483 = vmatmul.msk.f32.gmra.mxu1 %vm1202_vm10, %v2125_v63  ;;  %v5954_v63 = vld [vmem:[#allocation2 + $0x158] sm:$0xff] }
 0x233   : > { %1784 = vrot.lane.b32.xlu2 %v5769_v15, %s4860_s30 }
 0x234   : > { %1346 = vst [vmem:[#allocation3 + $0x81] sm:$0xff] %v5863_v54  ;;  %1914 = vrot.lane.b32.xlu0 %v5861_v1, %s4857_s27  ;;  %2400 = vmatmul.f32.gmra.mxu2 %v5863_v54 }
 0x235   : > { %v1713_v22 = vpop.permute.xlu2 %1712 }
 0x236   : > { %1786 = vrot.lane.b32.xlu1 %v5790_v30, %s4860_s30  ;;  %v1777_v42 = vpop.permute.xlu0 %1776 }
 0x238   : > { %v1649_v2 = vpop.permute.xlu1 %1648 }
 0x239   : > { %v2046_v56 = vsel %vm1097_vm4, %v2030_v7, %v1649_v2  ;;  %v4556_v2 = vld [vmem:[%s8170_s3 + $0x250] sm:$0xff] }
 0x23a   : > { %v2062_v6 = vsel %vm1114_vm5, %v2046_v56, %v1713_v22  ;;  %v4576_v22 = vld [vmem:[%s8170_s3 + $0x2f0] sm:$0xff]  ;;  %v4574_v56 = vld [vmem:[%s8170_s3 + $0x2e0] sm:$0xff] }
 0x23b   : > { %1976 = vrot.lane.b32.xlu2 %v5876_v4, %s4859_s29  ;;  %v2297_v14 = vld [vmem:[#allocation3 + $0x80] sm:$0xff]  ;;  %v2078_v20 = vsel %vm1131_vm6, %v2062_v6, %v1777_v42  ;;  %v4555_v6 = vld [vmem:[%s8170_s3 + $0x248] sm:$0xff] }
 0x23c   : > { %2465 = vmatmul.f32.gmra.mxu3 %v2297_v14  ;;  %1596 = vrot.lane.b32.xlu0 %v5769_v15, %s4855_s21 }
 0x23d   : > { %v1905_v5 = vpop.permute.xlu2 %1904 }
 0x23e   : > { %1978 = vrot.lane.b32.xlu1 %v5882_v3, %s4859_s29  ;;  %v1969_v19 = vpop.permute.xlu0 %1968 }
 0x240   : > { %v1841_v34 = vpop.permute.xlu1 %1840 }
 0x241   : > { %v2094_v21 = vsel %vm1148_vm7, %v2078_v20, %v1841_v34  ;;  %v1302_v24 = vpop.f32.mrf.mxu0  ;;  %v4573_v20 = vld [vmem:[%s8170_s3 + $0x2d8] sm:$0xff]  ;;  %v4572_v34 = vld [vmem:[%s8170_s3 + $0x2d0] sm:$0xff] }
 0x242   : > { %v1303_v25 = vadd.f32 %v5527_v55, %v1302_v24  ;;  %v2110_v29 = vsel %vm1165_vm8, %v2094_v21, %v1905_v5  ;;  %v4554_v21 = vld [vmem:[%s8170_s3 + $0x240] sm:$0xff] }
 0x243   : > { %1658 = vrot.lane.b32.xlu2 %v5796_v13, %s4856_s26  ;;  %v2126_v15 = vsel %vm1182_vm9, %v2110_v29, %v1969_v19  ;;  %v5983_v19 = vld [vmem:[#allocation2 + $0x151] sm:$0xff]  ;;  %v5999_v29 = vld [vmem:[#allocation2 + $0x159] sm:$0xff] }
 0x244   : > { %v5896_v12 = vmax.f32 %v1303_v25, 0.0  ;;  %4484 = vmatmul.msk.f32.gmra.mxu1 %vm1202_vm10, %v2126_v15  ;;  %1788 = vrot.lane.b32.xlu0 %v5876_v4, %s4860_s30 }
 0x245   : > { %v1587_v49 = vpop.permute.xlu2 %1586 }
 0x246   : > { %1347 = vst [vmem:[#allocation3 + $0x91] sm:$0xff] %v5896_v12  ;;  %1660 = vrot.lane.b32.xlu1 %v5817_v39, %s4856_s26  ;;  %v1651_v36 = vpop.permute.xlu0 %1650  ;;  %2403 = vmatmul.f32.gmra.mxu2 %v5896_v12 }
 0x248   : > { %v1523_v61 = vpop.permute.xlu1 %1522 }
 0x249   : > { %v2015_v11 = vsel %vm225_vm0, %v5670_v40, %v1523_v61  ;;  %v4561_v40 = vld [vmem:[%s8170_s3 + $0x278] sm:$0xff] }
 0x24a   : > { %v2031_v44 = vsel %vm1080_vm3, %v2015_v11, %v1587_v49  ;;  %2742 = vmatpush.msrb.mxu2 %v4561_v40  ;;  %v4571_v49 = vld [vmem:[%s8170_s3 + $0x2c8] sm:$0xff]  ;;  %v4568_v40 = vld [vmem:[%s8170_s3 + $0x2b0] sm:$0xff] }
 0x24b   : > { %1850 = vrot.lane.b32.xlu2 %v5905_v60, %s4861_s6  ;;  %v2047_v27 = vsel %vm1097_vm4, %v2031_v44, %v1651_v36 }
 0x24c   : > { %1980 = vrot.lane.b32.xlu0 %v5907_v26, %s4859_s29  ;;  %2743 = vmatpush.msrb.mxu2 %v4560_v37  ;;  %v4549_v37 = vld [vmem:[%s8170_s3 + $0x218] sm:$0xff] }
 0x24d   : > { %v1779_v52 = vpop.permute.xlu2 %1778  ;;  %v2298_v33 = vld [vmem:[#allocation3 + $0x90] sm:$0xff] }
 0x24e   : > { %1852 = vrot.lane.b32.xlu1 %v5913_v18, %s4861_s6  ;;  %2468 = vmatmul.f32.gmra.mxu3 %v2298_v33  ;;  %v1843_v47 = vpop.permute.xlu0 %1842  ;;  %v4569_v33 = vld [vmem:[%s8170_s3 + $0x2b8] sm:$0xff] }
 0x24f   : > { %2744 = vmatpush.msrb.mxu2 %v4559_v51 }
 0x250   : > { %v1715_v50 = vpop.permute.xlu1 %1714 }
 0x251   : > { %v2063_v10 = vsel %vm1114_vm5, %v2047_v27, %v1715_v50  ;;  %2745 = vmatpush.msrb.mxu2 %v4558_v23  ;;  %v4565_v23 = vld [vmem:[%s8170_s3 + $0x298] sm:$0xff] }
 0x252   : > { %v2079_v57 = vsel %vm1131_vm6, %v2063_v10, %v1779_v52  ;;  %v4552_v52 = vld [vmem:[%s8170_s3 + $0x230] sm:$0xff]  ;;  %v4567_v10 = vld [vmem:[%s8170_s3 + $0x2a8] sm:$0xff] }
 0x253   : > { %1532 = vrot.lane.b32.xlu2 %v5750_v43, %s4854_s20  ;;  %v4577_v43 = vld [vmem:[%s8170_s3 + $0x2f8] sm:$0xff]  ;;  %v2095_v59 = vsel %vm1148_vm7, %v2079_v57, %v1843_v47  ;;  %v4551_v47 = vld [vmem:[%s8170_s3 + $0x228] sm:$0xff] }
 0x254   : > { %1662 = vrot.lane.b32.xlu0 %v5905_v60, %s4856_s26  ;;  %2856 = vmatpush.msrb.mxu3 %v4577_v43 }
 0x255   : > { %v1971_v28 = vpop.permute.xlu2 %1970 }
 0x256   : > { %1534 = vrot.lane.b32.xlu1 %v5831_v41, %s4854_s20  ;;  %v1525_v8 = vpop.permute.xlu0 %1524  ;;  %v4557_v41 = vld [vmem:[%s8170_s3 + $0x258] sm:$0xff]  ;;  %2857 = vmatpush.msrb.mxu3 %v4576_v22  ;;  %v4564_v22 = vld [vmem:[%s8170_s3 + $0x290] sm:$0xff] }
 0x257   : > { %2746 = vmatpush.msrb.mxu2 %v4557_v41  ;;  %v2016_v24 = vsel %vm225_vm0, %v5605_v53, %v1525_v8  ;;  %v4553_v53 = vld [vmem:[%s8170_s3 + $0x238] sm:$0xff]  ;;  %v4548_v8 = vld [vmem:[%s8170_s3 + $0x210] sm:$0xff] }
 0x258   : > { %v1907_v48 = vpop.permute.xlu1 %1906  ;;  %v1305_v32 = vpop.f32.mrf.mxu0 }
 0x259   : > { %v2111_v38 = vsel %vm1165_vm8, %v2095_v59, %v1907_v48  ;;  %v1306_v62 = vadd.f32 %v5527_v55, %v1305_v32  ;;  %v4575_v55 = vld [vmem:[%s8170_s3 + $0x2e8] sm:$0xff]  ;;  %2747 = vmatpush.msrb.mxu2 %v4556_v2  ;;  %v6058_v59 = vld [vmem:[%s8169_s2] ss:$0 sm:$0xff] }
 0x25a   : > { %v2127_v16 = vsel %vm1182_vm9, %v2111_v38, %v1971_v28  ;;  %2858 = vmatpush.msrb.mxu3 %v4575_v55  ;;  %v4547_v32 = vld [vmem:[%s8170_s3 + $0x208] sm:$0xff] }
 0x25b   : > { %v5960_v42 = vmax.f32 %v1306_v62, 0.0  ;;  %1724 = vrot.lane.b32.xlu2 %v5838_v35, %s4858_s28  ;;  %4485 = vmatmul.msk.f32.gmra.mxu1 %vm1202_vm10, %v2127_v16  ;;  %v6065_v38 = vld [vmem:[#allocation2 + $0x169] sm:$0xff]  ;;  %v4546_v16 = vld [vmem:[%s8170_s3 + $0x200] sm:$0xff] }
 0x25c   : > { %1854 = vrot.lane.b32.xlu0 %v5954_v63, %s4861_s6  ;;  %2859 = vmatpush.msrb.mxu3 %v4574_v56  ;;  %v4563_v55 = vld [vmem:[%s8170_s3 + $0x288] sm:$0xff] }
 0x25d   : > { %1348 = vst [vmem:[#allocation3 + $0x99] sm:$0xff] %v5960_v42  ;;  %v1653_v7 = vpop.permute.xlu2 %1652  ;;  %2406 = vmatmul.f32.gmra.mxu2 %v5960_v42 }
 0x25e   : > { %1726 = vrot.lane.b32.xlu1 %v5861_v1, %s4858_s28  ;;  %v1717_v14 = vpop.permute.xlu0 %1716  ;;  %2860 = vmatpush.msrb.mxu3 %v4573_v20 }
 0x25f   : > { %2748 = vmatpush.msrb.mxu2 %v4555_v6 }
 0x260   : > { %v1589_v5 = vpop.permute.xlu1 %1588  ;;  %2861 = vmatpush.msrb.mxu3 %v4572_v34  ;;  %v365_v34 = vld [vmem:[%s5035_s25 + $0xf0] sm:$0xff] }
 0x261   : > { %v2032_v25 = vsel %vm1080_vm3, %v2016_v24, %v1589_v5  ;;  %2749 = vmatpush.msrb.mxu2 %v4554_v21  ;;  %v6092_v5 = vld [vmem:[#allocation2 + $0x15a] sm:$0xff]  ;;  %398 = vst.msk [vmem:[#allocation2 + $0x181] sm:$0xff] %vm225_vm0, %v365_v34  ;;  %v6100_v24 = vld [vmem:[#allocation2 + $0x16a] sm:$0xff] }
 0x262   : > { %v2048_v61 = vsel %vm1097_vm4, %v2032_v25, %v1653_v7  ;;  %2862 = vmatpush.msrb.mxu3 %v4571_v49 }
 0x263   : > { %1916 = vrot.lane.b32.xlu2 %v5983_v19, %s4857_s27  ;;  %2750 = vmatpush.msrb.mxu2 %v4553_v53  ;;  %v2064_v50 = vsel %vm1114_vm5, %v2048_v61, %v1717_v14  ;;  %v4562_v14 = vld [vmem:[%s8170_s3 + $0x280] sm:$0xff] }
 0x264   : > { %v2299_v15 = vld [vmem:[#allocation3 + $0x98] sm:$0xff]  ;;  %1536 = vrot.lane.b32.xlu0 %v5838_v35, %s4854_s20  ;;  %v4570_v35 = vld [vmem:[%s8170_s3 + $0x2c0] sm:$0xff] }
 0x265   : > { %v1845_v36 = vpop.permute.xlu2 %1844  ;;  %2471 = vmatmul.f32.gmra.mxu3 %v2299_v15  ;;  %2751 = vmatpush.msrb.mxu2 %v4552_v52 }
 0x266   : > { %1918 = vrot.lane.b32.xlu1 %v5999_v29, %s4857_s27  ;;  %v1909_v11 = vpop.permute.xlu0 %1908  ;;  %2863 = vmatpush.msrb.mxu3 %v4570_v35 }
 0x267   : > { %2752 = vmatpush.msrb.mxu2 %v4551_v47 }
 0x268   : > { %v1781_v44 = vpop.permute.xlu1 %1780  ;;  %2864 = vmatpush.msrb.mxu3 %v4569_v33 }
 0x269   : > { %v2080_v27 = vsel %vm1131_vm6, %v2064_v50, %v1781_v44  ;;  %2753 = vmatpush.msrb.mxu2 %v4550_v45  ;;  %v366_v50 = vld [vmem:[%s5035_s25 + $0xf8] sm:$0xff] }
 0x26a   : > { %2865 = vmatpush.msrb.mxu3 %v4568_v40  ;;  %v2096_v51 = vsel %vm1148_vm7, %v2080_v27, %v1845_v36  ;;  %v6124_v27 = vld [vmem:[#allocation2 + $0x168] sm:$0xff]  ;;  %399 = vst.msk [vmem:[#allocation2 + $0x189] sm:$0xff] %vm225_vm0, %v366_v50  ;;  %v6127_v45 = vld [vmem:[#allocation2 + $0x172] sm:$0xff] }
 0x26b   : > { %1598 = vrot.lane.b32.xlu2 %v5790_v30, %s4855_s21  ;;  %v4566_v30 = vld [vmem:[%s8170_s3 + $0x2a0] sm:$0xff]  ;;  %2754 = vmatpush.msrb.mxu2 %v4549_v37  ;;  %v2112_v46 = vsel %vm1165_vm8, %v2096_v51, %v1909_v11  ;;  %v6133_v37 = vld [vmem:[#allocation2 + $0x170] sm:$0xff] }
 0x26c   : > { %1728 = vrot.lane.b32.xlu0 %v5983_v19, %s4858_s28  ;;  %2866 = vmatpush.msrb.mxu3 %v4567_v10 }
 0x26d   : > { %v1527_v57 = vpop.permute.xlu2 %1526  ;;  %2755 = vmatpush.msrb.mxu2 %v4548_v8 }
 0x26e   : > { %1600 = vrot.lane.b32.xlu1 %v5876_v4, %s4855_s21  ;;  %v1591_v28 = vpop.permute.xlu0 %1590  ;;  %2867 = vmatpush.msrb.mxu3 %v4566_v30  ;;  %v2017_v7 = vsel %vm225_vm0, %v5683_v17, %v1527_v57 }
 0x26f   : > { %v1308_v43 = vpop.f32.mrf.mxu0  ;;  %2756 = vmatpush.msrb.mxu2 %v4547_v32  ;;  %v2033_v20 = vsel %vm1080_vm3, %v2017_v7, %v1591_v28  ;;  %v2709_v28 = vld [vmem:[#allocation3 + $0x19] sm:$0xff]  ;;  %v2710_v32 = vld [vmem:[#allocation3 + $0x21] sm:$0xff] }
 0x270   : > { %v1309_v4 = vadd.f32 %v6058_v59, %v1308_v43  ;;  %v1973_v48 = vpop.permute.xlu1 %1972  ;;  %2868 = vmatpush.msrb.mxu3 %v4565_v23 }
 0x271   : > { %v2128_v41 = vsel %vm1182_vm9, %v2112_v46, %v1973_v48  ;;  %2757 = vmatpush.msrb.mxu2 %v4546_v16 }
 0x272   : > { %v6067_v62 = vmax.f32 %v1309_v4, 0.0  ;;  %4486 = vmatmul.msk.f32.gmra.mxu1 %vm1202_vm10, %v2128_v41  ;;  %2869 = vmatpush.msrb.mxu3 %v4564_v22  ;;  %v2823_v4 = vld [vmem:[#allocation3 + $0x1a] sm:$0xff] }
 0x273   : > { %1790 = vrot.lane.b32.xlu2 %v5882_v3, %s4860_s30 }
 0x274   : > { %1349 = vst [vmem:[#allocation3 + $0xa9] sm:$0xff] %v6067_v62  ;;  %1920 = vrot.lane.b32.xlu0 %v6065_v38, %s4857_s27  ;;  %2409 = vmatmul.f32.gmra.mxu2 %v6067_v62 }
 0x275   : > { %v1719_v2 = vpop.permute.xlu2 %1718  ;;  %2870 = vmatpush.msrb.mxu3 %v4563_v55 }
 0x276   : > { %1792 = vrot.lane.b32.xlu1 %v5907_v26, %s4860_s30  ;;  %v1783_v56 = vpop.permute.xlu0 %1782 }
 0x277   : > { %2871 = vmatpush.msrb.mxu3 %v4562_v14  ;;  %v6160_v14 = vld [vmem:[#allocation3 + $0x22] sm:$0xff] }
 0x278   : > { %v1655_v6 = vpop.permute.xlu1 %1654 }
 0x279   : > { %v2049_v21 = vsel %vm1097_vm4, %v2033_v20, %v1655_v6  ;;  %v2711_v20 = vld [vmem:[#allocation3 + $0x31] sm:$0xff] }
 0x27a   : > { %v2065_v25 = vsel %vm1114_vm5, %v2049_v21, %v1719_v2  ;;  %v6152_v2 = vld [vmem:[#allocation2 + $0x180] sm:$0xff]  ;;  %v6165_v21 = vld [vmem:[#allocation2 + $0x171] sm:$0xff] }
 0x27b   : > { %1982 = vrot.lane.b32.xlu2 %v6092_v5, %s4859_s29  ;;  %v2300_v17 = vld [vmem:[#allocation3 + $0xa8] sm:$0xff]  ;;  %v2081_v53 = vsel %vm1131_vm6, %v2065_v25, %v1783_v56 }
 0x27c   : > { %2474 = vmatmul.f32.gmra.mxu3 %v2300_v17  ;;  %1602 = vrot.lane.b32.xlu0 %v5882_v3, %s4855_s21  ;;  %v453_v17 = vld [vmem:[#allocation2 + $0xaa] sm:$0xff] }
 0x27d   : > { %v1911_v15 = vpop.permute.xlu2 %1910 }
 0x27e   : > { %1984 = vrot.lane.b32.xlu1 %v6100_v24, %s4859_s29  ;;  %v1975_v49 = vpop.permute.xlu0 %1974 }
 0x280   : > { %v1847_v36 = vpop.permute.xlu1 %1846 }
 0x281   : > { %v2097_v61 = vsel %vm1148_vm7, %v2081_v53, %v1847_v36  ;;  %v1311_v11 = vpop.f32.mrf.mxu0  ;;  %v6173_v36 = vld [vmem:[#allocation3 + $0x32] sm:$0xff] }
 0x282   : > { %v1312_v35 = vadd.f32 %v6058_v59, %v1311_v11  ;;  %v2113_v52 = vsel %vm1165_vm8, %v2097_v61, %v1911_v15 }
 0x283   : > { %1664 = vrot.lane.b32.xlu2 %v5913_v18, %s4856_s26  ;;  %v2129_v3 = vsel %vm1182_vm9, %v2113_v52, %v1975_v49  ;;  %v437_v49 = vld [vmem:[#allocation2 + $0xa9] sm:$0xff] }
 0x284   : > { %v6114_v33 = vmax.f32 %v1312_v35, 0.0  ;;  %4487 = vmatmul.msk.f32.gmra.mxu1 %vm1202_vm10, %v2129_v3  ;;  %1794 = vrot.lane.b32.xlu0 %v6092_v5, %s4860_s30  ;;  %v2712_v35 = vld [vmem:[#allocation3 + $0x39] sm:$0xff] }
 0x285   : > { %v1593_v44 = vpop.permute.xlu2 %1592 }
 0x286   : > { %1350 = vst [vmem:[#allocation3 + $0xb1] sm:$0xff] %v6114_v33  ;;  %1666 = vrot.lane.b32.xlu1 %v5954_v63, %s4856_s26  ;;  %v1657_v47 = vpop.permute.xlu0 %1656  ;;  %2412 = vmatmul.f32.gmra.mxu2 %v6114_v33 }
 0x288   : > { %v1529_v40 = vpop.permute.xlu1 %1528 }
 0x289   : > { %v2018_v10 = vsel %vm225_vm0, %v5691_v58, %v1529_v40  ;;  %v6187_v40 = vld [vmem:[#allocation3 + $0x3a] sm:$0xff] }
 0x28a   : > { %v2034_v57 = vsel %vm1080_vm3, %v2018_v10, %v1593_v44  ;;  %v6182_v44 = vld [vmem:[#allocation2 + $0x182] sm:$0xff] }
 0x28b   : > { %1856 = vrot.lane.b32.xlu2 %v6124_v27, %s4861_s6  ;;  %v2050_v8 = vsel %vm1097_vm4, %v2034_v57, %v1657_v47 }
 0x28c   : > { %1986 = vrot.lane.b32.xlu0 %v6127_v45, %s4859_s29 }
 0x28d   : > { %v1785_v63 = vpop.permute.xlu2 %1784  ;;  %v2301_v51 = vld [vmem:[#allocation3 + $0xb0] sm:$0xff] }
 0x28e   : > { %1858 = vrot.lane.b32.xlu1 %v6133_v37, %s4861_s6  ;;  %2477 = vmatmul.f32.gmra.mxu3 %v2301_v51  ;;  %v1849_v30 = vpop.permute.xlu0 %1848 }
 0x28f   : > { %2758 = vmatmul.f32.vlgmr.msrb.gmra.mxu2 %v2709_v28  ;;  %v501_v28 = vld [vmem:[#allocation2 + $0xc2] sm:$0xff] }
 0x290   : > { %v1721_v58 = vpop.permute.xlu1 %1720 }
 0x291   : > { %v2066_v43 = vsel %vm1114_vm5, %v2050_v8, %v1721_v58  ;;  %v485_v8 = vld [vmem:[#allocation2 + $0xc1] sm:$0xff] }
 0x292   : > { %v2082_v23 = vsel %vm1131_vm6, %v2066_v43, %v1785_v63  ;;  %v2713_v63 = vld [vmem:[#allocation3 + $0x49] sm:$0xff] }
 0x293   : > { %1538 = vrot.lane.b32.xlu2 %v5861_v1, %s4854_s20  ;;  %v2098_v41 = vsel %vm1148_vm7, %v2082_v23, %v1849_v30  ;;  %v6199_v23 = vld [vmem:[#allocation3 + $0x4a] sm:$0xff] }
 0x294   : > { %1668 = vrot.lane.b32.xlu0 %v6124_v27, %s4856_s26 }
 0x295   : > { %v1977_v46 = vpop.permute.xlu2 %1976 }
 0x296   : > { %1540 = vrot.lane.b32.xlu1 %v5983_v19, %s4854_s20  ;;  %2872 = vmatmul.f32.vlgmr.msrb.gmra.mxu3 %v2823_v4  ;;  %v1531_v48 = vpop.permute.xlu0 %1530 }
 0x297   : > { %2761 = vmatmul.f32.gmra.mxu2 %v2710_v32  ;;  %v2019_v25 = vsel %vm225_vm0, %v5714_v9, %v1531_v48  ;;  %v2714_v48 = vld [vmem:[#allocation3 + $0x51] sm:$0xff] }
 0x298   : > { %v2205_v22 = vpop.f32.mrf.mxu1  ;;  %v1913_v16 = vpop.permute.xlu1 %1912 }
 0x299   : > { %v2206_v1 = vadd.f32 %v6058_v59, %v2205_v22  ;;  %v2114_v55 = vsel %vm1165_vm8, %v2098_v41, %v1913_v16  ;;  %v6205_v41 = vld [vmem:[#allocation2 + $0x181] sm:$0xff] }
 0x29a   : > { %v2130_v7 = vsel %vm1182_vm9, %v2114_v55, %v1977_v46  ;;  %v6214_v55 = vld [vmem:[#allocation3 + $0x52] sm:$0xff] }
 0x29b   : > { %v2253_v56 = vmax.f32 %v2206_v1, 0.0  ;;  %1730 = vrot.lane.b32.xlu2 %v5999_v29, %s4858_s28  ;;  %4488 = vmatmul.msk.f32.gmra.mxu1 %vm1202_vm10, %v2130_v7 }
 0x29c   : > { %1860 = vrot.lane.b32.xlu0 %v6152_v2, %s4861_s6 }
 0x29d   : > { %2270 = vst [vmem:[#allocation3 + $0xd9] sm:$0xff] %v2253_v56  ;;  %v1659_v19 = vpop.permute.xlu2 %1658  ;;  %v2715_v56 = vld [vmem:[#allocation3 + $0x61] sm:$0xff] }
 0x29e   : > { %1732 = vrot.lane.b32.xlu1 %v6065_v38, %s4858_s28  ;;  %2875 = vmatmul.f32.gmra.mxu3 %v6160_v14  ;;  %v1723_v6 = vpop.permute.xlu0 %1722 }
 0x29f   : > { %2764 = vmatmul.f32.gmra.mxu2 %v2711_v20  ;;  %v469_v20 = vld [vmem:[#allocation2 + $0xc0] sm:$0xff] }
 0x2a0   : > { %v1595_v34 = vpop.permute.xlu1 %1594 }
 0x2a1   : > { %v2035_v15 = vsel %vm1080_vm3, %v2019_v25, %v1595_v34  ;;  %v550_v25 = vld [vmem:[#allocation2 + $0xda] sm:$0xff] }
 0x2a2   : > { %v2051_v61 = vsel %vm1097_vm4, %v2035_v15, %v1659_v19 }
 0x2a3   : > { %1922 = vrot.lane.b32.xlu2 %v6165_v21, %s4857_s27  ;;  %v2067_v52 = vsel %vm1114_vm5, %v2051_v61, %v1723_v6 }
 0x2a4   : > { %660 = vrot.lane.b32.xlu0 %v453_v17, %s4855_s21 }
 0x2a5   : > { %v1851_v53 = vpop.permute.xlu2 %1850 }
 0x2a6   : > { %596 = vrot.lane.b32.xlu1 %v437_v49, %s4854_s20  ;;  %2878 = vmatmul.f32.gmra.mxu3 %v6173_v36  ;;  %v1915_v11 = vpop.permute.xlu0 %1914 }
 0x2a7   : > { %2767 = vmatmul.f32.gmra.mxu2 %v2712_v35  ;;  %v6227_v35 = vld [vmem:[#allocation3 + $0x62] sm:$0xff] }
 0x2a8   : > { %v1787_v9 = vpop.permute.xlu1 %1786 }
 0x2a9   : > { %v2083_v3 = vsel %vm1131_vm6, %v2067_v52, %v1787_v9  ;;  %v2716_v52 = vld [vmem:[#allocation3 + $0x69] sm:$0xff] }
 0x2aa   : > { %v2099_v47 = vsel %vm1148_vm7, %v2083_v3, %v1851_v53  ;;  %v534_v53 = vld [vmem:[#allocation2 + $0xd9] sm:$0xff] }
 0x2ab   : > { %1604 = vrot.lane.b32.xlu2 %v5907_v26, %s4855_s21  ;;  %v2115_v26 = vsel %vm1165_vm8, %v2099_v47, %v1915_v11  ;;  %v6231_v47 = vld [vmem:[#allocation2 + $0x189] sm:$0xff] }
 0x2ac   : > { %1542 = vrot.lane.b32.xlu0 %v5999_v29, %s4854_s20 }
 0x2ad   : > { %v1533_v50 = vpop.permute.xlu2 %1532 }
 0x2ae   : > { %1988 = vrot.lane.b32.xlu1 %v6182_v44, %s4859_s29  ;;  %2881 = vmatmul.f32.gmra.mxu3 %v6187_v40  ;;  %v1597_v10 = vpop.permute.xlu0 %1596  ;;  %v2020_v46 = vsel %vm225_vm0, %v5788_v31, %v1533_v50  ;;  %v6233_v50 = vpop.f32.mrf.mxu2 }
 0x2af   : > { %v2208_v51 = vpop.f32.mrf.mxu1  ;;  %2770 = vmatmul.f32.gmra.mxu2 %v2713_v63  ;;  %v2036_v22 = vsel %vm1080_vm3, %v2020_v46, %v1597_v10  ;;  %v6239_v63 = vld [vmem:[#allocation2 + $0x188] sm:$0xff] }
 0x2b0   : > { %v2209_v57 = vadd.f32 %v6058_v59, %v2208_v51  ;;  %v1979_v30 = vpop.permute.xlu1 %1978 }
 0x2b1   : > { %v2131_v29 = vsel %vm1182_vm9, %v2115_v26, %v1979_v30  ;;  %v6243_v26 = vld [vmem:[#allocation3 + $0x6a] sm:$0xff] }
 0x2b2   : > { %v2254_v58 = vmax.f32 %v2209_v57, 0.0  ;;  %4489 = vmatmul.msk.f32.gmra.mxu1 %vm1202_vm10, %v2131_v29 }
 0x2b3   : > { %1796 = vrot.lane.b32.xlu2 %v6100_v24, %s4860_s30 }
 0x2b4   : > { %2271 = vst [vmem:[#allocation3 + $0xe1] sm:$0xff] %v2254_v58  ;;  %852 = vrot.lane.b32.xlu0 %v501_v28, %s4860_s30  ;;  %v470_v28 = vld [vmem:[#allocation2 + $0xc8] sm:$0xff]  ;;  %v6251_v58 = vpop.f32.mrf.mxu3 }
 0x2b5   : > { %v1725_v43 = vpop.permute.xlu2 %1724 }
 0x2b6   : > { %788 = vrot.lane.b32.xlu1 %v485_v8, %s4858_s28  ;;  %2884 = vmatmul.f32.gmra.mxu3 %v6199_v23  ;;  %v1789_v4 = vpop.permute.xlu0 %1788  ;;  %v6256_v46 = vpop.f32.mrf.mxu2 }
 0x2b7   : > { %2773 = vmatmul.f32.gmra.mxu2 %v2714_v48 }
 0x2b8   : > { %v1661_v32 = vpop.permute.xlu1 %1660 }
 0x2b9   : > { %v2052_v16 = vsel %vm1097_vm4, %v2036_v22, %v1661_v32 }
 0x2ba   : > { %v2068_v31 = vsel %vm1114_vm5, %v2052_v16, %v1725_v43  ;;  %v454_v43 = vld [vmem:[#allocation2 + $0xb2] sm:$0xff] }
 0x2bb   : > { %1924 = vrot.lane.b32.xlu2 %v6205_v41, %s4857_s27  ;;  %v2084_v19 = vsel %vm1131_vm6, %v2068_v31, %v1789_v4 }
 0x2bc   : > { %1734 = vrot.lane.b32.xlu0 %v6165_v21, %s4858_s28 }
 0x2bd   : > { %v1917_v1 = vpop.permute.xlu2 %1916 }
 0x2be   : > { %1670 = vrot.lane.b32.xlu1 %v6133_v37, %s4856_s26  ;;  %2887 = vmatmul.f32.gmra.mxu3 %v6214_v55  ;;  %v1981_v7 = vpop.permute.xlu0 %1980 }
 0x2bf   : > { %2776 = vmatmul.f32.gmra.mxu2 %v2715_v56 }
 0x2c0   : > { %v1853_v6 = vpop.permute.xlu1 %1852 }
 0x2c1   : > { %v2100_v34 = vsel %vm1148_vm7, %v2084_v19, %v1853_v6  ;;  %v2211_v17 = vpop.f32.mrf.mxu1  ;;  %v6271_v6 = vpop.f32.mrf.mxu3 }
 0x2c2   : > { %v2212_v15 = vadd.f32 %v6058_v59, %v2211_v17  ;;  %v2116_v49 = vsel %vm1165_vm8, %v2100_v34, %v1917_v1  ;;  %v6280_v17 = vpop.f32.mrf.mxu2 }
 0x2c3   : > { %724 = vrot.lane.b32.xlu2 %v469_v20, %s4856_s26  ;;  %v2132_v37 = vsel %vm1182_vm9, %v2116_v49, %v1981_v7  ;;  %v6275_v20 = vld [vmem:[#allocation3 + $0x82] sm:$0xff]  ;;  %v519_v49 = vld [vmem:[#allocation2 + $0xe0] sm:$0xff] }
 0x2c4   : > { %v2255_v61 = vmax.f32 %v2212_v15, 0.0  ;;  %4490 = vmatmul.msk.f32.gmra.mxu1 %vm1202_vm10, %v2132_v37  ;;  %1044 = vrot.lane.b32.xlu0 %v550_v25, %s4859_s29  ;;  %v438_v15 = vld [vmem:[#allocation2 + $0xb1] sm:$0xff] }
 0x2c5   : > { %v1599_v11 = vpop.permute.xlu2 %1598 }
 0x2c6   : > { %2272 = vst [vmem:[#allocation3 + $0xf1] sm:$0xff] %v2255_v61  ;;  %980 = vrot.lane.b32.xlu1 %v534_v53, %s4857_s27  ;;  %2890 = vmatmul.f32.gmra.mxu3 %v6227_v35  ;;  %v1663_v9 = vpop.permute.xlu0 %1662  ;;  %v502_v53 = vld [vmem:[#allocation2 + $0xca] sm:$0xff]  ;;  %v6288_v61 = vld [vmem:[#allocation3 + $0x92] sm:$0xff] }
 0x2c7   : > { %2779 = vmatmul.f32.gmra.mxu2 %v2716_v52 }
 0x2c8   : > { %v1535_v3 = vpop.permute.xlu1 %1534 }
 0x2c9   : > { %v2021_v10 = vsel %vm225_vm0, %v5796_v13, %v1535_v3  ;;  %v6298_v3 = vld [vmem:[#allocation2 + $0x18a] sm:$0xff] }
 0x2ca   : > { %v2037_v57 = vsel %vm1080_vm3, %v2021_v10, %v1599_v11  ;;  %v6290_v11 = vpop.f32.mrf.mxu3 }
 0x2cb   : > { %1606 = vrot.lane.b32.xlu2 %v6092_v5, %s4855_s21  ;;  %v518_v5 = vld [vmem:[#allocation2 + $0xd8] sm:$0xff]  ;;  %v2053_v29 = vsel %vm1097_vm4, %v2037_v57, %v1663_v9 }
 0x2cc   : > { %1926 = vrot.lane.b32.xlu0 %v6231_v47, %s4857_s27  ;;  %v6307_v57 = vld [vmem:[%s8170_s3 + $0x178] sm:$0xff] }
 0x2cd   : > { %v1791_v51 = vpop.permute.xlu2 %1790  ;;  %2514 = vmatpush.msrb.mxu0 %v6307_v57 }
 0x2ce   : > { %1862 = vrot.lane.b32.xlu1 %v6239_v63, %s4861_s6  ;;  %2893 = vmatmul.f32.gmra.mxu3 %v6243_v26  ;;  %v1855_v30 = vpop.permute.xlu0 %1854 }
 0x2cf   : > { %2782 = vmatmul.f32.gmra.mxu2 %v5820_v0  ;;  %v6259_v0 = vld [vmem:[#allocation3 + $0x7a] sm:$0xff] }
 0x2d0   : > { %v1727_v13 = vpop.permute.xlu1 %1726 }
 0x2d1   : > { %v2069_v8 = vsel %vm1114_vm5, %v2053_v29, %v1727_v13  ;;  %v6313_v13 = vld [vmem:[#allocation3 + $0x9a] sm:$0xff] }
 0x2d2   : > { %v2085_v4 = vsel %vm1131_vm6, %v2069_v8, %v1791_v51  ;;  %v6320_v29 = vpop.f32.mrf.mxu3 }
 0x2d3   : > { %916 = vrot.lane.b32.xlu2 %v518_v5, %s4861_s6  ;;  %v2101_v22 = vsel %vm1148_vm7, %v2085_v4, %v1855_v30  ;;  %v6318_v5 = vld [vmem:[%s8170_s3 + $0x1f8] sm:$0xff] }
 0x2d4   : > { %726 = vrot.lane.b32.xlu0 %v470_v28, %s4856_s26  ;;  %2628 = vmatpush.msrb.mxu1 %v6318_v5 }
 0x2d5   : > { %v1983_v48 = vpop.permute.xlu2 %1982 }
 0x2d6   : > { %662 = vrot.lane.b32.xlu1 %v454_v43, %s4855_s21  ;;  %2896 = vmatmul.f32.gmra.mxu3 %v6259_v0  ;;  %v1537_v32 = vpop.permute.xlu0 %1536 }
 0x2d7   : > { %2785 = vmatmul.f32.gmra.mxu2 %v5863_v54 }
 0x2d8   : > { %v2214_v16 = vpop.f32.mrf.mxu1  ;;  %v1919_v31 = vpop.permute.xlu1 %1918 }
 0x2d9   : > { %v2215_v1 = vadd.f32 %v6058_v59, %v2214_v16  ;;  %v2117_v7 = vsel %vm1165_vm8, %v2101_v22, %v1919_v31  ;;  %v1482_v16 = vld [vmem:[#allocation2 + $0x199] sm:$0xff]  ;;  %v6336_v31 = vld [vmem:[%s8170_s3 + $0x170] sm:$0xff] }
 0x2da   : > { %v2133_v56 = vsel %vm1182_vm9, %v2117_v7, %v1983_v48  ;;  %2515 = vmatpush.msrb.mxu0 %v6336_v31  ;;  %v6341_v7 = vld [vmem:[#allocation3 + $0xaa] sm:$0xff] }
 0x2db   : > { %v2256_v19 = vmax.f32 %v2215_v1, 0.0  ;;  %1798 = vrot.lane.b32.xlu2 %v6127_v45, %s4860_s30  ;;  %4491 = vmatmul.msk.f32.gmra.mxu1 %vm1202_vm10, %v2133_v56  ;;  %v6343_v56 = vpop.f32.mrf.mxu3 }
 0x2dc   : > { %1608 = vrot.lane.b32.xlu0 %v6100_v24, %s4855_s21  ;;  %v2022_v24 = vsel %vm225_vm0, %v5817_v39, %v1537_v32  ;;  %v6295_v39 = vpop.f32.mrf.mxu2  ;;  %v486_v32 = vld [vmem:[#allocation2 + $0xc9] sm:$0xff] }
 0x2dd   : > { %2273 = vst [vmem:[#allocation3 + $0xf9] sm:$0xff] %v2256_v19  ;;  %v1665_v54 = vpop.permute.xlu2 %1664 }
 0x2de   : > { %1544 = vrot.lane.b32.xlu1 %v6065_v38, %s4854_s20  ;;  %2899 = vmatmul.f32.gmra.mxu3 %v6275_v20  ;;  %v1729_v34 = vpop.permute.xlu0 %1728 }
 0x2df   : > { %2788 = vmatmul.f32.gmra.mxu2 %v5896_v12 }
 0x2e0   : > { %v1601_v25 = vpop.permute.xlu1 %1600 }
 0x2e1   : > { %v2038_v37 = vsel %vm1080_vm3, %v2022_v24, %v1601_v25  ;;  %v1498_v24 = vld [vmem:[#allocation2 + $0x19a] sm:$0xff] }
 0x2e2   : > { %v2054_v12 = vsel %vm1097_vm4, %v2038_v37, %v1665_v54 }
 0x2e3   : > { %598 = vrot.lane.b32.xlu2 %v438_v15, %s4854_s20  ;;  %v2070_v10 = vsel %vm1114_vm5, %v2054_v12, %v1729_v34  ;;  %v6352_v34 = vld [vmem:[%s8170_s3 + $0x1f0] sm:$0xff]  ;;  %v6372_v12 = vpop.f32.mrf.mxu3 }
 0x2e4   : > { %918 = vrot.lane.b32.xlu0 %v519_v49, %s4861_s6  ;;  %v6325_v28 = vpop.f32.mrf.mxu2  ;;  %2629 = vmatpush.msrb.mxu1 %v6352_v34 }
 0x2e5   : > { %v1857_v38 = vpop.permute.xlu2 %1856 }
 0x2e6   : > { %854 = vrot.lane.b32.xlu1 %v502_v53, %s4860_s30  ;;  %2902 = vmatmul.f32.gmra.mxu3 %v6288_v61  ;;  %v1921_v9 = vpop.permute.xlu0 %1920 }
 0x2e7   : > { %2791 = vmatmul.f32.gmra.mxu2 %v5960_v42 }
 0x2e8   : > { %v1793_v52 = vpop.permute.xlu1 %1792 }
 0x2e9   : > { %v2086_v51 = vsel %vm1131_vm6, %v2070_v10, %v1793_v52  ;;  %v535_v10 = vld [vmem:[#allocation2 + $0xe1] sm:$0xff] }
 0x2ea   : > { %v2102_v42 = vsel %vm1148_vm7, %v2086_v51, %v1857_v38  ;;  %v6365_v38 = vld [vmem:[#allocation3 + $0xb2] sm:$0xff] }
 0x2eb   : > { %1990 = vrot.lane.b32.xlu2 %v6298_v3, %s4859_s29  ;;  %v2118_v43 = vsel %vm1165_vm8, %v2102_v42, %v1921_v9 }
 0x2ec   : > { %1800 = vrot.lane.b32.xlu0 %v6182_v44, %s4860_s30  ;;  %v6354_v25 = vpop.f32.mrf.mxu2 }
 0x2ed   : > { %v1539_v30 = vpop.permute.xlu2 %1538 }
 0x2ee   : > { %1736 = vrot.lane.b32.xlu1 %v6205_v41, %s4858_s28  ;;  %2905 = vmatmul.f32.gmra.mxu3 %v6313_v13  ;;  %v1603_v44 = vpop.permute.xlu0 %1602  ;;  %v2023_v19 = vsel %vm225_vm0, %v5905_v60, %v1539_v30  ;;  %v6388_v30 = vld [vmem:[%s8170_s3 + $0x160] sm:$0xff] }
 0x2ef   : > { %v2217_v8 = vpop.f32.mrf.mxu1  ;;  %2794 = vmatmul.f32.gmra.mxu2 %v6067_v62  ;;  %v551_v62 = vld [vmem:[#allocation2 + $0xe2] sm:$0xff]  ;;  %v2039_v49 = vsel %vm1080_vm3, %v2023_v19, %v1603_v44 }
 0x2f0   : > { %v2218_v4 = vadd.f32 %v6058_v59, %v2217_v8  ;;  %v1985_v48 = vpop.permute.xlu1 %1984 }
 0x2f1   : > { %v2134_v22 = vsel %vm1182_vm9, %v2118_v43, %v1985_v48 }
 0x2f2   : > { %v2257_v41 = vmax.f32 %v2218_v4, 0.0  ;;  %4492 = vmatmul.msk.f32.gmra.mxu1 %vm1202_vm10, %v2134_v22  ;;  %v4542_v22 = vld [vmem:[%s8170_s3 + $0x1e0] sm:$0xff] }
 0x2f3   : > { %790 = vrot.lane.b32.xlu2 %v486_v32, %s4858_s28 }
 0x2f4   : > { %2274 = vst [vmem:[#allocation3 + $0x109] sm:$0xff] %v2257_v41  ;;  %1928 = vrot.lane.b32.xlu0 %v1482_v16, %s4857_s27  ;;  %v1466_v41 = vld [vmem:[#allocation2 + $0x198] sm:$0xff] }
 0x2f5   : > { %v1731_v1 = vpop.permute.xlu2 %1730 }
 0x2f6   : > { %1046 = vrot.lane.b32.xlu1 %v551_v62, %s4859_s29  ;;  %2908 = vmatmul.f32.gmra.mxu3 %v6341_v7  ;;  %v1795_v54 = vpop.permute.xlu0 %1794  ;;  %v1499_v62 = vld [vmem:[#allocation2 + $0x1a2] sm:$0xff] }
 0x2f7   : > { %2797 = vmatmul.f32.gmra.mxu2 %v6114_v33  ;;  %v6370_v33 = vld [vmem:[%s8170_s3 + $0x168] sm:$0xff] }
 0x2f8   : > { %v1667_v15 = vpop.permute.xlu1 %1666  ;;  %2516 = vmatpush.msrb.mxu0 %v6370_v33 }
 0x2f9   : > { %v2055_v60 = vsel %vm1097_vm4, %v2039_v49, %v1667_v15 }
 0x2fa   : > { %v2071_v37 = vsel %vm1114_vm5, %v2055_v60, %v1731_v1  ;;  %2517 = vmatpush.msrb.mxu0 %v6388_v30  ;;  %v6406_v1 = vld [vmem:[%s8170_s3 + $0x158] sm:$0xff] }
 0x2fb   : > { %1672 = vrot.lane.b32.xlu2 %v6152_v2, %s4856_s26  ;;  %v2087_v9 = vsel %vm1131_vm6, %v2071_v37, %v1795_v54  ;;  %v4541_v54 = vld [vmem:[%s8170_s3 + $0x1d8] sm:$0xff] }
 0x2fc   : > { %1610 = vrot.lane.b32.xlu0 %v6127_v45, %s4855_s21  ;;  %v6379_v45 = vld [vmem:[%s8170_s3 + $0x1e8] sm:$0xff]  ;;  %2518 = vmatpush.msrb.mxu0 %v6406_v1 }
 0x2fd   : > { %v1923_v53 = vpop.permute.xlu2 %1922  ;;  %2630 = vmatpush.msrb.mxu1 %v6379_v45 }
 0x2fe   : > { %1992 = vrot.lane.b32.xlu1 %v1498_v24, %s4859_s29  ;;  %2911 = vmatmul.f32.gmra.mxu3 %v6365_v38  ;;  %v1987_v2 = vpop.permute.xlu0 %1986  ;;  %v6423_v24 = vld [vmem:[%s8170_s3 + $0x150] sm:$0xff] }
 0x2ff   : > { %2631 = vmatpush.msrb.mxu1 %v4542_v22  ;;  %2519 = vmatpush.msrb.mxu0 %v6423_v24 }
 0x300   : > { %v1859_v52 = vpop.permute.xlu1 %1858 }
 0x301   : > { %v2103_v51 = vsel %vm1148_vm7, %v2087_v9, %v1859_v52  ;;  %v2220_v42 = vpop.f32.mrf.mxu1  ;;  %2632 = vmatpush.msrb.mxu1 %v4541_v54 }
 0x302   : > { %v2221_v44 = vadd.f32 %v6058_v59, %v2220_v42  ;;  %v2119_v8 = vsel %vm1165_vm8, %v2103_v51, %v1923_v53  ;;  %v4523_v51 = vld [vmem:[%s8170_s3 + $0x148] sm:$0xff] }
 0x303   : > { %982 = vrot.lane.b32.xlu2 %v535_v10, %s4857_s27  ;;  %v2135_v43 = vsel %vm1182_vm9, %v2119_v8, %v1987_v2  ;;  %2520 = vmatpush.msrb.mxu0 %v4523_v51 }
 0x304   : > { %v2258_v4 = vmax.f32 %v2221_v44, 0.0  ;;  %4493 = vmatmul.msk.f32.gmra.mxu1 %vm1202_vm10, %v2135_v43  ;;  %1802 = vrot.lane.b32.xlu0 %v6298_v3, %s4860_s30  ;;  %v1467_v3 = vld [vmem:[#allocation2 + $0x1a0] sm:$0xff] }
 0x305   : > { %v1605_v48 = vpop.permute.xlu2 %1604 }
 0x306   : > { %2275 = vst [vmem:[#allocation3 + $0x111] sm:$0xff] %v2258_v4  ;;  %1674 = vrot.lane.b32.xlu1 %v6239_v63, %s4856_s26  ;;  %v1669_v32 = vpop.permute.xlu0 %1668 }
 0x308   : > { %v1541_v16 = vpop.permute.xlu1 %1540 }
 0x309   : > { %v2024_v15 = vsel %vm225_vm0, %v5913_v18, %v1541_v16  ;;  %v4540_v18 = vld [vmem:[%s8170_s3 + $0x1d0] sm:$0xff]  ;;  %v1483_v16 = vld [vmem:[#allocation2 + $0x1a1] sm:$0xff] }
 0x30a   : > { %v2040_v60 = vsel %vm1080_vm3, %v2024_v15, %v1605_v48  ;;  %2633 = vmatpush.msrb.mxu1 %v4540_v18  ;;  %v4539_v48 = vld [vmem:[%s8170_s3 + $0x1c8] sm:$0xff]  ;;  %v4521_v15 = vld [vmem:[%s8170_s3 + $0x138] sm:$0xff] }
 0x30b   : > { %1864 = vrot.lane.b32.xlu2 %v1466_v41, %s4861_s6  ;;  %v2056_v53 = vsel %vm1097_vm4, %v2040_v60, %v1669_v32  ;;  %v4537_v18 = vld [vmem:[%s8170_s3 + $0x1b8] sm:$0xff] }
 0x30c   : > { %1994 = vrot.lane.b32.xlu0 %v1499_v62, %s4859_s29  ;;  %2634 = vmatpush.msrb.mxu1 %v4539_v48  ;;  %s7366_s29 = scalar_lea.vmem %s8172_s5, %s4788_s22 }
 0x30d   : > { %v1797_v63 = vpop.permute.xlu2 %1796 }
 0x30e   : > { %1866 = vrot.lane.b32.xlu1 %v1467_v3, %s4861_s6  ;;  %v1861_v19 = vpop.permute.xlu0 %1860  ;;  %v4522_v3 = vld [vmem:[%s8170_s3 + $0x140] sm:$0xff] }
 0x30f   : > { %2521 = vmatpush.msrb.mxu0 %v4522_v3 }
 0x310   : > { %v1733_v49 = vpop.permute.xlu1 %1732 }
 0x311   : > { %v2072_v9 = vsel %vm1114_vm5, %v2056_v53, %v1733_v49  ;;  %2522 = vmatpush.msrb.mxu0 %v4521_v15  ;;  %v4519_v15 = vld [vmem:[%s8170_s3 + $0x128] sm:$0xff] }
 0x312   : > { %v2088_v42 = vsel %vm1131_vm6, %v2072_v9, %v1797_v63  ;;  %v4538_v63 = vld [vmem:[%s8170_s3 + $0x1c0] sm:$0xff] }
 0x313   : > { %1546 = vrot.lane.b32.xlu2 %v6165_v21, %s4854_s20  ;;  %v2104_v8 = vsel %vm1148_vm7, %v2088_v42, %v1861_v19  ;;  %2635 = vmatpush.msrb.mxu1 %v4538_v63  ;;  %v421_v19 = vld [vmem:[#allocation2 + $0xa8] sm:$0xff]  ;;  %v4520_v42 = vld [vmem:[%s8170_s3 + $0x130] sm:$0xff] }
 0x314   : > { %2523 = vmatpush.msrb.mxu0 %v4520_v42 }
 0x315   : > { %v1925_v37 = vpop.permute.xlu2 %1924  ;;  %2636 = vmatpush.msrb.mxu1 %v4537_v18 }
 0x316   : > { %v661_v2 = vpop.permute.xlu0 %660  ;;  %v2120_v32 = vsel %vm1165_vm8, %v2104_v8, %v1925_v37  ;;  %2524 = vmatpush.msrb.mxu0 %v4519_v15  ;;  %v422_v15 = vld [vmem:[#allocation2 + $0xb0] sm:$0xff] }
 0x318   : > { %v2223_v52 = vpop.f32.mrf.mxu1  ;;  %v597_v21 = vpop.permute.xlu1 %596 }
 0x319   : > { %v2224_v10 = vadd.f32 %v6058_v59, %v2223_v52  ;;  %v1078_v49 = vsel %vm225_vm0, %v421_v19, %v597_v21 }
 0x31a   : > { %v1095_v37 = vsel %vm1080_vm3, %v1078_v49, %v661_v2  ;;  %v1367_v2 = vld [vmem:[#allocation2 + $0x158] sm:$0xff] }
 0x31b   : > { %v2259_v44 = vmax.f32 %v2224_v10, 0.0  ;;  %1738 = vrot.lane.b32.xlu2 %v6231_v47, %s4858_s28 }
 0x31d   : > { %2276 = vst [vmem:[#allocation3 + $0x121] sm:$0xff] %v2259_v44  ;;  %v725_v43 = vpop.permute.xlu2 %724 }
 0x31e   : > { %v1543_v4 = vpop.permute.xlu0 %1542  ;;  %v1112_v51 = vsel %vm1097_vm4, %v1095_v37, %v725_v43  ;;  %v4536_v43 = vld [vmem:[%s8170_s3 + $0x1b0] sm:$0xff] }
 0x31f   : > { %2637 = vmatpush.msrb.mxu1 %v4536_v43 }
 0x320   : > { %v1989_v22 = vpop.permute.xlu1 %1988 }
 0x321   : > { %v2136_v41 = vsel %vm1182_vm9, %v2120_v32, %v1989_v22  ;;  %v2025_v32 = vsel %vm225_vm0, %v1367_v2, %v1543_v4  ;;  %v4534_v2 = vld [vmem:[%s8170_s3 + $0x1a0] sm:$0xff] }
 0x322   : > { %4494 = vmatmul.msk.f32.gmra.mxu1 %vm1202_vm10, %v2136_v41 }
 0x323   : > { %1930 = vrot.lane.b32.xlu2 %v1483_v16, %s4857_s27 }
 0x325   : > { %v1607_v47 = vpop.permute.xlu2 %1606 }
 0x326   : > { %v853_v62 = vpop.permute.xlu0 %852  ;;  %v2041_v3 = vsel %vm1080_vm3, %v2025_v32, %v1607_v47  ;;  %v4535_v47 = vld [vmem:[%s8170_s3 + $0x1a8] sm:$0xff]  ;;  %v4533_v32 = vld [vmem:[%s8170_s3 + $0x198] sm:$0xff] }
 0x327   : > { %2638 = vmatpush.msrb.mxu1 %v4535_v47 }
 0x328   : > { %v789_v54 = vpop.permute.xlu1 %788 }
 0x329   : > { %v1129_v21 = vsel %vm1114_vm5, %v1112_v51, %v789_v54  ;;  %2639 = vmatpush.msrb.mxu1 %v4534_v2 }
 0x32a   : > { %v1146_v8 = vsel %vm1131_vm6, %v1129_v21, %v853_v62 }
 0x32b   : > { %2640 = vmatpush.msrb.mxu1 %v4533_v32 }
 0x32d   : > { %v917_v60 = vpop.permute.xlu2 %916 }
 0x32e   : > { %v1735_v53 = vpop.permute.xlu0 %1734  ;;  %v1163_v16 = vsel %vm1148_vm7, %v1146_v8, %v917_v60 }
 0x32f   : > { %v2226_v9 = vpop.f32.mrf.mxu1 }
 0x330   : > { %v2227_v52 = vadd.f32 %v6058_v59, %v2226_v9  ;;  %v1671_v10 = vpop.permute.xlu1 %1670 }
 0x331   : > { %v2057_v19 = vsel %vm1097_vm4, %v2041_v3, %v1671_v10  ;;  %v4515_v3 = vld [vmem:[%s8170_s3 + $0x108] sm:$0xff] }
 0x332   : > { %v2260_v44 = vmax.f32 %v2227_v52, 0.0  ;;  %v2073_v4 = vsel %vm1114_vm5, %v2057_v19, %v1735_v53  ;;  %v4518_v53 = vld [vmem:[%s8170_s3 + $0x120] sm:$0xff]  ;;  %v4532_v19 = vld [vmem:[%s8170_s3 + $0x190] sm:$0xff] }
 0x333   : > { %2525 = vmatpush.msrb.mxu0 %v4518_v53  ;;  %2641 = vmatpush.msrb.mxu1 %v4532_v19  ;;  %v4531_v53 = vld [vmem:[%s8170_s3 + $0x188] sm:$0xff] }
 0x334   : > { %2277 = vst [vmem:[#allocation3 + $0x129] sm:$0xff] %v2260_v44 }
 0x335   : > { %v1799_v48 = vpop.permute.xlu2 %1798  ;;  %2642 = vmatpush.msrb.mxu1 %v4531_v53 }
 0x336   : > { %v1045_v22 = vpop.permute.xlu0 %1044  ;;  %v2089_v60 = vsel %vm1131_vm6, %v2073_v4, %v1799_v48  ;;  %v4517_v48 = vld [vmem:[%s8170_s3 + $0x118] sm:$0xff] }
 0x337   : > { %2526 = vmatpush.msrb.mxu0 %v4517_v48 }
 0x338   : > { %v981_v41 = vpop.permute.xlu1 %980 }
 0x339   : > { %v1180_v63 = vsel %vm1165_vm8, %v1163_v16, %v981_v41 }
 0x33a   : > { %v1197_v62 = vsel %vm1182_vm9, %v1180_v63, %v1045_v22  ;;  %v4516_v22 = vld [vmem:[%s8170_s3 + $0x110] sm:$0xff]  ;;  %v4514_v63 = vld [vmem:[%s8170_s3 + $0x100] sm:$0xff] }
 0x33b   : > { %4479 = vmatmul.msk.f32.gmra.mxu0 %vm1202_vm10, %v1197_v62 }
 0x33c   : > { %2527 = vmatpush.msrb.mxu0 %v4516_v22 }
 0x33d   : > { %v599_v54 = vpop.permute.xlu2 %598 }
 0x33e   : > { %v1927_v49 = vpop.permute.xlu0 %1926  ;;  %2528 = vmatpush.msrb.mxu0 %v4515_v3  ;;  %v4530_v3 = vld [vmem:[%s8170_s3 + $0x180] sm:$0xff] }
 0x33f   : > { %2643 = vmatpush.msrb.mxu1 %v4530_v3 }
 0x340   : > { %v1863_v37 = vpop.permute.xlu1 %1862  ;;  %2529 = vmatpush.msrb.mxu0 %v4514_v63 }
 0x341   : > { %v2105_v18 = vsel %vm1148_vm7, %v2089_v60, %v1863_v37  ;;  %v2229_v9 = vpop.f32.mrf.mxu1  ;;  %v1079_v37 = vsel %vm225_vm0, %v422_v15, %v599_v54 }
 0x342   : > { %v2230_v52 = vadd.f32 %v6058_v59, %v2229_v9  ;;  %v2121_v10 = vsel %vm1165_vm8, %v2105_v18, %v1927_v49 }
 0x344   : > { %v2261_v51 = vmax.f32 %v2230_v52, 0.0 }
 0x345   : > { %v1991_v42 = vpop.permute.xlu2 %1990 }
 0x346   : > { %2278 = vst [vmem:[#allocation3 + $0x139] sm:$0xff] %v2261_v51  ;;  %v2137_v21 = vsel %vm1182_vm9, %v2121_v10, %v1991_v42  ;;  %v727_v44 = vpop.permute.xlu0 %726 }
 0x347   : > { %4495 = vmatmul.msk.f32.gmra.mxu1 %vm1202_vm10, %v2137_v21 }
 0x348   : > { %v663_v8 = vpop.permute.xlu1 %662 }
 0x349   : > { %v1096_v18 = vsel %vm1080_vm3, %v1079_v37, %v663_v8 }
 0x34a   : > { %v1113_v10 = vsel %vm1097_vm4, %v1096_v18, %v727_v44 }
 0x34d   : > { %v791_v43 = vpop.permute.xlu2 %790 }
 0x34e   : > { %v1609_v16 = vpop.permute.xlu0 %1608  ;;  %v1130_v21 = vsel %vm1114_vm5, %v1113_v10, %v791_v43  ;;  %v4592_v10 = vld [vmem:[%s8170_s3 + $0x370] sm:$0xff] }
 0x350   : > { %v1545_v41 = vpop.permute.xlu1 %1544 }
 0x351   : > { %v2026_v2 = vsel %vm225_vm0, %v6124_v27, %v1545_v41 }
 0x352   : > { %v2042_v8 = vsel %vm1080_vm3, %v2026_v2, %v1609_v16  ;;  %v4593_v16 = vld [vmem:[%s8170_s3 + $0x378] sm:$0xff] }
 0x353   : > { %2971 = vmatpush.msra.mxu0 %v4593_v16 }
 0x355   : > { %v1673_v62 = vpop.permute.xlu2 %1672  ;;  %2972 = vmatpush.msra.mxu0 %v4592_v10  ;;  %v4606_v10 = vld [vmem:[%s8170_s3 + $0x3e0] sm:$0xff] }
 0x356   : > { %v919_v4 = vpop.permute.xlu0 %918  ;;  %v2058_v44 = vsel %vm1097_vm4, %v2042_v8, %v1673_v62  ;;  %v4609_v62 = vld [vmem:[%s8170_s3 + $0x3f8] sm:$0xff] }
 0x357   : > { %3085 = vmatpush.msra.mxu1 %v4609_v62 }
 0x358   : > { %v2232_v49 = vpop.f32.mrf.mxu1  ;;  %v855_v47 = vpop.permute.xlu1 %854 }
 0x359   : > { %v2233_v60 = vadd.f32 %v6058_v59, %v2232_v49  ;;  %v1147_v54 = vsel %vm1131_vm6, %v1130_v21, %v855_v47  ;;  %v4641_v21 = vld [vmem:[%s8170_s3 + $0xf8] sm:$0xff] }
 0x35a   : > { %v1164_v48 = vsel %vm1148_vm7, %v1147_v54, %v919_v4  ;;  %3412 = vmatpush.msra.mxu3 %v4641_v21  ;;  %v6607_v21 = vpop.f32.mrf.mxu2 }
 0x35b   : > { %v2262_v9 = vmax.f32 %v2233_v60, 0.0  ;;  %v2481_v60 = vld [vmem:[#allocation3 + $0x2] sm:$0xff]  ;;  %8199 = vst [vmem:[#allocation4_spill] sm:$0xff] %v6607_v21 }
 0x35c   : > { %v3057_v21 = vld [vmem:[#allocation3 + $0x69] sm:$0xff] }
 0x35d   : > { %2279 = vst [vmem:[#allocation3 + $0x141] sm:$0xff] %v2262_v9  ;;  %v983_v52 = vpop.permute.xlu2 %982 }
 0x35e   : > { %v1801_v51 = vpop.permute.xlu0 %1800  ;;  %v1181_v43 = vsel %vm1165_vm8, %v1164_v48, %v983_v52  ;;  %v2482_v48 = vld [vmem:[#allocation3 + $0xa] sm:$0xff] }
 0x360   : > { %v1737_v42 = vpop.permute.xlu1 %1736 }
 0x361   : > { %v2074_v27 = vsel %vm1114_vm5, %v2058_v44, %v1737_v42  ;;  %v4608_v42 = vld [vmem:[%s8170_s3 + $0x3f0] sm:$0xff]  ;;  %v4591_v44 = vld [vmem:[%s8170_s3 + $0x368] sm:$0xff] }
 0x362   : > { %v2090_v19 = vsel %vm1131_vm6, %v2074_v27, %v1801_v51  ;;  %v1369_v51 = vld [vmem:[#allocation2 + $0x170] sm:$0xff]  ;;  %3086 = vmatpush.msra.mxu1 %v4608_v42  ;;  %2973 = vmatpush.msra.mxu0 %v4591_v44  ;;  %v4639_v42 = vld [vmem:[%s8170_s3 + $0xe8] sm:$0xff]  ;;  %v4621_v44 = vld [vmem:[%s8170_s3 + $0x458] sm:$0xff] }
 0x363   : > { %v4640_v27 = vld [vmem:[%s8170_s3 + $0xf0] sm:$0xff] }
 0x364   : > { %3413 = vmatpush.msra.mxu3 %v4640_v27  ;;  %v6638_v27 = vld [vmem:[#allocation3 + $0x30] sm:$0xff] }
 0x365   : > { %v1865_v32 = vpop.permute.xlu2 %1864 }
 0x366   : > { %v1929_v22 = vpop.permute.xlu0 %1928  ;;  %v2106_v49 = vsel %vm1148_vm7, %v2090_v19, %v1865_v32  ;;  %3414 = vmatpush.msra.mxu3 %v4639_v42  ;;  %v4585_v42 = vld [vmem:[%s8170_s3 + $0x338] sm:$0xff] }
 0x367   : > { %v2122_v37 = vsel %vm1165_vm8, %v2106_v49, %v1929_v22 }
 0x368   : > { %v1047_v63 = vpop.permute.xlu1 %1046 }
 0x369   : > { %v1198_v41 = vsel %vm1182_vm9, %v1181_v43, %v1047_v63  ;;  %v4607_v43 = vld [vmem:[%s8170_s3 + $0x3e8] sm:$0xff]  ;;  %v4624_v63 = vld [vmem:[%s8170_s3 + $0x470] sm:$0xff] }
 0x36a   : > { %4480 = vmatmul.msk.f32.gmra.mxu0 %vm1202_vm10, %v1198_v41  ;;  %3087 = vmatpush.msra.mxu1 %v4607_v43  ;;  %v6633_v43 = vpop.f32.mrf.mxu3 }
 0x36b   : > { %8201 = vst [vmem:[#allocation6_spill] sm:$0xff] %v6633_v43  ;;  %v7025_v43 = vld [vmem:[#allocation3 + $0xf9] sm:$0xff] }
 0x36c   : > { %3088 = vmatpush.msra.mxu1 %v4606_v10 }
 0x36d   : > { %v1547_v4 = vpop.permute.xlu2 %1546 }
 0x36e   : > { %v1611_v15 = vpop.permute.xlu0 %1610  ;;  %v2027_v54 = vsel %vm225_vm0, %v1369_v51, %v1547_v4  ;;  %v4623_v51 = vld [vmem:[%s8170_s3 + $0x468] sm:$0xff] }
 0x36f   : > { %v2235_v47 = vpop.f32.mrf.mxu1  ;;  %v2043_v22 = vsel %vm1080_vm3, %v2027_v54, %v1611_v15  ;;  %v4605_v54 = vld [vmem:[%s8170_s3 + $0x3d8] sm:$0xff] }
 0x370   : > { %v2236_v18 = vadd.f32 %v6058_v59, %v2235_v47  ;;  %v1993_v9 = vpop.permute.xlu1 %1992  ;;  %v4625_v59 = vld [vmem:[%s8170_s3 + $0x478] sm:$0xff]  ;;  %v2483_v47 = vld [vmem:[#allocation3 + $0x1a] sm:$0xff]  ;;  %3089 = vmatpush.msra.mxu1 %v4605_v54  ;;  %v4618_v54 = vld [vmem:[%s8170_s3 + $0x440] sm:$0xff] }
 0x371   : > { %v2138_v53 = vsel %vm1182_vm9, %v2122_v37, %v1993_v9  ;;  %3199 = vmatpush.msra.mxu2 %v4625_v59  ;;  %v6581_v37 = vld [vmem:[%s8169_s2] ss:$0 sm:$0xff]  ;;  %v4589_v59 = vld [vmem:[%s8170_s3 + $0x358] sm:$0xff] }
 0x372   : > { %v2263_v52 = vmax.f32 %v2236_v18, 0.0  ;;  %4496 = vmatmul.msk.f32.gmra.mxu1 %vm1202_vm10, %v2138_v53  ;;  %2530 = vmatmul.f32.vlgmr.msrb.gmra.mxu0 %v2481_v60 }
 0x373   : > { %3200 = vmatpush.msra.mxu2 %v4624_v63 }
 0x374   : > { %2280 = vst [vmem:[#allocation3 + $0x151] sm:$0xff] %v2263_v52  ;;  %v4590_v52 = vld [vmem:[%s8170_s3 + $0x360] sm:$0xff] }
 0x375   : > { %v1739_v2 = vpop.permute.xlu2 %1738  ;;  %2974 = vmatpush.msra.mxu0 %v4590_v52  ;;  %3201 = vmatpush.msra.mxu2 %v4623_v51  ;;  %v4602_v52 = vld [vmem:[%s8170_s3 + $0x3c0] sm:$0xff]  ;;  %v4635_v51 = vld [vmem:[%s8170_s3 + $0xc8] sm:$0xff] }
 0x376   : > { %v1803_v8 = vpop.permute.xlu0 %1802 }
 0x377   : > { %2975 = vmatpush.msra.mxu0 %v4589_v59 }
 0x378   : > { %v1675_v32 = vpop.permute.xlu1 %1674 }
 0x379   : > { %v2059_v3 = vsel %vm1097_vm4, %v2043_v22, %v1675_v32  ;;  %v6622_v32 = vpop.f32.mrf.mxu2  ;;  %v2596_v22 = vld [vmem:[#allocation3 + $0x20] sm:$0xff] }
 0x37a   : > { %2533 = vmatmul.f32.gmra.mxu0 %v2482_v48  ;;  %v2075_v41 = vsel %vm1114_vm5, %v2059_v3, %v1739_v2  ;;  %v2595_v2 = vld [vmem:[#allocation3 + $0x18] sm:$0xff]  ;;  %v4588_v48 = vld [vmem:[%s8170_s3 + $0x350] sm:$0xff]  ;;  %8200 = vst [vmem:[#allocation5_spill] sm:$0xff] %v6622_v32 }
 0x37b   : > { %v2091_v19 = vsel %vm1131_vm6, %v2075_v41, %v1803_v8  ;;  %v4622_v8 = vld [vmem:[%s8170_s3 + $0x460] sm:$0xff]  ;;  %2976 = vmatpush.msra.mxu0 %v4588_v48  ;;  %v4604_v3 = vld [vmem:[%s8170_s3 + $0x3d0] sm:$0xff]  ;;  %v4587_v41 = vld [vmem:[%s8170_s3 + $0x348] sm:$0xff] }
 0x37c   : > { %3202 = vmatpush.msra.mxu2 %v4622_v8  ;;  %3090 = vmatpush.msra.mxu1 %v4604_v3  ;;  %v4634_v8 = vld [vmem:[%s8170_s3 + $0xc0] sm:$0xff]  ;;  %v4584_v48 = vld [vmem:[%s8170_s3 + $0x330] sm:$0xff] }
 0x37d   : > { %v1931_v16 = vpop.permute.xlu2 %1930  ;;  %2977 = vmatpush.msra.mxu0 %v4587_v41  ;;  %v6707_v3 = vld [vmem:[#allocation3 + $0x50] sm:$0xff] }
 0x37e   : > { %v1995_v4 = vpop.permute.xlu0 %1994  ;;  %3203 = vmatpush.msra.mxu2 %v4621_v44  ;;  %v4600_v44 = vld [vmem:[%s8170_s3 + $0x3b0] sm:$0xff] }
 0x380   : > { %v1867_v62 = vpop.permute.xlu1 %1866 }
 0x381   : > { %v2107_v15 = vsel %vm1148_vm7, %v2091_v19, %v1867_v62  ;;  %v2238_v49 = vpop.f32.mrf.mxu1  ;;  %v6636_v63 = vpop.f32.mrf.mxu2  ;;  %v4620_v19 = vld [vmem:[%s8170_s3 + $0x450] sm:$0xff] }
 0x382   : > { %v2123_v60 = vsel %vm1165_vm8, %v2107_v15, %v1931_v16  ;;  %v6584_v18 = vadd.f32 %v6581_v37, %v2238_v49  ;;  %2536 = vmatmul.f32.gmra.mxu0 %v2483_v47  ;;  %8202 = vst [vmem:[#allocation7_spill] sm:$0xff] %v6636_v63  ;;  %v4603_v16 = vld [vmem:[%s8170_s3 + $0x3c8] sm:$0xff]  ;;  %3204 = vmatpush.msra.mxu2 %v4620_v19  ;;  %v6656_v15 = vpop.f32.mrf.mxu3  ;;  %v6979_v63 = vld [vmem:[#allocation3 + $0xe1] sm:$0xff] }
 0x383   : > { %v2139_v9 = vsel %vm1182_vm9, %v2123_v60, %v1995_v4  ;;  %3091 = vmatpush.msra.mxu1 %v4603_v16  ;;  %8203 = vst [vmem:[#allocation8_spill] sm:$0xff] %v6656_v15  ;;  %v6662_v60 = vld [vmem:[#allocation3 + $0x38] sm:$0xff]  ;;  %v3171_v15 = vld [vmem:[#allocation3 + $0x6a] sm:$0xff] }
 0x384   : > { %v8175_v53 = vmax.f32 %v6584_v18, 0.0  ;;  %4497 = vmatmul.msk.f32.gmra.mxu1 %vm1202_vm10, %v2139_v9  ;;  %v4586_v9 = vld [vmem:[%s8170_s3 + $0x340] sm:$0xff] }
 0x385   : > { %3092 = vmatpush.msra.mxu1 %v4602_v52  ;;  %2978 = vmatpush.msra.mxu0 %v4586_v9  ;;  %v6730_v52 = vld [vmem:[#allocation3 + $0x60] sm:$0xff] }
 0x386   : > { %2281 = vst [vmem:[#allocation3 + $0x159] sm:$0xff] %v8175_v53 }
 0x387   : > { %2979 = vmatpush.msra.mxu0 %v4585_v42 }
 0x389   : > { %v6660_v47 = vpop.f32.mrf.mxu2  ;;  %2980 = vmatpush.msra.mxu0 %v4584_v48 }
 0x38a   : > { %2539 = vmatmul.f32.gmra.mxu0 %v6160_v14  ;;  %v4638_v14 = vld [vmem:[%s8170_s3 + $0xe0] sm:$0xff]  ;;  %8204 = vst [vmem:[#allocation9_spill] sm:$0xff] %v6660_v47  ;;  %v6676_v10 = vpop.f32.mrf.mxu3 }
 0x38b   : > { %3415 = vmatpush.msra.mxu3 %v4638_v14  ;;  %8205 = vst [vmem:[#allocation10_spill] sm:$0xff] %v6676_v10  ;;  %v3054_v10 = vld [vmem:[#allocation3 + $0x49] sm:$0xff] }
 0x38c   : > { %2644 = vmatmul.f32.vlgmr.msrb.gmra.mxu1 %v2595_v2  ;;  %v6687_v2 = vld [vmem:[#allocation3 + $0x48] sm:$0xff] }
 0x391   : > { %v6685_v59 = vpop.f32.mrf.mxu2 }
 0x392   : > { %2542 = vmatmul.f32.gmra.mxu0 %v6173_v36  ;;  %v4637_v36 = vld [vmem:[%s8170_s3 + $0xd8] sm:$0xff]  ;;  %8206 = vst [vmem:[#allocation11_spill] sm:$0xff] %v6685_v59  ;;  %v6699_v14 = vpop.f32.mrf.mxu3  ;;  %v6958_v59 = vld [vmem:[#allocation3 + $0xd9] sm:$0xff] }
 0x393   : > { %3416 = vmatpush.msra.mxu3 %v4637_v36  ;;  %8207 = vst [vmem:[#allocation12_spill] sm:$0xff] %v6699_v14  ;;  %v4617_v36 = vld [vmem:[%s8170_s3 + $0x438] sm:$0xff] }
 0x394   : > { %2647 = vmatmul.f32.gmra.mxu1 %v2596_v22  ;;  %v3170_v14 = vld [vmem:[#allocation3 + $0x62] sm:$0xff] }
 0x399   : > { %v6705_v22 = vpop.f32.mrf.mxu2 }
 0x39a   : > { %2545 = vmatmul.f32.gmra.mxu0 %v6187_v40  ;;  %v4636_v40 = vld [vmem:[%s8170_s3 + $0xd0] sm:$0xff]  ;;  %8208 = vst [vmem:[#allocation13_spill] sm:$0xff] %v6705_v22  ;;  %v6720_v19 = vpop.f32.mrf.mxu3  ;;  %v3169_v22 = vld [vmem:[#allocation3 + $0x52] sm:$0xff] }
 0x39b   : > { %3417 = vmatpush.msra.mxu3 %v4636_v40  ;;  %8209 = vst [vmem:[#allocation14_spill] sm:$0xff] %v6720_v19  ;;  %v4583_v40 = vld [vmem:[%s8170_s3 + $0x328] sm:$0xff] }
 0x39c   : > { %2650 = vmatmul.f32.gmra.mxu1 %v6638_v27  ;;  %2981 = vmatpush.msra.mxu0 %v4583_v40  ;;  %v3053_v19 = vld [vmem:[#allocation3 + $0x39] sm:$0xff] }
 0x39d   : > { %3418 = vmatpush.msra.mxu3 %v4635_v51  ;;  %v4632_v51 = vld [vmem:[%s8170_s3 + $0xb0] sm:$0xff] }
 0x39f   : > { %v2241_v62 = vpop.f32.mrf.mxu1  ;;  %3419 = vmatpush.msra.mxu3 %v4634_v8  ;;  %v6752_v8 = vld [vmem:[#allocation3 + $0x68] sm:$0xff] }
 0x3a0   : > { %v6654_v4 = vadd.f32 %v6581_v37, %v2241_v62 }
 0x3a1   : > { %v6726_v62 = vpop.f32.mrf.mxu2 }
 0x3a2   : > { %v8174_v49 = vmax.f32 %v6654_v4, 0.0  ;;  %2548 = vmatmul.f32.gmra.mxu0 %v6199_v23  ;;  %v4619_v23 = vld [vmem:[%s8170_s3 + $0x448] sm:$0xff]  ;;  %8210 = vst [vmem:[#allocation15_spill] sm:$0xff] %v6726_v62  ;;  %v6744_v42 = vpop.f32.mrf.mxu3 }
 0x3a3   : > { %3205 = vmatpush.msra.mxu2 %v4619_v23  ;;  %v4599_v23 = vld [vmem:[%s8170_s3 + $0x3a8] sm:$0xff]  ;;  %8211 = vst [vmem:[#allocation16_spill] sm:$0xff] %v6744_v42  ;;  %v3168_v42 = vld [vmem:[#allocation3 + $0x4a] sm:$0xff] }
 0x3a4   : > { %2282 = vst [vmem:[#allocation3 + $0x169] sm:$0xff] %v8174_v49  ;;  %2653 = vmatmul.f32.gmra.mxu1 %v6662_v60  ;;  %v6884_v49 = vld [vmem:[#allocation3 + $0xb0] sm:$0xff] }
 0x3a5   : > { %3206 = vmatpush.msra.mxu2 %v4618_v54 }
 0x3a7   : > { %3207 = vmatpush.msra.mxu2 %v4617_v36  ;;  %v4631_v36 = vld [vmem:[%s8170_s3 + $0xa8] sm:$0xff] }
 0x3a9   : > { %v6750_v54 = vpop.f32.mrf.mxu2 }
 0x3aa   : > { %2551 = vmatmul.f32.gmra.mxu0 %v6214_v55  ;;  %v4601_v55 = vld [vmem:[%s8170_s3 + $0x3b8] sm:$0xff]  ;;  %8212 = vst [vmem:[#allocation17_spill] sm:$0xff] %v6750_v54 }
 0x3ab   : > { %3093 = vmatpush.msra.mxu1 %v4601_v55  ;;  %v4582_v55 = vld [vmem:[%s8170_s3 + $0x320] sm:$0xff] }
 0x3ac   : > { %2656 = vmatmul.f32.gmra.mxu1 %v6687_v2  ;;  %2982 = vmatpush.msra.mxu0 %v4582_v55  ;;  %v4614_v55 = vld [vmem:[%s8170_s3 + $0x420] sm:$0xff] }
 0x3ad   : > { %3094 = vmatpush.msra.mxu1 %v4600_v44  ;;  %v4598_v44 = vld [vmem:[%s8170_s3 + $0x3a0] sm:$0xff] }
 0x3af   : > { %3095 = vmatpush.msra.mxu1 %v4599_v23  ;;  %v6775_v23 = vld [vmem:[#allocation3 + $0x78] sm:$0xff] }
 0x3b1   : > { %3096 = vmatpush.msra.mxu1 %v4598_v44  ;;  %v6773_v40 = vpop.f32.mrf.mxu2  ;;  %v4613_v44 = vld [vmem:[%s8170_s3 + $0x418] sm:$0xff] }
 0x3b2   : > { %2554 = vmatmul.f32.gmra.mxu0 %v6227_v35  ;;  %v4633_v35 = vld [vmem:[%s8170_s3 + $0xb8] sm:$0xff] }
 0x3b3   : > { %3420 = vmatpush.msra.mxu3 %v4633_v35 }
 0x3b4   : > { %2659 = vmatmul.f32.gmra.mxu1 %v6707_v3 }
 0x3b5   : > { %3421 = vmatpush.msra.mxu3 %v4632_v51  ;;  %v4597_v51 = vld [vmem:[%s8170_s3 + $0x398] sm:$0xff] }
 0x3b6   : > { %3097 = vmatpush.msra.mxu1 %v4597_v51  ;;  %v4578_v51 = vld [vmem:[%s8170_s3 + $0x300] sm:$0xff] }
 0x3b7   : > { %3422 = vmatpush.msra.mxu3 %v4631_v36  ;;  %v4612_v36 = vld [vmem:[%s8170_s3 + $0x410] sm:$0xff] }
 0x3b8   : > { %v1314_v41 = vpop.f32.mrf.mxu0 }
 0x3b9   : > { %v1315_v16 = vadd.f32 %v6581_v37, %v1314_v41 }
 0x3ba   : > { %2557 = vmatmul.f32.gmra.mxu0 %v6243_v26  ;;  %v4616_v26 = vld [vmem:[%s8170_s3 + $0x430] sm:$0xff] }
 0x3bb   : > { %v6728_v9 = vmax.f32 %v1315_v16, 0.0  ;;  %3208 = vmatpush.msra.mxu2 %v4616_v26  ;;  %v6770_v16 = vpop.f32.mrf.mxu3  ;;  %v4581_v26 = vld [vmem:[%s8170_s3 + $0x318] sm:$0xff] }
 0x3bc   : > { %2662 = vmatmul.f32.gmra.mxu1 %v6730_v52  ;;  %8213 = vst [vmem:[#allocation18_spill] sm:$0xff] %v6770_v16  ;;  %2983 = vmatpush.msra.mxu0 %v4581_v26 }
 0x3bd   : > { %1351 = vst [vmem:[#allocation3 + $0xc1] sm:$0xff] %v6728_v9  ;;  %2800 = vmatmul.f32.gmra.mxu2 %v6728_v9 }
 0x3c2   : > { %2560 = vmatmul.f32.gmra.mxu0 %v6259_v0  ;;  %v4615_v0 = vld [vmem:[%s8170_s3 + $0x428] sm:$0xff] }
 0x3c3   : > { %3209 = vmatpush.msra.mxu2 %v4615_v0  ;;  %v4579_v0 = vld [vmem:[%s8170_s3 + $0x308] sm:$0xff]  ;;  %v6802_v26 = vpop.f32.mrf.mxu3 }
 0x3c4   : > { %v2244_v48 = vpop.f32.mrf.mxu1  ;;  %2665 = vmatmul.f32.gmra.mxu1 %v6752_v8  ;;  %8214 = vst [vmem:[#allocation19_spill] sm:$0xff] %v6802_v26 }
 0x3c5   : > { %v6765_v35 = vadd.f32 %v6581_v37, %v2244_v48  ;;  %v4630_v48 = vld [vmem:[%s8170_s3 + $0xa0] sm:$0xff]  ;;  %3210 = vmatpush.msra.mxu2 %v4614_v55  ;;  %v4611_v55 = vld [vmem:[%s8170_s3 + $0x408] sm:$0xff] }
 0x3c6   : > { %3423 = vmatpush.msra.mxu3 %v4630_v48  ;;  %v6813_v48 = vld [vmem:[#allocation3 + $0x80] sm:$0xff] }
 0x3c7   : > { %v8173_v41 = vmax.f32 %v6765_v35, 0.0  ;;  %3211 = vmatpush.msra.mxu2 %v4613_v44  ;;  %v4629_v44 = vld [vmem:[%s8170_s3 + $0x98] sm:$0xff] }
 0x3c8   : > { %3424 = vmatpush.msra.mxu3 %v4629_v44  ;;  %v4626_v44 = vld [vmem:[%s8170_s3 + $0x80] sm:$0xff] }
 0x3c9   : > { %2283 = vst [vmem:[#allocation3 + $0x171] sm:$0xff] %v8173_v41  ;;  %3212 = vmatpush.msra.mxu2 %v4612_v36  ;;  %v6865_v41 = vld [vmem:[#allocation3 + $0xa8] sm:$0xff] }
 0x3ca   : > { %2563 = vmatmul.f32.gmra.mxu0 %v6275_v20  ;;  %v4580_v20 = vld [vmem:[%s8170_s3 + $0x310] sm:$0xff] }
 0x3cb   : > { %2984 = vmatpush.msra.mxu0 %v4580_v20  ;;  %v6811_v20 = vpop.f32.mrf.mxu2  ;;  %3213 = vmatpush.msra.mxu2 %v4611_v55  ;;  %v6827_v36 = vpop.f32.mrf.mxu3  ;;  %v4595_v55 = vld [vmem:[%s8170_s3 + $0x388] sm:$0xff] }
 0x3cc   : > { %2668 = vmatmul.f32.gmra.mxu1 %v6775_v23 }
 0x3cd   : > { %2985 = vmatpush.msra.mxu0 %v4579_v0  ;;  %v4610_v0 = vld [vmem:[%s8170_s3 + $0x400] sm:$0xff] }
 0x3ce   : > { %3214 = vmatpush.msra.mxu2 %v4610_v0  ;;  %v4594_v0 = vld [vmem:[%s8170_s3 + $0x380] sm:$0xff] }
 0x3cf   : > { %2986 = vmatpush.msra.mxu0 %v4578_v51  ;;  %v6830_v51 = vld [vmem:[#allocation3 + $0x90] sm:$0xff] }
 0x3d0   : > { %3687 = vmatpush.msrb.mxu2 %v6318_v5  ;;  %v4628_v5 = vld [vmem:[%s8170_s3 + $0x90] sm:$0xff] }
 0x3d1   : > { %3425 = vmatpush.msra.mxu3 %v4628_v5 }
 0x3d2   : > { %2566 = vmatmul.f32.gmra.mxu0 %v6288_v61  ;;  %v4596_v61 = vld [vmem:[%s8170_s3 + $0x390] sm:$0xff]  ;;  %3688 = vmatpush.msrb.mxu2 %v6352_v34 }
 0x3d3   : > { %3098 = vmatpush.msra.mxu1 %v4596_v61  ;;  %v6840_v61 = vpop.f32.mrf.mxu2  ;;  %v6842_v34 = vpop.f32.mrf.mxu3 }
 0x3d4   : > { %2671 = vmatmul.f32.gmra.mxu1 %v6813_v48  ;;  %3689 = vmatpush.msrb.mxu2 %v6379_v45  ;;  %v6848_v45 = vld [vmem:[#allocation3 + $0x98] sm:$0xff] }
 0x3d5   : > { %3099 = vmatpush.msra.mxu1 %v4595_v55 }
 0x3d7   : > { %3100 = vmatpush.msra.mxu1 %v4594_v0 }
 0x3d9   : > { %3574 = vmatpush.msrb.mxu1 %v6307_v57  ;;  %v3379_v57 = vld [vmem:[%s8170_s3 + $0x78] sm:$0xff] }
 0x3da   : > { %2569 = vmatmul.f32.gmra.mxu0 %v6313_v13  ;;  %v4627_v13 = vld [vmem:[%s8170_s3 + $0x88] sm:$0xff] }
 0x3db   : > { %3426 = vmatpush.msra.mxu3 %v4627_v13  ;;  %v6857_v55 = vpop.f32.mrf.mxu2  ;;  %3575 = vmatpush.msrb.mxu1 %v6336_v31 }
 0x3dc   : > { %2674 = vmatmul.f32.gmra.mxu1 %v6830_v51  ;;  %3477 = vmatpush.msrb.mxu0 %v3379_v57 }
 0x3dd   : > { %3427 = vmatpush.msra.mxu3 %v4626_v44  ;;  %v6867_v44 = vpop.f32.mrf.mxu3  ;;  %3576 = vmatpush.msrb.mxu1 %v6370_v33  ;;  %v3166_v33 = vld [vmem:[#allocation3 + $0x32] sm:$0xff] }
 0x3df   : > { %3577 = vmatpush.msrb.mxu1 %v6388_v30  ;;  %v3378_v30 = vld [vmem:[%s8170_s3 + $0x70] sm:$0xff] }
 0x3e0   : > { %3478 = vmatpush.msrb.mxu0 %v3378_v30  ;;  %v4688_v30 = vld [vmem:[%s8170_s3 + $0x270] sm:$0xff] }
 0x3e1   : > { %3578 = vmatpush.msrb.mxu1 %v6406_v1  ;;  %v4689_v1 = vld [vmem:[%s8170_s3 + $0x278] sm:$0xff] }
 0x3e2   : > { %2572 = vmatmul.f32.gmra.mxu0 %v6341_v7  ;;  %3800 = vmatpush.msrb.mxu3 %v4689_v1 }
 0x3e3   : > { %3579 = vmatpush.msrb.mxu1 %v6423_v24 }
 0x3e4   : > { %2677 = vmatmul.f32.gmra.mxu1 %v6848_v45  ;;  %3801 = vmatpush.msrb.mxu3 %v4688_v30 }
 0x3e7   : > { %v1317_v7 = vpop.f32.mrf.mxu0 }
 0x3e8   : > { %v1318_v5 = vadd.f32 %v6581_v37, %v1317_v7  ;;  %v6880_v7 = vpop.f32.mrf.mxu2 }
 0x3ea   : > { %v6861_v13 = vmax.f32 %v1318_v5, 0.0  ;;  %2575 = vmatmul.f32.gmra.mxu0 %v6365_v38 }
 0x3ec   : > { %1352 = vst [vmem:[#allocation3 + $0xc9] sm:$0xff] %v6861_v13  ;;  %2680 = vmatmul.f32.gmra.mxu1 %v6865_v41  ;;  %2803 = vmatmul.f32.gmra.mxu2 %v6861_v13 }
 0x3ef   : > { %v2247_v38 = vpop.f32.mrf.mxu1  ;;  %v6876_v0 = vpop.f32.mrf.mxu0 }
 0x3f0   : > { %v2248_v31 = vadd.f32 %v6581_v37, %v2247_v38  ;;  %v6902_v57 = vpop.f32.mrf.mxu2  ;;  %v6904_v38 = vld [vmem:[#allocation3 + $0xc0] sm:$0xff] }
 0x3f2   : > { %v2267_v5 = vmax.f32 %v2248_v31, 0.0  ;;  %2987 = vmatmul.f32.vlgmr.msra.gmra.mxu0 %v6638_v27  ;;  %v6897_v27 = vpop.f32.mrf.mxu3 }
 0x3f3   : > { %v6886_v53 = vld [vmem:[#allocation3 + $0xc2] sm:$0xff]  ;;  %v6906_v31 = vld [vmem:[#allocation3 + $0xca] sm:$0xff] }
 0x3f4   : > { %2284 = vst [vmem:[#allocation3 + $0x181] sm:$0xff] %v2267_v5  ;;  %2683 = vmatmul.f32.gmra.mxu1 %v6884_v49  ;;  %2914 = vmatmul.f32.gmra.mxu3 %v6886_v53  ;;  %v3167_v5 = vld [vmem:[#allocation3 + $0x3a] sm:$0xff]  ;;  %v6922_v16 = vld [vmem:[#allocation3 + $0xc8] sm:$0xff] }
 0x3f5   : > { %3215 = vmatmul.f32.vlgmr.msra.gmra.mxu2 %v3166_v33  ;;  %v3377_v33 = vld [vmem:[%s8170_s3 + $0x68] sm:$0xff] }
 0x3f6   : > { %3479 = vmatpush.msrb.mxu0 %v3377_v33  ;;  %v4687_v33 = vld [vmem:[%s8170_s3 + $0x268] sm:$0xff] }
 0x3f7   : > { %v6899_v24 = vpop.f32.mrf.mxu0  ;;  %3802 = vmatpush.msrb.mxu3 %v4687_v33 }
 0x3f8   : > { %v6932_v30 = vpop.f32.mrf.mxu2 }
 0x3fa   : > { %2990 = vmatmul.f32.gmra.mxu0 %v6662_v60  ;;  %v6918_v1 = vpop.f32.mrf.mxu3 }
 0x3fc   : > { %2686 = vmatmul.f32.gmra.mxu1 %v6904_v38  ;;  %2917 = vmatmul.f32.gmra.mxu3 %v6906_v31 }
 0x3fd   : > { %3218 = vmatmul.f32.gmra.mxu2 %v3167_v5  ;;  %v3376_v5 = vld [vmem:[%s8170_s3 + $0x60] sm:$0xff] }
 0x3fe   : > { %3480 = vmatpush.msrb.mxu0 %v3376_v5  ;;  %v4686_v5 = vld [vmem:[%s8170_s3 + $0x260] sm:$0xff] }
 0x3ff   : > { %v6916_v60 = vpop.f32.mrf.mxu0  ;;  %3803 = vmatpush.msrb.mxu3 %v4686_v5 }
 0x401   : > { %v2250_v26 = vpop.f32.mrf.mxu1 }
 0x402   : > { %v2251_v54 = vadd.f32 %v6581_v37, %v2250_v26  ;;  %2993 = vmatmul.f32.gmra.mxu0 %v6687_v2  ;;  %v3052_v26 = vld [vmem:[#allocation3 + $0x31] sm:$0xff] }
 0x404   : > { %v2268_v62 = vmax.f32 %v2251_v54, 0.0  ;;  %2689 = vmatmul.f32.gmra.mxu1 %v6922_v16  ;;  %3428 = vmatmul.f32.vlgmr.msra.gmra.mxu3 %v6728_v9  ;;  %v6938_v54 = vpop.f32.mrf.mxu3 }
 0x405   : > { %3221 = vmatmul.f32.gmra.mxu2 %v3168_v42  ;;  %v3375_v42 = vld [vmem:[%s8170_s3 + $0x58] sm:$0xff] }
 0x406   : > { %2285 = vst [vmem:[#allocation3 + $0x189] sm:$0xff] %v2268_v62  ;;  %v4670_v62 = vld [vmem:[%s8170_s3 + $0x1e0] sm:$0xff]  ;;  %3481 = vmatpush.msrb.mxu0 %v3375_v42  ;;  %v4669_v42 = vld [vmem:[%s8170_s3 + $0x1d8] sm:$0xff] }
 0x407   : > { %v6934_v37 = vpop.f32.mrf.mxu0  ;;  %3690 = vmatpush.msrb.mxu2 %v4670_v62 }
 0x409   : > { %v6936_v2 = vpop.f32.mrf.mxu1  ;;  %3691 = vmatpush.msrb.mxu2 %v4669_v42  ;;  %v4668_v42 = vld [vmem:[%s8170_s3 + $0x1d0] sm:$0xff] }
 0x40a   : > { %2996 = vmatmul.f32.gmra.mxu0 %v6707_v3  ;;  %v6951_v3 = vpop.f32.mrf.mxu2 }
 0x40b   : > { %8215 = vst [vmem:[#allocation20_spill] sm:$0xff] %v6951_v3  ;;  %3692 = vmatpush.msrb.mxu2 %v4668_v42  ;;  %v3055_v3 = vld [vmem:[#allocation3 + $0x51] sm:$0xff] }
 0x40c   : > { %3101 = vmatmul.f32.vlgmr.msra.gmra.mxu1 %v3052_v26  ;;  %3431 = vmatmul.f32.gmra.mxu3 %v6861_v13  ;;  %v6960_v47 = vpop.f32.mrf.mxu3  ;;  %v4650_v42 = vld [vmem:[%s8170_s3 + $0x140] sm:$0xff] }
 0x40d   : > { %3224 = vmatmul.f32.gmra.mxu2 %v3169_v22  ;;  %8216 = vst [vmem:[#allocation21_spill] sm:$0xff] %v6960_v47  ;;  %v3374_v22 = vld [vmem:[%s8170_s3 + $0x50] sm:$0xff]  ;;  %v7049_v47 = vld [vmem:[#allocation3 + $0x109] sm:$0xff] }
 0x40e   : > { %3482 = vmatpush.msrb.mxu0 %v3374_v22  ;;  %v4651_v22 = vld [vmem:[%s8170_s3 + $0x148] sm:$0xff]  ;;  %8227 = vst [vmem:[#allocation32_spill] sm:$0xff] %v7049_v47 }
 0x40f   : > { %v6953_v33 = vpop.f32.mrf.mxu0  ;;  %3580 = vmatpush.msrb.mxu1 %v4651_v22  ;;  %v3372_v22 = vld [vmem:[%s8170_s3 + $0x40] sm:$0xff] }
 0x411   : > { %v6955_v26 = vpop.f32.mrf.mxu1  ;;  %3581 = vmatpush.msrb.mxu1 %v4650_v42  ;;  %v4649_v42 = vld [vmem:[%s8170_s3 + $0x138] sm:$0xff] }
 0x412   : > { %2999 = vmatmul.f32.gmra.mxu0 %v6730_v52  ;;  %v4685_v52 = vld [vmem:[%s8170_s3 + $0x258] sm:$0xff] }
 0x413   : > { %3804 = vmatpush.msrb.mxu3 %v4685_v52  ;;  %3582 = vmatpush.msrb.mxu1 %v4649_v42  ;;  %v4648_v42 = vld [vmem:[%s8170_s3 + $0x130] sm:$0xff] }
 0x414   : > { %3104 = vmatmul.f32.gmra.mxu1 %v3053_v19  ;;  %3434 = vmatmul.f32.gmra.mxu3 %v6958_v59  ;;  %v6974_v19 = vpop.f32.mrf.mxu2 }
 0x415   : > { %3227 = vmatmul.f32.gmra.mxu2 %v3170_v14  ;;  %8217 = vst [vmem:[#allocation22_spill] sm:$0xff] %v6974_v19  ;;  %v3373_v14 = vld [vmem:[%s8170_s3 + $0x48] sm:$0xff]  ;;  %3583 = vmatpush.msrb.mxu1 %v4648_v42 }
 0x416   : > { %3483 = vmatpush.msrb.mxu0 %v3373_v14  ;;  %v3172_v14 = vld [vmem:[#allocation3 + $0x7a] sm:$0xff] }
 0x417   : > { %v6972_v62 = vpop.f32.mrf.mxu0  ;;  %v3369_v42 = vld [vmem:[%s8170_s3 + $0x28] sm:$0xff] }
 0x418   : > { %3484 = vmatpush.msrb.mxu0 %v3372_v22  ;;  %v3371_v22 = vld [vmem:[%s8170_s3 + $0x38] sm:$0xff] }
 0x419   : > { %v6976_v5 = vpop.f32.mrf.mxu1 }
 0x41a   : > { %3002 = vmatmul.f32.gmra.mxu0 %v6752_v8  ;;  %v6994_v8 = vpop.f32.mrf.mxu3 }
 0x41b   : > { %8218 = vst [vmem:[#allocation23_spill] sm:$0xff] %v6994_v8  ;;  %3485 = vmatpush.msrb.mxu0 %v3371_v22  ;;  %v3370_v22 = vld [vmem:[%s8170_s3 + $0x30] sm:$0xff] }
 0x41c   : > { %3107 = vmatmul.f32.gmra.mxu1 %v3054_v10  ;;  %3437 = vmatmul.f32.gmra.mxu3 %v6979_v63  ;;  %v4684_v10 = vld [vmem:[%s8170_s3 + $0x250] sm:$0xff]  ;;  %v7001_v32 = vpop.f32.mrf.mxu2 }
 0x41d   : > { %3230 = vmatmul.f32.gmra.mxu2 %v3171_v15  ;;  %3805 = vmatpush.msrb.mxu3 %v4684_v10  ;;  %8220 = vst [vmem:[#allocation25_spill] sm:$0xff] %v7001_v32  ;;  %v7003_v15 = vld [vmem:[#allocation3 + $0xf1] sm:$0xff] }
 0x41e   : > { %3486 = vmatpush.msrb.mxu0 %v3370_v22 }
 0x41f   : > { %v6996_v52 = vpop.f32.mrf.mxu0 }
 0x420   : > { %8219 = vst [vmem:[#allocation24_spill] sm:$0xff] %v6996_v52  ;;  %v3056_v52 = vld [vmem:[#allocation3 + $0x61] sm:$0xff]  ;;  %3487 = vmatpush.msrb.mxu0 %v3369_v42  ;;  %v3368_v42 = vld [vmem:[%s8170_s3 + $0x20] sm:$0xff] }
 0x421   : > { %v6998_v19 = vpop.f32.mrf.mxu1 }
 0x422   : > { %3005 = vmatmul.f32.gmra.mxu0 %v6775_v23  ;;  %v4667_v23 = vld [vmem:[%s8170_s3 + $0x1c8] sm:$0xff]  ;;  %v7020_v32 = vpop.f32.mrf.mxu3 }
 0x423   : > { %3693 = vmatpush.msrb.mxu2 %v4667_v23  ;;  %8222 = vst [vmem:[#allocation27_spill] sm:$0xff] %v7020_v32  ;;  %v4666_v23 = vld [vmem:[%s8170_s3 + $0x1c0] sm:$0xff]  ;;  %3488 = vmatpush.msrb.mxu0 %v3368_v42 }
 0x424   : > { %3110 = vmatmul.f32.gmra.mxu1 %v3055_v3  ;;  %3440 = vmatmul.f32.gmra.mxu3 %v7003_v15  ;;  %v4683_v3 = vld [vmem:[%s8170_s3 + $0x248] sm:$0xff] }
 0x425   : > { %3233 = vmatmul.f32.gmra.mxu2 %v3172_v14  ;;  %3806 = vmatpush.msrb.mxu3 %v4683_v3  ;;  %v3173_v14 = vld [vmem:[#allocation3 + $0x82] sm:$0xff]  ;;  %v3177_v42 = vld [vmem:[#allocation3 + $0xb2] sm:$0xff] }
 0x426   : > { %3694 = vmatpush.msrb.mxu2 %v4666_v23  ;;  %v4665_v23 = vld [vmem:[%s8170_s3 + $0x1b8] sm:$0xff] }
 0x427   : > { %v7018_v10 = vpop.f32.mrf.mxu0 }
 0x428   : > { %8221 = vst [vmem:[#allocation26_spill] sm:$0xff] %v7018_v10  ;;  %3695 = vmatpush.msrb.mxu2 %v4665_v23  ;;  %v4647_v23 = vld [vmem:[%s8170_s3 + $0x128] sm:$0xff] }
 0x429   : > { %v7022_v8 = vpop.f32.mrf.mxu1  ;;  %3584 = vmatpush.msrb.mxu1 %v4647_v23  ;;  %v4646_v23 = vld [vmem:[%s8170_s3 + $0x120] sm:$0xff] }
 0x42a   : > { %3008 = vmatmul.f32.gmra.mxu0 %v6813_v48  ;;  %v7037_v48 = vpop.f32.mrf.mxu2  ;;  %v7046_v10 = vpop.f32.mrf.mxu3 }
 0x42b   : > { %8223 = vst [vmem:[#allocation28_spill] sm:$0xff] %v7037_v48  ;;  %3585 = vmatpush.msrb.mxu1 %v4646_v23  ;;  %v3367_v23 = vld [vmem:[%s8170_s3 + $0x18] sm:$0xff] }
 0x42c   : > { %3113 = vmatmul.f32.gmra.mxu1 %v3056_v52  ;;  %3443 = vmatmul.f32.gmra.mxu3 %v7025_v43  ;;  %v4682_v52 = vld [vmem:[%s8170_s3 + $0x240] sm:$0xff]  ;;  %8226 = vst [vmem:[#allocation31_spill] sm:$0xff] %v7046_v10  ;;  %v3058_v10 = vld [vmem:[#allocation3 + $0x79] sm:$0xff] }
 0x42d   : > { %3236 = vmatmul.f32.gmra.mxu2 %v3173_v14  ;;  %3807 = vmatpush.msrb.mxu3 %v4682_v52  ;;  %v3174_v14 = vld [vmem:[#allocation3 + $0x92] sm:$0xff] }
 0x42e   : > { %3489 = vmatpush.msrb.mxu0 %v3367_v23  ;;  %v3365_v23 = vld [vmem:[%s8170_s3 + $0x8] sm:$0xff] }
 0x42f   : > { %v7042_v3 = vpop.f32.mrf.mxu0 }
 0x430   : > { %8224 = vst [vmem:[#allocation29_spill] sm:$0xff] %v7042_v3  ;;  %v7071_v3 = vld [vmem:[#allocation3 + $0x111] sm:$0xff] }
 0x431   : > { %v7044_v32 = vpop.f32.mrf.mxu1  ;;  %8231 = vst [vmem:[#allocation36_spill] sm:$0xff] %v7071_v3 }
 0x432   : > { %8225 = vst [vmem:[#allocation30_spill] sm:$0xff] %v7044_v32  ;;  %3011 = vmatmul.f32.gmra.mxu0 %v6830_v51  ;;  %v7064_v51 = vpop.f32.mrf.mxu2  ;;  %v7073_v22 = vpop.f32.mrf.mxu3 }
 0x433   : > { %8228 = vst [vmem:[#allocation33_spill] sm:$0xff] %v7064_v51 }
 0x434   : > { %3116 = vmatmul.f32.gmra.mxu1 %v3057_v21  ;;  %3446 = vmatmul.f32.gmra.mxu3 %v7049_v47  ;;  %v4681_v21 = vld [vmem:[%s8170_s3 + $0x238] sm:$0xff]  ;;  %8232 = vst [vmem:[#allocation37_spill] sm:$0xff] %v7073_v22 }
 0x435   : > { %3239 = vmatmul.f32.gmra.mxu2 %v3174_v14  ;;  %3808 = vmatpush.msrb.mxu3 %v4681_v21  ;;  %v3175_v14 = vld [vmem:[#allocation3 + $0x9a] sm:$0xff] }
 0x437   : > { %v7066_v52 = vpop.f32.mrf.mxu0 }
 0x438   : > { %8229 = vst [vmem:[#allocation34_spill] sm:$0xff] %v7066_v52  ;;  %v3059_v52 = vld [vmem:[#allocation3 + $0x81] sm:$0xff] }
 0x439   : > { %v7068_v48 = vpop.f32.mrf.mxu1 }
 0x43a   : > { %8230 = vst [vmem:[#allocation35_spill] sm:$0xff] %v7068_v48  ;;  %3014 = vmatmul.f32.gmra.mxu0 %v6848_v45  ;;  %v4664_v45 = vld [vmem:[%s8170_s3 + $0x1b0] sm:$0xff]  ;;  %v7090_v51 = vpop.f32.mrf.mxu2 }
 0x43b   : > { %3696 = vmatpush.msrb.mxu2 %v4664_v45  ;;  %8234 = vst [vmem:[#allocation39_spill] sm:$0xff] %v7090_v51  ;;  %v7095_v48 = vld [vmem:[#allocation3 + $0x121] sm:$0xff]  ;;  %v4663_v45 = vld [vmem:[%s8170_s3 + $0x1a8] sm:$0xff] }
 0x43c   : > { %3119 = vmatmul.f32.gmra.mxu1 %v3058_v10  ;;  %3449 = vmatmul.f32.gmra.mxu3 %v7071_v3  ;;  %v4680_v10 = vld [vmem:[%s8170_s3 + $0x230] sm:$0xff]  ;;  %8236 = vst [vmem:[#allocation41_spill] sm:$0xff] %v7095_v48 }
 0x43d   : > { %3242 = vmatmul.f32.gmra.mxu2 %v3175_v14  ;;  %3809 = vmatpush.msrb.mxu3 %v4680_v10  ;;  %v3176_v14 = vld [vmem:[#allocation3 + $0xaa] sm:$0xff] }
 0x43e   : > { %3697 = vmatpush.msrb.mxu2 %v4663_v45  ;;  %v4645_v45 = vld [vmem:[%s8170_s3 + $0x118] sm:$0xff] }
 0x43f   : > { %v7088_v21 = vpop.f32.mrf.mxu0  ;;  %3586 = vmatpush.msrb.mxu1 %v4645_v45  ;;  %v4660_v45 = vld [vmem:[%s8170_s3 + $0x190] sm:$0xff] }
 0x440   : > { %8233 = vst [vmem:[#allocation38_spill] sm:$0xff] %v7088_v21 }
 0x441   : > { %v7092_v22 = vpop.f32.mrf.mxu1 }
 0x442   : > { %8235 = vst [vmem:[#allocation40_spill] sm:$0xff] %v7092_v22  ;;  %3017 = vmatmul.f32.gmra.mxu0 %v6865_v41  ;;  %v4679_v41 = vld [vmem:[%s8170_s3 + $0x228] sm:$0xff]  ;;  %v7117_v21 = vpop.f32.mrf.mxu2 }
 0x443   : > { %3810 = vmatpush.msrb.mxu3 %v4679_v41  ;;  %8240 = vst [vmem:[#allocation45_spill] sm:$0xff] %v7117_v21  ;;  %v3060_v22 = vld [vmem:[#allocation3 + $0x91] sm:$0xff] }
 0x444   : > { %3122 = vmatmul.f32.gmra.mxu1 %v3059_v52  ;;  %3452 = vmatmul.f32.gmra.mxu3 %v7095_v48  ;;  %v7110_v52 = vpop.f32.mrf.mxu3  ;;  %v4678_v41 = vld [vmem:[%s8170_s3 + $0x220] sm:$0xff]  ;;  %v7223_v48 = vld [vmem:[#allocation3 + $0xe2] sm:$0xff] }
 0x445   : > { %3245 = vmatmul.f32.gmra.mxu2 %v3176_v14  ;;  %8237 = vst [vmem:[#allocation42_spill] sm:$0xff] %v7110_v52  ;;  %v7119_v14 = vld [vmem:[#allocation3 + $0x129] sm:$0xff]  ;;  %3811 = vmatpush.msrb.mxu3 %v4678_v41 }
 0x446   : > { %8241 = vst [vmem:[#allocation46_spill] sm:$0xff] %v7119_v14  ;;  %v3364_v41 = vld [vmem:[%s8170_s3] sm:$0xff] }
 0x447   : > { %v7112_v10 = vpop.f32.mrf.mxu0 }
 0x448   : > { %8238 = vst [vmem:[#allocation43_spill] sm:$0xff] %v7112_v10  ;;  %v4661_v10 = vld [vmem:[%s8170_s3 + $0x198] sm:$0xff] }
 0x449   : > { %v7114_v51 = vpop.f32.mrf.mxu1 }
 0x44a   : > { %8239 = vst [vmem:[#allocation44_spill] sm:$0xff] %v7114_v51  ;;  %3020 = vmatmul.f32.gmra.mxu0 %v6884_v49  ;;  %v4662_v49 = vld [vmem:[%s8170_s3 + $0x1a0] sm:$0xff]  ;;  %v7181_v51 = vld [vmem:[#allocation3 + $0x141] sm:$0xff] }
 0x44b   : > { %3698 = vmatpush.msrb.mxu2 %v4662_v49  ;;  %v3061_v49 = vld [vmem:[#allocation3 + $0x99] sm:$0xff]  ;;  %8250 = vst [vmem:[#allocation55_spill] sm:$0xff] %v7181_v51 }
 0x44c   : > { %3125 = vmatmul.f32.gmra.mxu1 %v3060_v22  ;;  %3455 = vmatmul.f32.gmra.mxu3 %v7119_v14  ;;  %v3366_v22 = vld [vmem:[%s8170_s3 + $0x10] sm:$0xff] }
 0x44d   : > { %3248 = vmatmul.f32.gmra.mxu2 %v3177_v42  ;;  %3490 = vmatpush.msrb.mxu0 %v3366_v22  ;;  %v7142_v42 = vpop.f32.mrf.mxu3  ;;  %v7153_v22 = vld [vmem:[#allocation3 + $0x139] sm:$0xff] }
 0x44e   : > { %8243 = vst [vmem:[#allocation48_spill] sm:$0xff] %v7142_v42  ;;  %3699 = vmatpush.msrb.mxu2 %v4661_v10  ;;  %v4644_v10 = vld [vmem:[%s8170_s3 + $0x110] sm:$0xff] }
 0x44f   : > { %v7137_v21 = vpop.f32.mrf.mxu0  ;;  %3491 = vmatpush.msrb.mxu0 %v3365_v23  ;;  %8245 = vst [vmem:[#allocation50_spill] sm:$0xff] %v7153_v22  ;;  %v4677_v23 = vld [vmem:[%s8170_s3 + $0x218] sm:$0xff]  ;;  %3587 = vmatpush.msrb.mxu1 %v4644_v10  ;;  %v4676_v10 = vld [vmem:[%s8170_s3 + $0x210] sm:$0xff] }
 0x450   : > { %8242 = vst [vmem:[#allocation47_spill] sm:$0xff] %v7137_v21  ;;  %3700 = vmatpush.msrb.mxu2 %v4660_v45  ;;  %v4659_v45 = vld [vmem:[%s8170_s3 + $0x188] sm:$0xff]  ;;  %v7168_v21 = vpop.f32.mrf.mxu2  ;;  %3812 = vmatpush.msrb.mxu3 %v4677_v23 }
 0x451   : > { %v7147_v52 = vpop.f32.mrf.mxu1  ;;  %8246 = vst [vmem:[#allocation51_spill] sm:$0xff] %v7168_v21  ;;  %3492 = vmatpush.msrb.mxu0 %v3364_v41  ;;  %v3062_v21 = vld [vmem:[#allocation3 + $0xa9] sm:$0xff]  ;;  %v4643_v41 = vld [vmem:[%s8170_s3 + $0x108] sm:$0xff] }
 0x452   : > { %8244 = vst [vmem:[#allocation49_spill] sm:$0xff] %v7147_v52  ;;  %3023 = vmatmul.f32.gmra.mxu0 %v6904_v38  ;;  %3701 = vmatpush.msrb.mxu2 %v4659_v45 }
 0x453   : > { %3588 = vmatpush.msrb.mxu1 %v4643_v41  ;;  %3813 = vmatpush.msrb.mxu3 %v4676_v10  ;;  %v7206_v41 = vld [vmem:[#allocation3 + $0xda] sm:$0xff]  ;;  %v4674_v10 = vld [vmem:[%s8170_s3 + $0x200] sm:$0xff] }
 0x454   : > { %3128 = vmatmul.f32.gmra.mxu1 %v3061_v49  ;;  %3458 = vmatmul.f32.gmra.mxu3 %v7153_v22  ;;  %v4658_v49 = vld [vmem:[%s8170_s3 + $0x180] sm:$0xff] }
 0x455   : > { %3251 = vmatmul.f32.gmra.mxu2 %v6886_v53  ;;  %v7178_v22 = vpop.f32.mrf.mxu3 }
 0x456   : > { %3702 = vmatpush.msrb.mxu2 %v4658_v49  ;;  %8249 = vst [vmem:[#allocation54_spill] sm:$0xff] %v7178_v22  ;;  %v7198_v22 = vld [vmem:[#allocation3 + $0x151] sm:$0xff] }
 0x457   : > { %v7174_v42 = vpop.f32.mrf.mxu0  ;;  %8253 = vst [vmem:[#allocation58_spill] sm:$0xff] %v7198_v22 }
 0x458   : > { %8247 = vst [vmem:[#allocation52_spill] sm:$0xff] %v7174_v42  ;;  %v7191_v23 = vpop.f32.mrf.mxu2  ;;  %v3063_v42 = vld [vmem:[#allocation3 + $0xb1] sm:$0xff] }
 0x459   : > { %v7176_v52 = vpop.f32.mrf.mxu1  ;;  %8251 = vst [vmem:[#allocation56_spill] sm:$0xff] %v7191_v23  ;;  %v4642_v23 = vld [vmem:[%s8170_s3 + $0x100] sm:$0xff] }
 0x45a   : > { %8248 = vst [vmem:[#allocation53_spill] sm:$0xff] %v7176_v52  ;;  %3026 = vmatmul.f32.gmra.mxu0 %v6922_v16  ;;  %v4675_v52 = vld [vmem:[%s8170_s3 + $0x208] sm:$0xff]  ;;  %3589 = vmatpush.msrb.mxu1 %v4642_v23 }
 0x45b   : > { %3814 = vmatpush.msrb.mxu3 %v4675_v52 }
 0x45c   : > { %3131 = vmatmul.f32.gmra.mxu1 %v3062_v21  ;;  %3461 = vmatmul.f32.gmra.mxu3 %v7181_v51  ;;  %v7195_v21 = vld [vmem:[#allocation3 + $0xd8] sm:$0xff] }
 0x45d   : > { %3254 = vmatmul.f32.gmra.mxu2 %v6906_v31  ;;  %v7203_v51 = vpop.f32.mrf.mxu3  ;;  %3815 = vmatpush.msrb.mxu3 %v4674_v10 }
 0x45e   : > { %8254 = vst [vmem:[#allocation59_spill] sm:$0xff] %v7203_v51  ;;  %v7217_v51 = vld [vmem:[#allocation3 + $0xe0] sm:$0xff] }
 0x45f   : > { %v2573_v45 = vpop.f32.mrf.mxu0 }
 0x461   : > { %v7193_v49 = vpop.f32.mrf.mxu1 }
 0x462   : > { %8252 = vst [vmem:[#allocation57_spill] sm:$0xff] %v7193_v49  ;;  %3029 = vmatmul.f32.gmra.mxu0 %v7195_v21  ;;  %v2801_v49 = vpop.f32.mrf.mxu2 }
 0x464   : > { %3134 = vmatmul.f32.gmra.mxu1 %v3063_v42  ;;  %3464 = vmatmul.f32.gmra.mxu3 %v7198_v22  ;;  %v8256_v22 = vmax.f32 %v6584_v18, 0.0  ;;  %v4721_v18 = vld [vmem:[%s8170_s3 + $0x378] sm:$0xff] }
 0x465   : > { %3257 = vmatmul.f32.gmra.mxu2 %v7206_v41  ;;  %v7226_v52 = vpop.f32.mrf.mxu3  ;;  %4027 = vmatpush.msra.mxu1 %v4721_v18 }
 0x466   : > { %8257 = vst [vmem:[#allocation61_spill] sm:$0xff] %v7226_v52 }
 0x467   : > { %v2576_v14 = vpop.f32.mrf.mxu0 }
 0x469   : > { %v7215_v42 = vpop.f32.mrf.mxu1 }
 0x46a   : > { %8255 = vst [vmem:[#allocation60_spill] sm:$0xff] %v7215_v42  ;;  %3032 = vmatmul.f32.gmra.mxu0 %v7217_v51 }
 0x46c   : > { %3137 = vmatmul.f32.gmra.mxu1 %v6728_v9  ;;  %3467 = vmatmul.f32.gmra.mxu3 %v8256_v22  ;;  %v4705_v9 = vld [vmem:[%s8170_s3 + $0x2f8] sm:$0xff]  ;;  %v8259_v22 = vmax.f32 %v6654_v4, 0.0  ;;  %v4704_v4 = vld [vmem:[%s8170_s3 + $0x2f0] sm:$0xff] }
 0x46d   : > { %3260 = vmatmul.f32.gmra.mxu2 %v7223_v48  ;;  %3913 = vmatpush.msra.mxu0 %v4705_v9  ;;  %v2434_v9 = vadd.f32 %v6251_v58, %v6233_v50  ;;  %v7266_v50 = vld [vmem:[%s8170_s3 + $0x478] sm:$0xff] }
 0x46e   : > { %4806 = vmatpush.msra.mxu3 %v7266_v50 }
 0x46f   : > { %v7228_v23 = vpop.f32.mrf.mxu0  ;;  %v2804_v10 = vpop.f32.mrf.mxu2  ;;  %3914 = vmatpush.msra.mxu0 %v4704_v4  ;;  %v2579_v58 = vadd.f32 %v6876_v0, %v2434_v9  ;;  %v2437_v9 = vadd.f32 %v6271_v6, %v6256_v46  ;;  %v7302_v46 = vld [vmem:[%s8170_s3 + $0x470] sm:$0xff] }
 0x470   : > { %4807 = vmatpush.msra.mxu3 %v7302_v46 }
 0x471   : > { %v7230_v3 = vpop.f32.mrf.mxu1  ;;  %v2580_v6 = vadd.f32 %v6899_v24, %v2437_v9 }
 0x472   : > { %8258 = vst [vmem:[#allocation62_spill] sm:$0xff] %v7230_v3  ;;  %3493 = vmatmul.f32.vlgmr.msrb.gmra.mxu0 %v6904_v38  ;;  %v2476_v38 = vadd.f32 %v6827_v36, %v6773_v40  ;;  %v4720_v40 = vld [vmem:[%s8170_s3 + $0x370] sm:$0xff]  ;;  %v7261_v36 = vld [vmem:[%s8170_s3 + $0x3f8] sm:$0xff] }
 0x473   : > { %4028 = vmatpush.msra.mxu1 %v4720_v40  ;;  %4790 = vmatpush.msra.mxu2 %v7261_v36 }
 0x474   : > { %3140 = vmatmul.f32.gmra.mxu1 %v6861_v13  ;;  %3470 = vmatmul.f32.gmra.mxu3 %v8259_v22  ;;  %v2593_v42 = vadd.f32 %v2573_v45, %v2476_v38  ;;  %v2479_v13 = vadd.f32 %v6842_v34, %v6811_v20  ;;  %v2693_v45 = vadd.f32 %v6936_v2, %v2579_v58  ;;  %v4703_v20 = vld [vmem:[%s8170_s3 + $0x2e8] sm:$0xff]  ;;  %v7297_v2 = vld [vmem:[%s8170_s3 + $0x3f0] sm:$0xff] }
 0x475   : > { %3703 = vmatmul.f32.vlgmr.msrb.gmra.mxu2 %v7195_v21  ;;  %v4719_v34 = vld [vmem:[%s8170_s3 + $0x368] sm:$0xff]  ;;  %3915 = vmatpush.msra.mxu0 %v4703_v20 }
 0x476   : > { %v2594_v22 = vadd.f32 %v2576_v14, %v2479_v13  ;;  %4029 = vmatpush.msra.mxu1 %v4719_v34  ;;  %v7307_v14 = vld [vmem:[#allocation3 + $0xf0] sm:$0xff]  ;;  %4791 = vmatpush.msra.mxu2 %v7297_v2 }
 0x477   : > { %v2915_v52 = vpop.f32.mrf.mxu3  ;;  %v7245_v3 = vpop.f32.mrf.mxu0  ;;  %v7329_v13 = vld [vmem:[%s8171_s4] ss:$0 sm:$0xff] }
 0x478   : > { %v7247_v32 = vpop.f32.mrf.mxu2 }
 0x479   : > { %v2687_v47 = vpop.f32.mrf.mxu1 }
 0x47a   : > { %v2707_v18 = vadd.f32 %v2687_v47, %v2593_v42  ;;  %3496 = vmatmul.f32.gmra.mxu0 %v6922_v16  ;;  %v8260_v16 = vmax.f32 %v6765_v35, 0.0 }
 0x47c   : > { %v2821_v47 = vadd.f32 %v2801_v49, %v2707_v18  ;;  %3143 = vmatmul.f32.gmra.mxu1 %v6958_v59  ;;  %3473 = vmatmul.f32.gmra.mxu3 %v8260_v16  ;;  %v2807_v18 = vadd.f32 %v6840_v61, %v2693_v45  ;;  %v2440_v16 = vadd.f32 %v6290_v11, %v6280_v17  ;;  %v4718_v45 = vld [vmem:[%s8170_s3 + $0x360] sm:$0xff]  ;;  %v7341_v17 = vld [vmem:[%s8170_s3 + $0x3e8] sm:$0xff] }
 0x47d   : > { %3706 = vmatmul.f32.gmra.mxu2 %v7217_v51  ;;  %4030 = vmatpush.msra.mxu1 %v4718_v45  ;;  %v7346_v11 = vld [vmem:[%s8170_s3 + $0x468] sm:$0xff]  ;;  %v4700_v45 = vld [vmem:[%s8170_s3 + $0x2d0] sm:$0xff] }
 0x47e   : > { %v7278_v42 = vadd.f32 %v2915_v52, %v2821_v47  ;;  %v2921_v52 = vadd.f32 %v6867_v44, %v2807_v18  ;;  %4808 = vmatpush.msra.mxu3 %v7346_v11  ;;  %4792 = vmatpush.msra.mxu2 %v7341_v17 }
 0x47f   : > { %v2918_v0 = vpop.f32.mrf.mxu3  ;;  %v7280_v49 = vpop.f32.mrf.mxu0 }
 0x480   : > { %v7282_v38 = vpop.f32.mrf.mxu2 }
 0x481   : > { %v2690_v35 = vpop.f32.mrf.mxu1 }
 0x482   : > { %v2708_v4 = vadd.f32 %v2690_v35, %v2594_v22  ;;  %3499 = vmatmul.f32.gmra.mxu0 %v7195_v21  ;;  %v2694_v21 = vadd.f32 %v6955_v26, %v2580_v6  ;;  %v3280_v22 = vld [vmem:[%s5035_s25] sm:$0xff]  ;;  %v4701_v6 = vld [vmem:[%s8170_s3 + $0x2d8] sm:$0xff] }
 0x484   : > { %v2822_v61 = vadd.f32 %v2804_v10, %v2708_v4  ;;  %3146 = vmatmul.f32.gmra.mxu1 %v6979_v63  ;;  %3816 = vmatmul.f32.vlgmr.msrb.gmra.mxu3 %v6958_v59  ;;  %v3036_v59 = vadd.f32 %v7228_v23, %v2921_v52  ;;  %v2808_v26 = vadd.f32 %v6857_v55, %v2694_v21  ;;  %v4702_v23 = vld [vmem:[%s8170_s3 + $0x2e0] sm:$0xff]  ;;  %v7401_v21 = vld [vmem:[#allocation3 + $0x108] sm:$0xff]  ;;  %v3281_v52 = vld [vmem:[%s5035_s25 + $0x8] sm:$0xff] }
 0x485   : > { %3709 = vmatmul.f32.gmra.mxu2 %v7307_v14  ;;  %3916 = vmatpush.msra.mxu0 %v4702_v23  ;;  %v2581_v55 = vadd.f32 %v6916_v60, %v2440_v16  ;;  %v2443_v4 = vadd.f32 %v6320_v29, %v6295_v39  ;;  %v7390_v39 = vld [vmem:[%s8170_s3 + $0x3e0] sm:$0xff]  ;;  %8261 = vst [vmem:[#allocation63_spill] sm:$0xff] %v7401_v21 }
 0x486   : > { %v7314_v40 = vadd.f32 %v2918_v0, %v2822_v61  ;;  %v7352_v0 = vld [vmem:[#allocation3 + $0xf8] sm:$0xff]  ;;  %v2922_v9 = vadd.f32 %v6897_v27, %v2808_v26  ;;  %v7395_v29 = vld [vmem:[%s8170_s3 + $0x460] sm:$0xff]  ;;  %4793 = vmatpush.msra.mxu2 %v7390_v39  ;;  %v2446_v23 = vadd.f32 %v6343_v56, %v6325_v28  ;;  %v7432_v28 = vld [vmem:[%s8170_s3 + $0x3d8] sm:$0xff] }
 0x487   : > { %v7316_v24 = vpop.f32.mrf.mxu0  ;;  %v7318_v10 = vpop.f32.mrf.mxu3  ;;  %v2695_v35 = vadd.f32 %v6976_v5, %v2581_v55  ;;  %3917 = vmatpush.msra.mxu0 %v4701_v6  ;;  %4809 = vmatpush.msra.mxu3 %v7395_v29  ;;  %v7437_v56 = vld [vmem:[%s8170_s3 + $0x458] sm:$0xff]  ;;  %v8264_v6 = vld [vmem:[#allocation32_spill] sm:$0xff] }
 0x488   : > { %v7321_v58 = vpop.f32.mrf.mxu2  ;;  %4794 = vmatpush.msra.mxu2 %v7432_v28 }
 0x489   : > { %v3102_v47 = vpop.f32.mrf.mxu1  ;;  %v2809_v20 = vadd.f32 %v6880_v7, %v2695_v35  ;;  %v2582_v7 = vadd.f32 %v6934_v37, %v2443_v4  ;;  %3918 = vmatpush.msra.mxu0 %v4700_v45  ;;  %4810 = vmatpush.msra.mxu3 %v7437_v56  ;;  %v2449_v4 = vadd.f32 %v6372_v12, %v6354_v25  ;;  %v7474_v25 = vld [vmem:[%s8170_s3 + $0x3d0] sm:$0xff] }
 0x48a   : > { %v3150_v44 = vadd.f32 %v3102_v47, %v3036_v59  ;;  %3502 = vmatmul.f32.gmra.mxu0 %v7217_v51  ;;  %v7479_v12 = vld [vmem:[%s8170_s3 + $0x450] sm:$0xff]  ;;  %4795 = vmatpush.msra.mxu2 %v7474_v25 }
 0x48b   : > { %v2696_v59 = vadd.f32 %v6998_v19, %v2582_v7  ;;  %v2923_v47 = vadd.f32 %v6918_v1, %v2809_v20  ;;  %v4699_v20 = vld [vmem:[%s8170_s3 + $0x2c8] sm:$0xff]  ;;  %v3283_v7 = vld [vmem:[%s5035_s25 + $0x18] sm:$0xff]  ;;  %4811 = vmatpush.msra.mxu3 %v7479_v12 }
 0x48c   : > { %v3264_v51 = vadd.f32 %v7247_v32, %v3150_v44  ;;  %3590 = vmatmul.f32.vlgmr.msrb.gmra.mxu1 %v6886_v53  ;;  %3819 = vmatmul.f32.gmra.mxu3 %v6979_v63  ;;  %v3037_v63 = vadd.f32 %v7245_v3, %v2922_v9  ;;  %v4717_v3 = vld [vmem:[%s8170_s3 + $0x358] sm:$0xff] }
 0x48d   : > { %3712 = vmatmul.f32.gmra.mxu2 %v7352_v0  ;;  %4031 = vmatpush.msra.mxu1 %v4717_v3  ;;  %v2810_v1 = vadd.f32 %v6902_v57, %v2696_v59  ;;  %v2583_v57 = vadd.f32 %v6953_v33, %v2446_v23  ;;  %v7485_v3 = vld [vmem:[#allocation3 + $0x120] sm:$0xff]  ;;  %v8267_v59 = vld [vmem:[#allocation21_spill] sm:$0xff] }
 0x48e   : > { %v3299_v18 = vadd.f32 %v7329_v13, %v3264_v51  ;;  %v7443_v51 = vld [vmem:[#allocation3 + $0x110] sm:$0xff]  ;;  %3919 = vmatpush.msra.mxu0 %v4699_v20  ;;  %8265 = vst [vmem:[#allocation32_spill] sm:$0xff] %v7485_v3  ;;  %v8275_v20 = vld [vmem:[#allocation35_spill] sm:$0xff] }
 0x48f   : > { %v7368_v53 = vpop.f32.mrf.mxu0  ;;  %v7370_v32 = vpop.f32.mrf.mxu3  ;;  %8262 = vst [vmem:[#allocation64_spill] sm:$0xff] %v7443_v51  ;;  %v2697_v35 = vadd.f32 %v7022_v8, %v2583_v57  ;;  %v2924_v9 = vadd.f32 %v6938_v54, %v2810_v1  ;;  %v8269_v1 = vld [vmem:[#allocation4_spill] sm:$0xff] }
 0x490   : > { %v3315_v60 = vadd.f32 %v3299_v18, %v3280_v22  ;;  %v7373_v5 = vpop.f32.mrf.mxu2  ;;  %v3282_v22 = vld [vmem:[%s5035_s25 + $0x10] sm:$0xff] }
 0x491   : > { %v3105_v27 = vpop.f32.mrf.mxu1  ;;  %v2811_v54 = vadd.f32 %v6932_v30, %v2697_v35  ;;  %v2584_v30 = vadd.f32 %v6972_v62, %v2449_v4  ;;  %v7513_v35 = vld [vmem:[#allocation3 + $0xf2] sm:$0xff] }
 0x492   : > { %3331 = vst.msk [vmem:[%s7366_s29] sm:$0xff] %vm225_vm0, %v3315_v60  ;;  %v3151_v34 = vadd.f32 %v3105_v27, %v3037_v63  ;;  %3505 = vmatmul.f32.gmra.mxu0 %v7307_v14  ;;  %v8273_v4 = vld [vmem:[#allocation36_spill] sm:$0xff] }
 0x494   : > { %v3265_v61 = vadd.f32 %v7282_v38, %v3151_v34  ;;  %3593 = vmatmul.f32.gmra.mxu1 %v6906_v31  ;;  %3822 = vmatmul.f32.gmra.mxu3 %v7003_v15  ;;  %v3038_v15 = vadd.f32 %v7280_v49, %v2923_v47  ;;  %v4716_v49 = vld [vmem:[%s8170_s3 + $0x350] sm:$0xff]  ;;  %v2925_v47 = vadd.f32 %v8267_v59, %v2811_v54  ;;  %v7529_v54 = vld [vmem:[#allocation3 + $0x128] sm:$0xff] }
 0x495   : > { %3715 = vmatmul.f32.gmra.mxu2 %v7401_v21  ;;  %4032 = vmatpush.msra.mxu1 %v4716_v49  ;;  %v8271_v49 = vld [vmem:[#allocation20_spill] sm:$0xff]  ;;  %8274 = vst [vmem:[#allocation21_spill] sm:$0xff] %v7529_v54 }
 0x496   : > { %v3300_v37 = vadd.f32 %v7329_v13, %v3265_v61  ;;  %v8266_v61 = vld [vmem:[#allocation30_spill] sm:$0xff] }
 0x497   : > { %v7410_v38 = vpop.f32.mrf.mxu0  ;;  %v7412_v31 = vpop.f32.mrf.mxu3 }
 0x498   : > { %v3316_v16 = vadd.f32 %v3300_v37, %v3281_v52  ;;  %v7415_v26 = vpop.f32.mrf.mxu2  ;;  %v2698_v52 = vadd.f32 %v8266_v61, %v2584_v30  ;;  %v8276_v30 = vld [vmem:[#allocation23_spill] sm:$0xff] }
 0x499   : > { %v3108_v44 = vpop.f32.mrf.mxu1 }
 0x49a   : > { %3332 = vst.msk [vmem:[%s7366_s29 + $0x8] sm:$0xff] %vm225_vm0, %v3316_v16  ;;  %v3152_v19 = vadd.f32 %v3108_v44, %v3038_v15  ;;  %3508 = vmatmul.f32.gmra.mxu0 %v7352_v0  ;;  %v3040_v15 = vadd.f32 %v7368_v53, %v2925_v47  ;;  %v2812_v57 = vadd.f32 %v8271_v49, %v2698_v52  ;;  %v4714_v53 = vld [vmem:[%s8170_s3 + $0x340] sm:$0xff]  ;;  %v7557_v49 = vld [vmem:[#allocation3 + $0xfa] sm:$0xff] }
 0x49c   : > { %v3266_v55 = vadd.f32 %v7321_v58, %v3152_v19  ;;  %3596 = vmatmul.f32.gmra.mxu1 %v7206_v41  ;;  %3825 = vmatmul.f32.gmra.mxu3 %v7025_v43  ;;  %v3039_v43 = vadd.f32 %v7316_v24, %v2924_v9  ;;  %v4715_v24 = vld [vmem:[%s8170_s3 + $0x348] sm:$0xff]  ;;  %v8270_v19 = vld [vmem:[#allocation6_spill] sm:$0xff] }
 0x49d   : > { %3718 = vmatmul.f32.gmra.mxu2 %v7443_v51  ;;  %4033 = vmatpush.msra.mxu1 %v4715_v24  ;;  %v2452_v45 = vadd.f32 %v8270_v19, %v8269_v1  ;;  %v7518_v9 = vld [vmem:[%s8170_s3 + $0x3c8] sm:$0xff] }
 0x49e   : > { %v3301_v33 = vadd.f32 %v7329_v13, %v3266_v55  ;;  %4796 = vmatpush.msra.mxu2 %v7518_v9 }
 0x49f   : > { %v7452_v58 = vpop.f32.mrf.mxu0  ;;  %v7454_v18 = vpop.f32.mrf.mxu3  ;;  %4034 = vmatpush.msra.mxu1 %v4714_v53 }
 0x4a0   : > { %8263 = vst [vmem:[#allocation65_spill] sm:$0xff] %v7454_v18  ;;  %v3317_v63 = vadd.f32 %v3301_v33, %v3282_v22  ;;  %v7457_v60 = vpop.f32.mrf.mxu2  ;;  %v4698_v22 = vld [vmem:[%s8170_s3 + $0x2c0] sm:$0xff]  ;;  %v7523_v33 = vld [vmem:[%s8170_s3 + $0x448] sm:$0xff] }
 0x4a1   : > { %v3111_v27 = vpop.f32.mrf.mxu1  ;;  %3920 = vmatpush.msra.mxu0 %v4698_v22  ;;  %4812 = vmatpush.msra.mxu3 %v7523_v33  ;;  %v8281_v22 = vld [vmem:[#allocation26_spill] sm:$0xff] }
 0x4a2   : > { %3333 = vst.msk [vmem:[%s7366_s29 + $0x10] sm:$0xff] %vm225_vm0, %v3317_v63  ;;  %v3153_v8 = vadd.f32 %v3111_v27, %v3039_v43  ;;  %3511 = vmatmul.f32.gmra.mxu0 %v7401_v21  ;;  %v8272_v43 = vld [vmem:[#allocation24_spill] sm:$0xff] }
 0x4a3   : > { %v2585_v63 = vadd.f32 %v8272_v43, %v2452_v45  ;;  %v4697_v45 = vld [vmem:[%s8170_s3 + $0x2b8] sm:$0xff] }
 0x4a4   : > { %v3267_v34 = vadd.f32 %v7373_v5, %v3153_v8  ;;  %3599 = vmatmul.f32.gmra.mxu1 %v7223_v48  ;;  %3828 = vmatmul.f32.gmra.mxu3 %v8264_v6  ;;  %v3284_v8 = vld [vmem:[%s5035_s25 + $0x20] sm:$0xff] }
 0x4a5   : > { %3721 = vmatmul.f32.gmra.mxu2 %v7485_v3  ;;  %v2699_v24 = vadd.f32 %v8275_v20, %v2585_v63  ;;  %3921 = vmatpush.msra.mxu0 %v4697_v45  ;;  %v8282_v63 = vld [vmem:[#allocation41_spill] sm:$0xff] }
 0x4a6   : > { %v3302_v62 = vadd.f32 %v7329_v13, %v3267_v34  ;;  %v2926_v34 = vadd.f32 %v8276_v30, %v2812_v57  ;;  %v7562_v57 = vld [vmem:[%s8170_s3 + $0x3c0] sm:$0xff] }
 0x4a7   : > { %v7494_v5 = vpop.f32.mrf.mxu0  ;;  %v7496_v37 = vpop.f32.mrf.mxu3  ;;  %4797 = vmatpush.msra.mxu2 %v7562_v57 }
 0x4a8   : > { %8268 = vst [vmem:[#allocation30_spill] sm:$0xff] %v7496_v37  ;;  %v3318_v16 = vadd.f32 %v3302_v62, %v3283_v7  ;;  %v7499_v44 = vpop.f32.mrf.mxu2  ;;  %v3041_v61 = vadd.f32 %v7410_v38, %v2926_v34  ;;  %v8278_v62 = vld [vmem:[#allocation5_spill] sm:$0xff]  ;;  %v4713_v38 = vld [vmem:[%s8170_s3 + $0x338] sm:$0xff] }
 0x4a9   : > { %v3114_v23 = vpop.f32.mrf.mxu1  ;;  %4035 = vmatpush.msra.mxu1 %v4713_v38  ;;  %v4696_v38 = vld [vmem:[%s8170_s3 + $0x2b0] sm:$0xff] }
 0x4aa   : > { %3334 = vst.msk [vmem:[%s7366_s29 + $0x18] sm:$0xff] %vm225_vm0, %v3318_v16  ;;  %v3154_v55 = vadd.f32 %v3114_v23, %v3040_v15  ;;  %3514 = vmatmul.f32.gmra.mxu0 %v7443_v51  ;;  %v8279_v15 = vld [vmem:[#allocation8_spill] sm:$0xff]  ;;  %v8280_v23 = vld [vmem:[#allocation22_spill] sm:$0xff] }
 0x4ab   : > { %v2455_v16 = vadd.f32 %v8279_v15, %v8278_v62  ;;  %v2813_v1 = vadd.f32 %v8280_v23, %v2699_v24  ;;  %v8285_v24 = vld [vmem:[#allocation27_spill] sm:$0xff]  ;;  %3922 = vmatpush.msra.mxu0 %v4696_v38 }
 0x4ac   : > { %v3268_v27 = vadd.f32 %v7415_v26, %v3154_v55  ;;  %3602 = vmatmul.f32.gmra.mxu1 %v7513_v35  ;;  %3831 = vmatmul.f32.gmra.mxu3 %v8273_v4  ;;  %v7567_v55 = vld [vmem:[%s8170_s3 + $0x440] sm:$0xff]  ;;  %v3285_v4 = vld [vmem:[%s5035_s25 + $0x28] sm:$0xff]  ;;  %v8287_v15 = vld [vmem:[#allocation7_spill] sm:$0xff] }
 0x4ad   : > { %3724 = vmatmul.f32.gmra.mxu2 %v7529_v54  ;;  %v2586_v53 = vadd.f32 %v8281_v22, %v2455_v16  ;;  %4813 = vmatpush.msra.mxu3 %v7567_v55  ;;  %v2927_v30 = vadd.f32 %v8285_v24, %v2813_v1  ;;  %v8288_v16 = vld [vmem:[#allocation10_spill] sm:$0xff]  ;;  %v7601_v22 = vld [vmem:[#allocation3 + $0x10a] sm:$0xff] }
 0x4ae   : > { %v3303_v6 = vadd.f32 %v7329_v13, %v3268_v27  ;;  %v7573_v27 = vld [vmem:[#allocation3 + $0x138] sm:$0xff]  ;;  %v2458_v23 = vadd.f32 %v8288_v16, %v8287_v15  ;;  %v7617_v24 = vld [vmem:[#allocation3 + $0x140] sm:$0xff] }
 0x4af   : > { %v7538_v26 = vpop.f32.mrf.mxu0  ;;  %v7540_v7 = vpop.f32.mrf.mxu3  ;;  %8283 = vst [vmem:[#allocation6_spill] sm:$0xff] %v7573_v27 }
 0x4b0   : > { %8277 = vst [vmem:[#allocation4_spill] sm:$0xff] %v7540_v7  ;;  %v3319_v52 = vadd.f32 %v3303_v6, %v3284_v8  ;;  %v7543_v59 = vpop.f32.mrf.mxu2  ;;  %v8284_v8 = vld [vmem:[#allocation40_spill] sm:$0xff] }
 0x4b1   : > { %v3117_v47 = vpop.f32.mrf.mxu1  ;;  %v2700_v20 = vadd.f32 %v8284_v8, %v2586_v53  ;;  %v7606_v53 = vld [vmem:[%s8170_s3 + $0x3b8] sm:$0xff]  ;;  %8292 = vst [vmem:[#allocation24_spill] sm:$0xff] %v7617_v24 }
 0x4b2   : > { %3335 = vst.msk [vmem:[%s7366_s29 + $0x20] sm:$0xff] %vm225_vm0, %v3319_v52  ;;  %v3155_v19 = vadd.f32 %v3117_v47, %v3041_v61  ;;  %3517 = vmatmul.f32.gmra.mxu0 %v7485_v3  ;;  %v3042_v61 = vadd.f32 %v7452_v58, %v2927_v30  ;;  %v4712_v58 = vld [vmem:[%s8170_s3 + $0x330] sm:$0xff]  ;;  %4798 = vmatpush.msra.mxu2 %v7606_v53  ;;  %v8317_v3 = vld [vmem:[#allocation39_spill] sm:$0xff] }
 0x4b3   : > { %4036 = vmatpush.msra.mxu1 %v4712_v58  ;;  %v3286_v30 = vld [vmem:[%s5035_s25 + $0x30] sm:$0xff]  ;;  %v8296_v58 = vld [vmem:[#allocation9_spill] sm:$0xff] }
 0x4b4   : > { %v3269_v43 = vadd.f32 %v7457_v60, %v3155_v19  ;;  %3605 = vmatmul.f32.gmra.mxu1 %v7557_v49  ;;  %3834 = vmatmul.f32.gmra.mxu3 %v8282_v63  ;;  %v8289_v19 = vld [vmem:[#allocation25_spill] sm:$0xff] }
 0x4b5   : > { %3727 = vmatmul.f32.gmra.mxu2 %v7573_v27  ;;  %v2814_v45 = vadd.f32 %v8289_v19, %v2700_v20  ;;  %v8290_v63 = vld [vmem:[#allocation29_spill] sm:$0xff]  ;;  %v8291_v20 = vld [vmem:[#allocation46_spill] sm:$0xff] }
 0x4b6   : > { %v3304_v34 = vadd.f32 %v7329_v13, %v3269_v43  ;;  %v7611_v43 = vld [vmem:[%s8170_s3 + $0x438] sm:$0xff] }
 0x4b7   : > { %v7582_v60 = vpop.f32.mrf.mxu0  ;;  %v7584_v6 = vpop.f32.mrf.mxu3  ;;  %4814 = vmatpush.msra.mxu3 %v7611_v43 }
 0x4b8   : > { %8286 = vst [vmem:[#allocation20_spill] sm:$0xff] %v7584_v6  ;;  %v3320_v52 = vadd.f32 %v3304_v34, %v3285_v4  ;;  %v7587_v47 = vpop.f32.mrf.mxu2  ;;  %v2587_v4 = vadd.f32 %v8290_v63, %v2458_v23  ;;  %v8293_v34 = vld [vmem:[#allocation44_spill] sm:$0xff]  ;;  %v8305_v6 = vld [vmem:[#allocation11_spill] sm:$0xff] }
 0x4b9   : > { %v3120_v62 = vpop.f32.mrf.mxu1  ;;  %v8297_v63 = vld [vmem:[#allocation12_spill] sm:$0xff] }
 0x4ba   : > { %3336 = vst.msk [vmem:[%s7366_s29 + $0x28] sm:$0xff] %vm225_vm0, %v3320_v52  ;;  %v3156_v1 = vadd.f32 %v3120_v62, %v3042_v61  ;;  %3520 = vmatmul.f32.gmra.mxu0 %v7529_v54  ;;  %v2701_v61 = vadd.f32 %v8293_v34, %v2587_v4  ;;  %v8294_v52 = vld [vmem:[#allocation31_spill] sm:$0xff]  ;;  %v8298_v4 = vld [vmem:[#allocation28_spill] sm:$0xff]  ;;  %v8306_v54 = vld [vmem:[#allocation14_spill] sm:$0xff] }
 0x4bb   : > { %v2928_v62 = vadd.f32 %v8294_v52, %v2814_v45  ;;  %v7655_v52 = vld [vmem:[%s8170_s3 + $0x430] sm:$0xff]  ;;  %v2464_v7 = vadd.f32 %v8306_v54, %v8305_v6  ;;  %v7694_v54 = vld [vmem:[%s8170_s3 + $0x3a8] sm:$0xff] }
 0x4bc   : > { %v3270_v8 = vadd.f32 %v7499_v44, %v3156_v1  ;;  %3608 = vmatmul.f32.gmra.mxu1 %v7601_v22  ;;  %3837 = vmatmul.f32.gmra.mxu3 %v8291_v20  ;;  %v2461_v20 = vadd.f32 %v8297_v63, %v8296_v58  ;;  %v2815_v34 = vadd.f32 %v8298_v4, %v2701_v61  ;;  %v7650_v61 = vld [vmem:[%s8170_s3 + $0x3b0] sm:$0xff]  ;;  %v3287_v58 = vld [vmem:[%s5035_s25 + $0x38] sm:$0xff]  ;;  %v8302_v63 = vld [vmem:[#allocation49_spill] sm:$0xff] }
 0x4bd   : > { %3730 = vmatmul.f32.gmra.mxu2 %v7617_v24  ;;  %v3043_v23 = vadd.f32 %v7494_v5, %v2928_v62  ;;  %v4711_v5 = vld [vmem:[%s8170_s3 + $0x328] sm:$0xff]  ;;  %v8299_v62 = vld [vmem:[#allocation34_spill] sm:$0xff]  ;;  %4815 = vmatpush.msra.mxu3 %v7655_v52 }
 0x4be   : > { %v3305_v15 = vadd.f32 %v7329_v13, %v3270_v8  ;;  %v4695_v8 = vld [vmem:[%s8170_s3 + $0x2a8] sm:$0xff]  ;;  %4037 = vmatpush.msra.mxu1 %v4711_v5  ;;  %4799 = vmatpush.msra.mxu2 %v7650_v61  ;;  %v8309_v6 = vld [vmem:[#allocation38_spill] sm:$0xff] }
 0x4bf   : > { %v7626_v44 = vpop.f32.mrf.mxu0  ;;  %v7628_v16 = vpop.f32.mrf.mxu3  ;;  %3923 = vmatpush.msra.mxu0 %v4695_v8  ;;  %v8303_v8 = vld [vmem:[#allocation37_spill] sm:$0xff] }
 0x4c0   : > { %8295 = vst [vmem:[#allocation36_spill] sm:$0xff] %v7628_v16  ;;  %v3321_v19 = vadd.f32 %v3305_v15, %v3286_v30  ;;  %v7631_v1 = vpop.f32.mrf.mxu2  ;;  %v7645_v30 = vld [vmem:[#allocation3 + $0x112] sm:$0xff]  ;;  %v2588_v15 = vadd.f32 %v8299_v62, %v2461_v20  ;;  %v2929_v5 = vadd.f32 %v8303_v8, %v2815_v34  ;;  %4800 = vmatpush.msra.mxu2 %v7694_v54 }
 0x4c1   : > { %v3123_v38 = vpop.f32.mrf.mxu1 }
 0x4c2   : > { %3337 = vst.msk [vmem:[%s7366_s29 + $0x30] sm:$0xff] %vm225_vm0, %v3321_v19  ;;  %v3157_v45 = vadd.f32 %v3123_v38, %v3043_v23  ;;  %3523 = vmatmul.f32.gmra.mxu0 %v7573_v27  ;;  %v8300_v19 = vld [vmem:[#allocation50_spill] sm:$0xff]  ;;  %v7661_v38 = vld [vmem:[#allocation3 + $0x150] sm:$0xff]  ;;  %v2702_v4 = vadd.f32 %v8302_v63, %v2588_v15  ;;  %v3044_v62 = vadd.f32 %v7538_v26, %v2929_v5  ;;  %v8307_v15 = vld [vmem:[#allocation33_spill] sm:$0xff] }
 0x4c3   : > { %8301 = vst [vmem:[#allocation35_spill] sm:$0xff] %v7661_v38  ;;  %v4710_v26 = vld [vmem:[%s8170_s3 + $0x320] sm:$0xff]  ;;  %v8310_v5 = vld [vmem:[#allocation55_spill] sm:$0xff] }
 0x4c4   : > { %v3271_v23 = vadd.f32 %v7543_v59, %v3157_v45  ;;  %3611 = vmatmul.f32.gmra.mxu1 %v7645_v30  ;;  %3840 = vmatmul.f32.gmra.mxu3 %v8300_v19  ;;  %v2816_v63 = vadd.f32 %v8307_v15, %v2702_v4  ;;  %v2589_v4 = vadd.f32 %v8309_v6, %v2464_v7  ;;  %v7716_v7 = vld [vmem:[%s8170_s3 + $0x3a0] sm:$0xff] }
 0x4c5   : > { %3733 = vmatmul.f32.gmra.mxu2 %v7661_v38  ;;  %4038 = vmatpush.msra.mxu1 %v4710_v26 }
 0x4c6   : > { %v3306_v20 = vadd.f32 %v7329_v13, %v3271_v23  ;;  %v4694_v23 = vld [vmem:[%s8170_s3 + $0x2a0] sm:$0xff]  ;;  %4801 = vmatpush.msra.mxu2 %v7716_v7 }
 0x4c7   : > { %v7670_v59 = vpop.f32.mrf.mxu0  ;;  %v7672_v45 = vpop.f32.mrf.mxu3  ;;  %3924 = vmatpush.msra.mxu0 %v4694_v23 }
 0x4c8   : > { %8304 = vst [vmem:[#allocation23_spill] sm:$0xff] %v7672_v45  ;;  %v3322_v19 = vadd.f32 %v3306_v20, %v3287_v58  ;;  %v7675_v16 = vpop.f32.mrf.mxu2  ;;  %v7689_v58 = vld [vmem:[#allocation3 + $0x122] sm:$0xff]  ;;  %v7705_v20 = vld [vmem:[#allocation3 + $0x158] sm:$0xff] }
 0x4c9   : > { %v3126_v27 = vpop.f32.mrf.mxu1  ;;  %8308 = vst [vmem:[#allocation5_spill] sm:$0xff] %v7689_v58  ;;  %v4692_v45 = vld [vmem:[%s8170_s3 + $0x290] sm:$0xff] }
 0x4ca   : > { %3338 = vst.msk [vmem:[%s7366_s29 + $0x38] sm:$0xff] %vm225_vm0, %v3322_v19  ;;  %v3158_v34 = vadd.f32 %v3126_v27, %v3044_v62  ;;  %3526 = vmatmul.f32.gmra.mxu0 %v7617_v24  ;;  %v7699_v27 = vld [vmem:[%s8170_s3 + $0x428] sm:$0xff]  ;;  %v3288_v62 = vld [vmem:[%s5035_s25 + $0x40] sm:$0xff]  ;;  %v4693_v19 = vld [vmem:[%s8170_s3 + $0x298] sm:$0xff] }
 0x4cb   : > { %8311 = vst [vmem:[#allocation8_spill] sm:$0xff] %v7705_v20  ;;  %4816 = vmatpush.msra.mxu3 %v7699_v27  ;;  %3925 = vmatpush.msra.mxu0 %v4693_v19 }
 0x4cc   : > { %v3272_v8 = vadd.f32 %v7587_v47, %v3158_v34  ;;  %3614 = vmatmul.f32.gmra.mxu1 %v7689_v58  ;;  %3843 = vmatmul.f32.gmra.mxu3 %v8310_v5  ;;  %v8312_v47 = vld [vmem:[#allocation53_spill] sm:$0xff]  ;;  %v8313_v34 = vld [vmem:[#allocation42_spill] sm:$0xff] }
 0x4cd   : > { %3736 = vmatmul.f32.gmra.mxu2 %v7705_v20  ;;  %v2703_v15 = vadd.f32 %v8312_v47, %v2589_v4  ;;  %v2930_v23 = vadd.f32 %v8313_v34, %v2816_v63  ;;  %v7732_v4 = vld [vmem:[%s8170_s3 + $0x398] sm:$0xff]  ;;  %3926 = vmatpush.msra.mxu0 %v4692_v45  ;;  %v8315_v34 = vld [vmem:[#allocation13_spill] sm:$0xff]  ;;  %v7750_v45 = vld [vmem:[%s8170_s3 + $0x420] sm:$0xff] }
 0x4ce   : > { %v3307_v26 = vadd.f32 %v7329_v13, %v3272_v8  ;;  %4802 = vmatpush.msra.mxu2 %v7732_v4  ;;  %4817 = vmatpush.msra.mxu3 %v7750_v45 }
 0x4cf   : > { %v7722_v6 = vpop.f32.mrf.mxu0  ;;  %v7724_v5 = vpop.f32.mrf.mxu3  ;;  %v3045_v63 = vadd.f32 %v7582_v60, %v2930_v23  ;;  %v2817_v37 = vadd.f32 %v8317_v3, %v2703_v15  ;;  %v4709_v60 = vld [vmem:[%s8170_s3 + $0x318] sm:$0xff]  ;;  %v7762_v15 = vld [vmem:[%s8170_s3 + $0x390] sm:$0xff] }
 0x4d0   : > { %8314 = vst [vmem:[#allocation22_spill] sm:$0xff] %v7724_v5  ;;  %v3323_v47 = vadd.f32 %v3307_v26, %v3288_v62  ;;  %v7735_v8 = vpop.f32.mrf.mxu2  ;;  %v8316_v5 = vld [vmem:[#allocation16_spill] sm:$0xff]  ;;  %v4691_v62 = vld [vmem:[%s8170_s3 + $0x288] sm:$0xff]  ;;  %4039 = vmatpush.msra.mxu1 %v4709_v60  ;;  %v8319_v23 = vld [vmem:[#allocation43_spill] sm:$0xff]  ;;  %4803 = vmatpush.msra.mxu2 %v7762_v15 }
 0x4d1   : > { %v3129_v19 = vpop.f32.mrf.mxu1  ;;  %v2467_v24 = vadd.f32 %v8316_v5, %v8315_v34  ;;  %v7756_v3 = vld [vmem:[#allocation3 + $0x12a] sm:$0xff]  ;;  %v3289_v34 = vld [vmem:[%s5035_s25 + $0x48] sm:$0xff]  ;;  %3927 = vmatpush.msra.mxu0 %v4691_v62 }
 0x4d2   : > { %3339 = vst.msk [vmem:[%s7366_s29 + $0x40] sm:$0xff] %vm225_vm0, %v3323_v47  ;;  %v3159_v51 = vadd.f32 %v3129_v19, %v3045_v63  ;;  %3529 = vmatmul.f32.gmra.mxu0 %v7661_v38  ;;  %v8320_v63 = vld [vmem:[#allocation58_spill] sm:$0xff]  ;;  %v7768_v47 = vld [vmem:[#allocation3 + $0x168] sm:$0xff]  ;;  %v4690_v19 = vld [vmem:[%s8170_s3 + $0x280] sm:$0xff] }
 0x4d3   : > { %8318 = vst [vmem:[#allocation26_spill] sm:$0xff] %v7756_v3  ;;  %v2590_v26 = vadd.f32 %v8319_v23, %v2467_v24  ;;  %v7778_v24 = vld [vmem:[%s8170_s3 + $0x388] sm:$0xff]  ;;  %v8322_v60 = vld [vmem:[#allocation48_spill] sm:$0xff]  ;;  %3928 = vmatpush.msra.mxu0 %v4690_v19 }
 0x4d4   : > { %v3273_v5 = vadd.f32 %v7631_v1, %v3159_v51  ;;  %3617 = vmatmul.f32.gmra.mxu1 %v7756_v3  ;;  %3846 = vmatmul.f32.gmra.mxu3 %v8320_v63  ;;  %v8321_v51 = vld [vmem:[#allocation57_spill] sm:$0xff]  ;;  %v2931_v23 = vadd.f32 %v8322_v60, %v2817_v37  ;;  %v7791_v62 = vld [vmem:[%s8170_s3 + $0x380] sm:$0xff]  ;;  %v8325_v60 = vld [vmem:[#allocation18_spill] sm:$0xff] }
 0x4d5   : > { %3739 = vmatmul.f32.gmra.mxu2 %v7768_v47  ;;  %v2704_v1 = vadd.f32 %v8321_v51, %v2590_v26  ;;  %4140 = vmatpush.msrb.mxu0 %v7261_v36  ;;  %v7810_v36 = vld [vmem:[%s8170_s3 + $0x418] sm:$0xff] }
 0x4d6   : > { %v3308_v63 = vadd.f32 %v7329_v13, %v3273_v5  ;;  %v3046_v18 = vadd.f32 %v7626_v44, %v2931_v23  ;;  %4804 = vmatpush.msra.mxu2 %v7778_v24  ;;  %v8324_v5 = vld [vmem:[#allocation15_spill] sm:$0xff]  ;;  %v4708_v44 = vld [vmem:[%s8170_s3 + $0x310] sm:$0xff]  ;;  %4818 = vmatpush.msra.mxu3 %v7810_v36 }
 0x4d7   : > { %v7784_v38 = vpop.f32.mrf.mxu0  ;;  %v7786_v3 = vpop.f32.mrf.mxu3  ;;  %v2470_v58 = vadd.f32 %v8325_v60, %v8324_v5  ;;  %4040 = vmatpush.msra.mxu1 %v4708_v44  ;;  %4141 = vmatpush.msrb.mxu0 %v7297_v2  ;;  %v8331_v60 = vld [vmem:[#allocation54_spill] sm:$0xff] }
 0x4d8   : > { %8323 = vst [vmem:[#allocation41_spill] sm:$0xff] %v7786_v3  ;;  %v3324_v26 = vadd.f32 %v3308_v63, %v3289_v34  ;;  %v7794_v51 = vpop.f32.mrf.mxu2  ;;  %v8326_v3 = vld [vmem:[#allocation45_spill] sm:$0xff]  ;;  %4805 = vmatpush.msra.mxu2 %v7791_v62  ;;  %v7822_v63 = vld [vmem:[#allocation3 + $0x170] sm:$0xff]  ;;  %v7841_v2 = vld [vmem:[%s8170_s3 + $0x410] sm:$0xff] }
 0x4d9   : > { %v3132_v37 = vpop.f32.mrf.mxu1  ;;  %v2818_v19 = vadd.f32 %v8326_v3, %v2704_v1  ;;  %v7813_v34 = vld [vmem:[#allocation3 + $0x13a] sm:$0xff]  ;;  %4142 = vmatpush.msrb.mxu0 %v7341_v17  ;;  %4819 = vmatpush.msra.mxu3 %v7841_v2 }
 0x4da   : > { %3340 = vst.msk [vmem:[%s7366_s29 + $0x48] sm:$0xff] %vm225_vm0, %v3324_v26  ;;  %v3160_v21 = vadd.f32 %v3132_v37, %v3046_v18  ;;  %3532 = vmatmul.f32.gmra.mxu0 %v7705_v20  ;;  %v7815_v3 = vld [vmem:[#allocation3 + $0x159] sm:$0xff]  ;;  %v8329_v18 = vld [vmem:[#allocation47_spill] sm:$0xff]  ;;  %v8330_v37 = vld [vmem:[#allocation60_spill] sm:$0xff] }
 0x4db   : > { %8327 = vst [vmem:[#allocation40_spill] sm:$0xff] %v7813_v34  ;;  %v2591_v1 = vadd.f32 %v8329_v18, %v2470_v58  ;;  %v3290_v26 = vld [vmem:[%s5035_s25 + $0x50] sm:$0xff]  ;;  %v2932_v44 = vadd.f32 %v8331_v60, %v2818_v19  ;;  %4143 = vmatpush.msrb.mxu0 %v7390_v39  ;;  %v8333_v19 = vld [vmem:[#allocation17_spill] sm:$0xff]  ;;  %v7856_v39 = vld [vmem:[#allocation3 + $0x169] sm:$0xff] }
 0x4dc   : > { %8328 = vst [vmem:[#allocation27_spill] sm:$0xff] %v7815_v3  ;;  %v3274_v23 = vadd.f32 %v7675_v16, %v3160_v21  ;;  %3620 = vmatmul.f32.gmra.mxu1 %v7813_v34  ;;  %3849 = vmatmul.f32.gmra.mxu3 %v7815_v3 }
 0x4dd   : > { %3742 = vmatmul.f32.gmra.mxu2 %v7822_v63  ;;  %v2705_v5 = vadd.f32 %v8330_v37, %v2591_v1  ;;  %v3047_v16 = vadd.f32 %v7670_v59, %v2932_v44  ;;  %v8334_v1 = vld [vmem:[#allocation19_spill] sm:$0xff]  ;;  %v4707_v59 = vld [vmem:[%s8170_s3 + $0x308] sm:$0xff]  ;;  %4144 = vmatpush.msrb.mxu0 %v7432_v28  ;;  %v7876_v28 = vld [vmem:[%s8170_s3 + $0x400] sm:$0xff] }
 0x4de   : > { %v3309_v58 = vadd.f32 %v7329_v13, %v3274_v23  ;;  %v2473_v23 = vadd.f32 %v8334_v1, %v8333_v19  ;;  %v8335_v37 = vld [vmem:[#allocation51_spill] sm:$0xff]  ;;  %4041 = vmatpush.msra.mxu1 %v4707_v59  ;;  %v8338_v19 = vld [vmem:[#allocation62_spill] sm:$0xff] }
 0x4df   : > { %v7830_v18 = vpop.f32.mrf.mxu0  ;;  %v7832_v21 = vpop.f32.mrf.mxu3  ;;  %v2819_v60 = vadd.f32 %v8335_v37, %v2705_v5  ;;  %v7861_v5 = vld [vmem:[%s8170_s3 + $0x408] sm:$0xff]  ;;  %4145 = vmatpush.msrb.mxu0 %v7474_v25 }
 0x4e0   : > { %8332 = vst [vmem:[#allocation7_spill] sm:$0xff] %v7832_v21  ;;  %v3325_v20 = vadd.f32 %v3309_v58, %v3290_v26  ;;  %v7836_v3 = vpop.f32.mrf.mxu2  ;;  %v7854_v26 = vld [vmem:[#allocation3 + $0x142] sm:$0xff]  ;;  %4820 = vmatpush.msra.mxu3 %v7861_v5 }
 0x4e1   : > { %v3135_v34 = vpop.f32.mrf.mxu1  ;;  %v7868_v58 = vld [vmem:[#allocation3 + $0x180] sm:$0xff]  ;;  %4146 = vmatpush.msrb.mxu0 %v7518_v9 }
 0x4e2   : > { %3341 = vst.msk [vmem:[%s7366_s29 + $0x50] sm:$0xff] %vm225_vm0, %v3325_v20  ;;  %v3161_v17 = vadd.f32 %v3135_v34, %v3047_v16  ;;  %3535 = vmatmul.f32.gmra.mxu0 %v7768_v47  ;;  %v8336_v20 = vld [vmem:[#allocation52_spill] sm:$0xff]  ;;  %v3291_v16 = vld [vmem:[%s5035_s25 + $0x58] sm:$0xff]  ;;  %4821 = vmatpush.msra.mxu3 %v7876_v28 }
 0x4e3   : > { %v2592_v34 = vadd.f32 %v8336_v20, %v2473_v23  ;;  %8337 = vst [vmem:[#allocation10_spill] sm:$0xff] %v7868_v58  ;;  %4147 = vmatpush.msrb.mxu0 %v7562_v57 }
 0x4e4   : > { %v3275_v44 = vadd.f32 %v7735_v8, %v3161_v17  ;;  %3623 = vmatmul.f32.gmra.mxu1 %v7854_v26  ;;  %3852 = vmatmul.f32.gmra.mxu3 %v7856_v39  ;;  %v8339_v8 = vld [vmem:[#allocation59_spill] sm:$0xff] }
 0x4e5   : > { %3745 = vmatmul.f32.gmra.mxu2 %v7868_v58  ;;  %v2706_v1 = vadd.f32 %v8338_v19, %v2592_v34  ;;  %v2933_v23 = vadd.f32 %v8339_v8, %v2819_v60  ;;  %v8340_v60 = vld [vmem:[#allocation56_spill] sm:$0xff]  ;;  %4148 = vmatpush.msrb.mxu0 %v7606_v53  ;;  %v7925_v53 = vld [vmem:[#allocation3 + $0x15a] sm:$0xff] }
 0x4e6   : > { %v3310_v37 = vadd.f32 %v7329_v13, %v3275_v44  ;;  %v4706_v44 = vld [vmem:[%s8170_s3 + $0x300] sm:$0xff] }
 0x4e7   : > { %v7882_v17 = vpop.f32.mrf.mxu0  ;;  %v7884_v59 = vpop.f32.mrf.mxu3  ;;  %v3048_v20 = vadd.f32 %v7722_v6, %v2933_v23  ;;  %v2820_v19 = vadd.f32 %v8340_v60, %v2706_v1  ;;  %v7898_v8 = vld [vmem:[#allocation3 + $0x152] sm:$0xff]  ;;  %4042 = vmatpush.msra.mxu1 %v4706_v44  ;;  %4149 = vmatpush.msrb.mxu0 %v7650_v61 }
 0x4e8   : > { %v3326_v58 = vadd.f32 %v3310_v37, %v3291_v16  ;;  %v7888_v21 = vpop.f32.mrf.mxu2  ;;  %v7900_v6 = vld [vmem:[#allocation3 + $0x171] sm:$0xff] }
 0x4e9   : > { %v3138_v34 = vpop.f32.mrf.mxu1  ;;  %v3292_v16 = vld [vmem:[%s5035_s25 + $0x60] sm:$0xff]  ;;  %4253 = vmatpush.msrb.mxu1 %v7266_v50  ;;  %v8341_v1 = vld [vmem:[#allocation61_spill] sm:$0xff]  ;;  %4150 = vmatpush.msrb.mxu0 %v7694_v54  ;;  %v3050_v54 = vadd.f32 %v7830_v18, %v7278_v42 }
 0x4ea   : > { %3342 = vst.msk [vmem:[%s7366_s29 + $0x58] sm:$0xff] %vm225_vm0, %v3326_v58  ;;  %v3162_v25 = vadd.f32 %v3138_v34, %v3048_v20  ;;  %3538 = vmatmul.f32.gmra.mxu0 %v7822_v63  ;;  %v7906_v58 = vld [vmem:[#allocation3 + $0x188] sm:$0xff]  ;;  %v2934_v23 = vadd.f32 %v8341_v1, %v2820_v19  ;;  %v3293_v61 = vld [vmem:[%s5035_s25 + $0x68] sm:$0xff] }
 0x4eb   : > { %4254 = vmatpush.msrb.mxu1 %v7302_v46  ;;  %4151 = vmatpush.msrb.mxu0 %v7716_v7  ;;  %v7950_v7 = vld [vmem:[#allocation3 + $0x16a] sm:$0xff] }
 0x4ec   : > { %v3276_v9 = vadd.f32 %v7794_v51, %v3162_v25  ;;  %3626 = vmatmul.f32.gmra.mxu1 %v7898_v8  ;;  %3855 = vmatmul.f32.gmra.mxu3 %v7900_v6  ;;  %v3049_v20 = vadd.f32 %v7784_v38, %v2934_v23  ;;  %v7927_v25 = vld [vmem:[#allocation3 + $0x181] sm:$0xff] }
 0x4ed   : > { %3748 = vmatmul.f32.gmra.mxu2 %v7906_v58  ;;  %4255 = vmatpush.msrb.mxu1 %v7346_v11  ;;  %v4109_v11 = vld [vmem:[#allocation3 + $0xf9] sm:$0xff] }
 0x4ee   : > { %v3311_v37 = vadd.f32 %v7329_v13, %v3276_v9  ;;  %4152 = vmatpush.msrb.mxu0 %v7732_v4 }
 0x4ef   : > { %v7914_v57 = vpop.f32.mrf.mxu3  ;;  %v7916_v51 = vpop.f32.mrf.mxu0  ;;  %4256 = vmatpush.msrb.mxu1 %v7395_v29 }
 0x4f0   : > { %v3327_v34 = vadd.f32 %v3311_v37, %v3292_v16  ;;  %v3261_v60 = vpop.f32.mrf.mxu2  ;;  %v7952_v16 = vld [vmem:[#allocation3 + $0x189] sm:$0xff]  ;;  %4153 = vmatpush.msrb.mxu0 %v7762_v15  ;;  %v3051_v15 = vadd.f32 %v7882_v17, %v7314_v40  ;;  %v4111_v40 = vld [vmem:[#allocation3 + $0x111] sm:$0xff] }
 0x4f1   : > { %v3141_v50 = vpop.f32.mrf.mxu1  ;;  %4257 = vmatpush.msrb.mxu1 %v7437_v56 }
 0x4f2   : > { %3343 = vst.msk [vmem:[%s7366_s29 + $0x60] sm:$0xff] %vm225_vm0, %v3327_v34  ;;  %v3163_v19 = vadd.f32 %v3141_v50, %v3049_v20  ;;  %3929 = vmatmul.f32.vlgmr.msra.gmra.mxu0 %v7206_v41 }
 0x4f3   : > { %4258 = vmatpush.msrb.mxu1 %v7479_v12  ;;  %v4110_v12 = vld [vmem:[#allocation3 + $0x109] sm:$0xff]  ;;  %4154 = vmatpush.msrb.mxu0 %v7778_v24  ;;  %v7973_v24 = vld [vmem:[#allocation3 + $0x172] sm:$0xff] }
 0x4f4   : > { %v3277_v46 = vadd.f32 %v7836_v3, %v3163_v19  ;;  %3629 = vmatmul.f32.gmra.mxu1 %v7925_v53  ;;  %3858 = vmatmul.f32.gmra.mxu3 %v7927_v25 }
 0x4f5   : > { %4159 = vmatmul.f32.vlgmr.msra.gmra.mxu2 %v4109_v11  ;;  %4259 = vmatpush.msrb.mxu1 %v7523_v33  ;;  %v3294_v33 = vld [vmem:[%s5035_s25 + $0x70] sm:$0xff] }
 0x4f6   : > { %v3312_v41 = vadd.f32 %v7329_v13, %v3277_v46  ;;  %4155 = vmatpush.msrb.mxu0 %v7791_v62  ;;  %v3295_v62 = vld [vmem:[%s5035_s25 + $0x78] sm:$0xff] }
 0x4f7   : > { %v7938_v38 = vpop.f32.mrf.mxu3  ;;  %v7940_v29 = vpop.f32.mrf.mxu0  ;;  %4260 = vmatpush.msrb.mxu1 %v7567_v55 }
 0x4f8   : > { %v3328_v3 = vadd.f32 %v3312_v41, %v3293_v61  ;;  %v3704_v44 = vpop.f32.mrf.mxu2 }
 0x4f9   : > { %v3144_v9 = vpop.f32.mrf.mxu1  ;;  %4261 = vmatpush.msrb.mxu1 %v7611_v43 }
 0x4fa   : > { %3344 = vst.msk [vmem:[%s7366_s29 + $0x68] sm:$0xff] %vm225_vm0, %v3328_v3  ;;  %v3164_v56 = vadd.f32 %v3144_v9, %v3050_v54  ;;  %3932 = vmatmul.f32.gmra.mxu0 %v7223_v48  ;;  %v8343_v3 = vld [vmem:[#allocation5_spill] sm:$0xff] }
 0x4fb   : > { %4262 = vmatpush.msrb.mxu1 %v7655_v52 }
 0x4fc   : > { %v3278_v42 = vadd.f32 %v7888_v21, %v3164_v56  ;;  %3632 = vmatmul.f32.gmra.mxu1 %v7950_v7  ;;  %3861 = vmatmul.f32.gmra.mxu3 %v7952_v16 }
 0x4fd   : > { %4162 = vmatmul.f32.gmra.mxu2 %v4110_v12  ;;  %4263 = vmatpush.msrb.mxu1 %v7699_v27 }
 0x4fe   : > { %v3313_v48 = vadd.f32 %v7329_v13, %v3278_v42  ;;  %v8344_v42 = vld [vmem:[#allocation65_spill] sm:$0xff] }
 0x4ff   : > { %v7963_v4 = vpop.f32.mrf.mxu3  ;;  %v3500_v55 = vpop.f32.mrf.mxu0  ;;  %4264 = vmatpush.msrb.mxu1 %v7750_v45 }
 0x500   : > { %v3329_v18 = vadd.f32 %v3313_v48, %v3294_v33  ;;  %v3707_v21 = vpop.f32.mrf.mxu2  ;;  %v3501_v61 = vadd.f32 %v3500_v55, %v7412_v31 }
 0x501   : > { %v3147_v1 = vpop.f32.mrf.mxu1  ;;  %4265 = vmatpush.msrb.mxu1 %v7810_v36  ;;  %v4112_v36 = vld [vmem:[#allocation3 + $0x121] sm:$0xff] }
 0x502   : > { %3345 = vst.msk [vmem:[%s7366_s29 + $0x70] sm:$0xff] %vm225_vm0, %v3329_v18  ;;  %v3165_v43 = vadd.f32 %v3147_v1, %v3051_v15  ;;  %3935 = vmatmul.f32.gmra.mxu0 %v7513_v35  ;;  %v3495_v35 = vadd.f32 %v7916_v51, %v7318_v10  ;;  %v8346_v15 = vld [vmem:[#allocation26_spill] sm:$0xff] }
 0x503   : > { %4266 = vmatpush.msrb.mxu1 %v7841_v2  ;;  %v4115_v18 = vld [vmem:[#allocation3 + $0x141] sm:$0xff] }
 0x504   : > { %v3279_v52 = vadd.f32 %v3261_v60, %v3165_v43  ;;  %3635 = vmatmul.f32.gmra.mxu1 %v7973_v24  ;;  %4272 = vmatmul.f32.vlgmr.msra.gmra.mxu3 %v7557_v49 }
 0x505   : > { %4165 = vmatmul.f32.gmra.mxu2 %v4111_v40  ;;  %4267 = vmatpush.msrb.mxu1 %v7861_v5  ;;  %v3498_v5 = vadd.f32 %v7940_v29, %v7370_v32 }
 0x506   : > { %v3314_v27 = vadd.f32 %v7329_v13, %v3279_v52  ;;  %v8347_v52 = vld [vmem:[#allocation30_spill] sm:$0xff] }
 0x507   : > { %v3503_v17 = vpop.f32.mrf.mxu0  ;;  %v3817_v23 = vpop.f32.mrf.mxu3  ;;  %4268 = vmatpush.msrb.mxu1 %v7876_v28 }
 0x508   : > { %v3330_v45 = vadd.f32 %v3314_v27, %v3295_v62  ;;  %v3710_v37 = vpop.f32.mrf.mxu2  ;;  %v3504_v12 = vadd.f32 %v3503_v17, %v8344_v42 }
 0x509   : > { %v3591_v20 = vpop.f32.mrf.mxu1 }
 0x50a   : > { %3346 = vst.msk [vmem:[%s7366_s29 + $0x78] sm:$0xff] %vm225_vm0, %v3330_v45  ;;  %v3639_v34 = vadd.f32 %v3591_v20, %v3495_v35  ;;  %3938 = vmatmul.f32.gmra.mxu0 %v7557_v49  ;;  %v8348_v35 = vld [vmem:[#allocation32_spill] sm:$0xff] }
 0x50b   : > { %v8349_v45 = vld [vmem:[#allocation40_spill] sm:$0xff] }
 0x50c   : > { %v3752_v13 = vadd.f32 %v3704_v44, %v3639_v34  ;;  %4043 = vmatmul.f32.vlgmr.msra.gmra.mxu1 %v7307_v14  ;;  %4275 = vmatmul.f32.gmra.mxu3 %v7601_v22  ;;  %v4113_v14 = vld [vmem:[#allocation3 + $0x129] sm:$0xff] }
 0x50d   : > { %4168 = vmatmul.f32.gmra.mxu2 %v4112_v36  ;;  %v8350_v36 = vld [vmem:[#allocation4_spill] sm:$0xff] }
 0x50e   : > { %v7991_v10 = vadd.f32 %v3817_v23, %v3752_v13 }
 0x50f   : > { %v3506_v2 = vpop.f32.mrf.mxu0  ;;  %v3820_v51 = vpop.f32.mrf.mxu3 }
 0x510   : > { %v3713_v60 = vpop.f32.mrf.mxu2  ;;  %v3507_v40 = vadd.f32 %v3506_v2, %v8347_v52 }
 0x511   : > { %v3594_v50 = vpop.f32.mrf.mxu1 }
 0x512   : > { %v3640_v19 = vadd.f32 %v3594_v50, %v3498_v5  ;;  %3941 = vmatmul.f32.gmra.mxu0 %v7601_v22  ;;  %v8342_v22 = vld [vmem:[#allocation63_spill] sm:$0xff] }
 0x514   : > { %v3753_v49 = vadd.f32 %v3707_v21, %v3640_v19  ;;  %4046 = vmatmul.f32.gmra.mxu1 %v7352_v0  ;;  %4278 = vmatmul.f32.gmra.mxu3 %v7645_v30  ;;  %v4114_v0 = vld [vmem:[#allocation3 + $0x139] sm:$0xff] }
 0x515   : > { %4171 = vmatmul.f32.gmra.mxu2 %v4113_v14  ;;  %v8351_v19 = vld [vmem:[#allocation21_spill] sm:$0xff] }
 0x516   : > { %v7998_v28 = vadd.f32 %v3820_v51, %v3753_v49  ;;  %v8352_v49 = vld [vmem:[#allocation27_spill] sm:$0xff] }
 0x517   : > { %v3509_v46 = vpop.f32.mrf.mxu0  ;;  %v3823_v11 = vpop.f32.mrf.mxu3 }
 0x518   : > { %v3716_v41 = vpop.f32.mrf.mxu2  ;;  %v3510_v51 = vadd.f32 %v3509_v46, %v8350_v36 }
 0x519   : > { %v3597_v32 = vpop.f32.mrf.mxu1 }
 0x51a   : > { %v3641_v29 = vadd.f32 %v3597_v32, %v3501_v61  ;;  %3944 = vmatmul.f32.gmra.mxu0 %v7645_v30  ;;  %v8345_v30 = vld [vmem:[#allocation64_spill] sm:$0xff] }
 0x51c   : > { %v3754_v54 = vadd.f32 %v3710_v37, %v3641_v29  ;;  %4049 = vmatmul.f32.gmra.mxu1 %v8342_v22  ;;  %4281 = vmatmul.f32.gmra.mxu3 %v8343_v3  ;;  %v4116_v37 = vld [vmem:[#allocation3 + $0x151] sm:$0xff] }
 0x51d   : > { %4174 = vmatmul.f32.gmra.mxu2 %v4114_v0 }
 0x51e   : > { %v8004_v44 = vadd.f32 %v3823_v11, %v3754_v54 }
 0x51f   : > { %v3512_v9 = vpop.f32.mrf.mxu0  ;;  %v3826_v56 = vpop.f32.mrf.mxu3 }
 0x520   : > { %v3719_v33 = vpop.f32.mrf.mxu2 }
 0x521   : > { %v3600_v31 = vpop.f32.mrf.mxu1 }
 0x522   : > { %v3642_v48 = vadd.f32 %v3600_v31, %v3504_v12  ;;  %3947 = vmatmul.f32.gmra.mxu0 %v8343_v3  ;;  %v8354_v3 = vld [vmem:[#allocation6_spill] sm:$0xff]  ;;  %v8355_v12 = vld [vmem:[#allocation36_spill] sm:$0xff] }
 0x524   : > { %v3755_v55 = vadd.f32 %v3713_v60, %v3642_v48  ;;  %4052 = vmatmul.f32.gmra.mxu1 %v8345_v30  ;;  %4284 = vmatmul.f32.gmra.mxu3 %v8346_v15 }
 0x525   : > { %4177 = vmatmul.f32.gmra.mxu2 %v4115_v18  ;;  %v8357_v18 = vld [vmem:[#allocation23_spill] sm:$0xff] }
 0x526   : > { %v8010_v21 = vadd.f32 %v3826_v56, %v3755_v55 }
 0x527   : > { %v3515_v1 = vpop.f32.mrf.mxu0  ;;  %v3829_v43 = vpop.f32.mrf.mxu3 }
 0x528   : > { %v3722_v62 = vpop.f32.mrf.mxu2 }
 0x529   : > { %v3603_v27 = vpop.f32.mrf.mxu1 }
 0x52a   : > { %v3643_v17 = vadd.f32 %v3603_v27, %v3507_v40  ;;  %3950 = vmatmul.f32.gmra.mxu0 %v8346_v15 }
 0x52c   : > { %v3756_v23 = vadd.f32 %v3716_v41, %v3643_v17  ;;  %4055 = vmatmul.f32.gmra.mxu1 %v8348_v35  ;;  %4287 = vmatmul.f32.gmra.mxu3 %v8349_v45  ;;  %v8353_v41 = vld [vmem:[#allocation20_spill] sm:$0xff] }
 0x52d   : > { %4180 = vmatmul.f32.gmra.mxu2 %v4116_v37  ;;  %v3513_v32 = vadd.f32 %v3512_v9, %v8353_v41 }
 0x52e   : > { %v8016_v20 = vadd.f32 %v3829_v43, %v3756_v23  ;;  %v8359_v23 = vld [vmem:[#allocation22_spill] sm:$0xff] }
 0x52f   : > { %v3518_v34 = vpop.f32.mrf.mxu0  ;;  %v3832_v13 = vpop.f32.mrf.mxu3 }
 0x530   : > { %v3725_v5 = vpop.f32.mrf.mxu2  ;;  %v3519_v43 = vadd.f32 %v3518_v34, %v8357_v18 }
 0x531   : > { %v3606_v2 = vpop.f32.mrf.mxu1 }
 0x532   : > { %v3644_v60 = vadd.f32 %v3606_v2, %v3510_v51  ;;  %3953 = vmatmul.f32.gmra.mxu0 %v8349_v45 }
 0x534   : > { %v3757_v50 = vadd.f32 %v3719_v33, %v3644_v60  ;;  %4058 = vmatmul.f32.gmra.mxu1 %v8351_v19  ;;  %4290 = vmatmul.f32.gmra.mxu3 %v7854_v26  ;;  %v3516_v33 = vadd.f32 %v3515_v1, %v8355_v12 }
 0x535   : > { %4183 = vmatmul.f32.gmra.mxu2 %v8352_v49  ;;  %v4122_v49 = vld [vmem:[#allocation3 + $0x199] sm:$0xff] }
 0x536   : > { %v8023_v14 = vadd.f32 %v3832_v13, %v3757_v50 }
 0x537   : > { %v3521_v11 = vpop.f32.mrf.mxu0  ;;  %v3835_v61 = vpop.f32.mrf.mxu3 }
 0x538   : > { %v3728_v29 = vpop.f32.mrf.mxu2  ;;  %v3522_v35 = vadd.f32 %v3521_v11, %v8359_v23 }
 0x539   : > { %v3609_v46 = vpop.f32.mrf.mxu1 }
 0x53a   : > { %v3645_v54 = vadd.f32 %v3609_v46, %v3513_v32  ;;  %3956 = vmatmul.f32.gmra.mxu0 %v7854_v26  ;;  %v8356_v26 = vld [vmem:[#allocation24_spill] sm:$0xff]  ;;  %v8362_v32 = vld [vmem:[#allocation7_spill] sm:$0xff] }
 0x53c   : > { %v3758_v22 = vadd.f32 %v3722_v62, %v3645_v54  ;;  %4061 = vmatmul.f32.gmra.mxu1 %v8354_v3  ;;  %4293 = vmatmul.f32.gmra.mxu3 %v7898_v8  ;;  %v4123_v3 = vld [vmem:[#allocation3 + $0x1a1] sm:$0xff] }
 0x53d   : > { %4186 = vmatmul.f32.gmra.mxu2 %v7856_v39 }
 0x53e   : > { %v8030_v0 = vadd.f32 %v3835_v61, %v3758_v22 }
 0x53f   : > { %v3524_v56 = vpop.f32.mrf.mxu0  ;;  %v3838_v42 = vpop.f32.mrf.mxu3 }
 0x540   : > { %v3731_v31 = vpop.f32.mrf.mxu2 }
 0x541   : > { %v3612_v9 = vpop.f32.mrf.mxu1 }
 0x542   : > { %v3646_v48 = vadd.f32 %v3612_v9, %v3516_v33  ;;  %3959 = vmatmul.f32.gmra.mxu0 %v7898_v8  ;;  %v8358_v8 = vld [vmem:[#allocation35_spill] sm:$0xff] }
 0x544   : > { %v3759_v55 = vadd.f32 %v3725_v5, %v3646_v48  ;;  %4064 = vmatmul.f32.gmra.mxu1 %v8356_v26  ;;  %4296 = vmatmul.f32.gmra.mxu3 %v7925_v53  ;;  %v8361_v5 = vld [vmem:[#allocation41_spill] sm:$0xff] }
 0x545   : > { %4189 = vmatmul.f32.gmra.mxu2 %v7900_v6  ;;  %v3525_v2 = vadd.f32 %v3524_v56, %v8361_v5  ;;  %v4234_v56 = vld [vmem:[#allocation3 + $0x18a] sm:$0xff]  ;;  %v4235_v48 = vld [vmem:[#allocation3 + $0x19a] sm:$0xff] }
 0x546   : > { %v8037_v30 = vadd.f32 %v3838_v42, %v3759_v55 }
 0x547   : > { %v3527_v39 = vpop.f32.mrf.mxu0  ;;  %v3841_v15 = vpop.f32.mrf.mxu3 }
 0x548   : > { %v3734_v52 = vpop.f32.mrf.mxu2 }
 0x549   : > { %v3615_v1 = vpop.f32.mrf.mxu1 }
 0x54a   : > { %v3647_v40 = vadd.f32 %v3615_v1, %v3519_v43  ;;  %3962 = vmatmul.f32.gmra.mxu0 %v7925_v53  ;;  %v8360_v53 = vld [vmem:[#allocation8_spill] sm:$0xff] }
 0x54c   : > { %v3760_v62 = vadd.f32 %v3728_v29, %v3647_v40  ;;  %4067 = vmatmul.f32.gmra.mxu1 %v8358_v8  ;;  %4299 = vmatmul.f32.gmra.mxu3 %v7950_v7  ;;  %v3528_v29 = vadd.f32 %v3527_v39, %v8362_v32  ;;  %v8363_v39 = vld [vmem:[#allocation10_spill] sm:$0xff] }
 0x54d   : > { %4192 = vmatmul.f32.gmra.mxu2 %v7927_v25 }
 0x54e   : > { %v8044_v27 = vadd.f32 %v3841_v15, %v3760_v62  ;;  %v4236_v62 = vld [vmem:[#allocation3 + $0x1a2] sm:$0xff] }
 0x54f   : > { %v3530_v6 = vpop.f32.mrf.mxu0  ;;  %v3844_v17 = vpop.f32.mrf.mxu3 }
 0x550   : > { %v3737_v45 = vpop.f32.mrf.mxu2  ;;  %v3531_v33 = vadd.f32 %v3530_v6, %v7884_v59  ;;  %v4108_v59 = vld [vmem:[#allocation3 + $0xf1] sm:$0xff] }
 0x551   : > { %v3618_v37 = vpop.f32.mrf.mxu1 }
 0x552   : > { %v3648_v34 = vadd.f32 %v3618_v37, %v3522_v35  ;;  %3965 = vmatmul.f32.gmra.mxu0 %v7950_v7  ;;  %v4233_v7 = vld [vmem:[#allocation3 + $0x182] sm:$0xff] }
 0x554   : > { %v3761_v13 = vadd.f32 %v3731_v31, %v3648_v34  ;;  %4070 = vmatmul.f32.gmra.mxu1 %v8360_v53  ;;  %4302 = vmatmul.f32.gmra.mxu3 %v7973_v24 }
 0x555   : > { %4195 = vmatmul.f32.gmra.mxu2 %v7952_v16 }
 0x556   : > { %v8051_v36 = vadd.f32 %v3844_v17, %v3761_v13  ;;  %v4843_v13 = vld [vmem:[#allocation3] sm:$0xff] }
 0x557   : > { %v3533_v25 = vpop.f32.mrf.mxu0  ;;  %v3847_v51 = vpop.f32.mrf.mxu3 }
 0x558   : > { %v3740_v60 = vpop.f32.mrf.mxu2  ;;  %v3534_v43 = vadd.f32 %v3533_v25, %v7914_v57 }
 0x559   : > { %v3621_v50 = vpop.f32.mrf.mxu1 }
 0x55a   : > { %v3649_v19 = vadd.f32 %v3621_v50, %v3525_v2  ;;  %3968 = vmatmul.f32.gmra.mxu0 %v7973_v24 }
 0x55c   : > { %v3762_v11 = vadd.f32 %v3734_v52, %v3649_v19  ;;  %4073 = vmatmul.f32.gmra.mxu1 %v7768_v47  ;;  %4305 = vmatmul.f32.gmra.mxu3 %v4233_v7 }
 0x55d   : > { %4198 = vmatmul.f32.gmra.mxu2 %v4122_v49 }
 0x55e   : > { %v8056_v61 = vadd.f32 %v3847_v51, %v3762_v11 }
 0x55f   : > { %v3536_v16 = vpop.f32.mrf.mxu0  ;;  %v3850_v41 = vpop.f32.mrf.mxu3 }
 0x560   : > { %v3743_v46 = vpop.f32.mrf.mxu2 }
 0x561   : > { %v3624_v54 = vpop.f32.mrf.mxu1 }
 0x562   : > { %v3650_v22 = vadd.f32 %v3624_v54, %v3528_v29  ;;  %3971 = vmatmul.f32.gmra.mxu0 %v4233_v7 }
 0x564   : > { %v3763_v24 = vadd.f32 %v3737_v45, %v3650_v22  ;;  %4076 = vmatmul.f32.gmra.mxu1 %v7822_v63  ;;  %4308 = vmatmul.f32.gmra.mxu3 %v4234_v56  ;;  %v3537_v45 = vadd.f32 %v3536_v16, %v7938_v38  ;;  %v4221_v16 = vld [vmem:[#allocation3 + $0xf2] sm:$0xff] }
 0x565   : > { %4201 = vmatmul.f32.gmra.mxu2 %v4123_v3 }
 0x566   : > { %v8060_v47 = vadd.f32 %v3850_v41, %v3763_v24  ;;  %v4755_v24 = vld [vmem:[%s5035_s25 + $0x88] sm:$0xff] }
 0x567   : > { %v3539_v42 = vpop.f32.mrf.mxu0  ;;  %v3853_v12 = vpop.f32.mrf.mxu3 }
 0x568   : > { %v3746_v31 = vpop.f32.mrf.mxu2  ;;  %v3540_v5 = vadd.f32 %v3539_v42, %v7963_v4 }
 0x569   : > { %v3627_v9 = vpop.f32.mrf.mxu1 }
 0x56a   : > { %v3651_v55 = vadd.f32 %v3627_v9, %v3531_v33  ;;  %3974 = vmatmul.f32.gmra.mxu0 %v4234_v56 }
 0x56c   : > { %v3764_v26 = vadd.f32 %v3740_v60, %v3651_v55  ;;  %4079 = vmatmul.f32.gmra.mxu1 %v8363_v39  ;;  %4311 = vmatmul.f32.gmra.mxu3 %v4235_v48 }
 0x56e   : > { %v8064_v15 = vadd.f32 %v3853_v12, %v3764_v26 }
 0x56f   : > { %v3856_v63 = vpop.f32.mrf.mxu3  ;;  %v3930_v18 = vpop.f32.mrf.mxu0 }
 0x570   : > { %v3978_v52 = vadd.f32 %v3930_v18, %v7991_v10  ;;  %v3749_v1 = vpop.f32.mrf.mxu2 }
 0x571   : > { %v3630_v40 = vpop.f32.mrf.mxu1 }
 0x572   : > { %v3652_v8 = vadd.f32 %v3630_v40, %v3534_v43  ;;  %4156 = vmatmul.f32.vlgmr.msrb.gmra.mxu0 %v4108_v59 }
 0x574   : > { %v3765_v6 = vadd.f32 %v3743_v46, %v3652_v8  ;;  %4082 = vmatmul.f32.gmra.mxu1 %v7906_v58  ;;  %4314 = vmatmul.f32.gmra.mxu3 %v4236_v62 }
 0x576   : > { %v8069_v17 = vadd.f32 %v3856_v63, %v3765_v6  ;;  %v4756_v63 = vld [vmem:[%s5035_s25 + $0x90] sm:$0xff] }
 0x577   : > { %v3859_v23 = vpop.f32.mrf.mxu3  ;;  %v3933_v35 = vpop.f32.mrf.mxu0 }
 0x578   : > { %v4160_v37 = vpop.f32.mrf.mxu2  ;;  %v3979_v4 = vadd.f32 %v3933_v35, %v7998_v28 }
 0x579   : > { %v3633_v57 = vpop.f32.mrf.mxu1 }
 0x57a   : > { %v3653_v34 = vadd.f32 %v3633_v57, %v3537_v45 }
 0x57c   : > { %v3766_v10 = vadd.f32 %v3746_v31, %v3653_v34  ;;  %4085 = vmatmul.f32.gmra.mxu1 %v4843_v13  ;;  %v8085_v31 = vld [vmem:[%s8171_s4] ss:$0 sm:$0xff] }
 0x57e   : > { %v8072_v53 = vadd.f32 %v3859_v23, %v3766_v10  ;;  %v4757_v23 = vld [vmem:[%s5035_s25 + $0x98] sm:$0xff] }
 0x57f   : > { %v3862_v25 = vpop.f32.mrf.mxu3  ;;  %v3936_v51 = vpop.f32.mrf.mxu0 }
 0x580   : > { %v4163_v2 = vpop.f32.mrf.mxu2  ;;  %v3980_v33 = vadd.f32 %v3936_v51, %v8004_v44 }
 0x581   : > { %v3636_v58 = vpop.f32.mrf.mxu1 }
 0x582   : > { %v3654_v60 = vadd.f32 %v3636_v58, %v3540_v5  ;;  %v4758_v5 = vld [vmem:[%s5035_s25 + $0xa0] sm:$0xff] }
 0x584   : > { %v3767_v50 = vadd.f32 %v3749_v1, %v3654_v60  ;;  %4088 = vmatmul.f32.gmra.mxu1 %v4843_v13 }
 0x586   : > { %v8075_v19 = vadd.f32 %v3862_v25, %v3767_v50 }
 0x587   : > { %v3939_v38 = vpop.f32.mrf.mxu0  ;;  %v4273_v49 = vpop.f32.mrf.mxu3 }
 0x588   : > { %v4166_v41 = vpop.f32.mrf.mxu2  ;;  %v3981_v44 = vadd.f32 %v3939_v38, %v8010_v21 }
 0x589   : > { %v4044_v7 = vpop.f32.mrf.mxu1 }
 0x58a   : > { %v8077_v11 = vadd.f32 %v4044_v7, %v3978_v52 }
 0x58c   : > { %4269 = vmatmul.f32.vlgmr.msrb.gmra.mxu1 %v4221_v16 }
 0x58f   : > { %v3942_v32 = vpop.f32.mrf.mxu0  ;;  %v4276_v29 = vpop.f32.mrf.mxu3 }
 0x590   : > { %v4169_v3 = vpop.f32.mrf.mxu2  ;;  %v3982_v45 = vadd.f32 %v3942_v32, %v8016_v20  ;;  %v4759_v32 = vld [vmem:[%s5035_s25 + $0xa8] sm:$0xff] }
 0x591   : > { %v4047_v46 = vpop.f32.mrf.mxu1 }
 0x592   : > { %v4093_v54 = vadd.f32 %v4047_v46, %v3979_v4 }
 0x594   : > { %v4206_v22 = vadd.f32 %v4160_v37, %v4093_v54 }
 0x596   : > { %v4319_v56 = vadd.f32 %v4273_v49, %v4206_v22 }
 0x597   : > { %v3945_v42 = vpop.f32.mrf.mxu0  ;;  %v4279_v12 = vpop.f32.mrf.mxu3 }
 0x598   : > { %v4352_v9 = vadd.f32 %v8085_v31, %v4319_v56  ;;  %v4172_v18 = vpop.f32.mrf.mxu2 }
 0x599   : > { %v4050_v28 = vpop.f32.mrf.mxu1 }
 0x59a   : > { %v4368_v48 = vadd.f32 %v4755_v24, %v4352_v9  ;;  %v4094_v55 = vadd.f32 %v4050_v28, %v3980_v33 }
 0x59c   : > { %4771 = vst.msk [vmem:[%s7366_s29 + $0x88] sm:$0xff] %vm225_vm0, %v4368_v48  ;;  %v4207_v26 = vadd.f32 %v4163_v2, %v4094_v55  ;;  %v3983_v2 = vadd.f32 %v3945_v42, %v8023_v14 }
 0x59e   : > { %v4320_v39 = vadd.f32 %v4276_v29, %v4207_v26 }
 0x59f   : > { %v4282_v43 = vpop.f32.mrf.mxu3  ;;  %v3948_v1 = vpop.f32.mrf.mxu0 }
 0x5a0   : > { %v4353_v52 = vadd.f32 %v8085_v31, %v4320_v39  ;;  %v4175_v57 = vpop.f32.mrf.mxu2  ;;  %v3984_v4 = vadd.f32 %v3948_v1, %v8030_v0 }
 0x5a1   : > { %v4053_v40 = vpop.f32.mrf.mxu1 }
 0x5a2   : > { %v4369_v59 = vadd.f32 %v4756_v63, %v4353_v52  ;;  %v4095_v62 = vadd.f32 %v4053_v40, %v3981_v44 }
 0x5a4   : > { %4772 = vst.msk [vmem:[%s7366_s29 + $0x90] sm:$0xff] %vm225_vm0, %v4369_v59  ;;  %v4208_v8 = vadd.f32 %v4166_v41, %v4095_v62 }
 0x5a6   : > { %v4321_v6 = vadd.f32 %v4279_v12, %v4208_v8  ;;  %v4760_v12 = vld [vmem:[%s5035_s25 + $0xb0] sm:$0xff] }
 0x5a7   : > { %v4285_v35 = vpop.f32.mrf.mxu3  ;;  %v3951_v10 = vpop.f32.mrf.mxu0 }
 0x5a8   : > { %v4354_v37 = vadd.f32 %v8085_v31, %v4321_v6  ;;  %v4178_v49 = vpop.f32.mrf.mxu2  ;;  %v3985_v9 = vadd.f32 %v3951_v10, %v8037_v30  ;;  %v4762_v6 = vld [vmem:[%s5035_s25 + $0xc0] sm:$0xff] }
 0x5a9   : > { %v4056_v21 = vpop.f32.mrf.mxu1 }
 0x5aa   : > { %v4370_v34 = vadd.f32 %v4757_v23, %v4354_v37  ;;  %v4096_v13 = vadd.f32 %v4056_v21, %v3982_v45 }
 0x5ac   : > { %4773 = vst.msk [vmem:[%s7366_s29 + $0x98] sm:$0xff] %vm225_vm0, %v4370_v34  ;;  %v4209_v25 = vadd.f32 %v4169_v3, %v4096_v13 }
 0x5ae   : > { %v4322_v51 = vadd.f32 %v4282_v43, %v4209_v25  ;;  %v4763_v25 = vld [vmem:[%s5035_s25 + $0xc8] sm:$0xff] }
 0x5af   : > { %v4288_v58 = vpop.f32.mrf.mxu3  ;;  %v3954_v7 = vpop.f32.mrf.mxu0 }
 0x5b0   : > { %v4355_v60 = vadd.f32 %v8085_v31, %v4322_v51  ;;  %v4181_v56 = vpop.f32.mrf.mxu2  ;;  %v3986_v43 = vadd.f32 %v3954_v7, %v8044_v27  ;;  %v4764_v7 = vld [vmem:[%s5035_s25 + $0xd0] sm:$0xff] }
 0x5b1   : > { %v4059_v20 = vpop.f32.mrf.mxu1 }
 0x5b2   : > { %v4371_v50 = vadd.f32 %v4758_v5, %v4355_v60  ;;  %v4097_v38 = vadd.f32 %v4059_v20, %v3983_v2 }
 0x5b4   : > { %4774 = vst.msk [vmem:[%s7366_s29 + $0xa0] sm:$0xff] %vm225_vm0, %v4371_v50  ;;  %v4210_v16 = vadd.f32 %v4172_v18, %v4097_v38  ;;  %v4761_v18 = vld [vmem:[%s5035_s25 + $0xb8] sm:$0xff] }
 0x5b6   : > { %v4323_v41 = vadd.f32 %v4285_v35, %v4210_v16 }
 0x5b7   : > { %v4291_v29 = vpop.f32.mrf.mxu3  ;;  %v3957_v24 = vpop.f32.mrf.mxu0 }
 0x5b8   : > { %v4356_v46 = vadd.f32 %v8085_v31, %v4323_v41  ;;  %v4184_v63 = vpop.f32.mrf.mxu2  ;;  %v3987_v23 = vadd.f32 %v3957_v24, %v8051_v36 }
 0x5b9   : > { %v4062_v14 = vpop.f32.mrf.mxu1 }
 0x5ba   : > { %v4372_v54 = vadd.f32 %v4759_v32, %v4356_v46  ;;  %v4098_v22 = vadd.f32 %v4062_v14, %v3984_v4 }
 0x5bc   : > { %4775 = vst.msk [vmem:[%s7366_s29 + $0xa8] sm:$0xff] %vm225_vm0, %v4372_v54  ;;  %v4211_v3 = vadd.f32 %v4175_v57, %v4098_v22 }
 0x5be   : > { %v4324_v42 = vadd.f32 %v4288_v58, %v4211_v3  ;;  %v4765_v3 = vld [vmem:[%s5035_s25 + $0xd8] sm:$0xff] }
 0x5bf   : > { %v4294_v33 = vpop.f32.mrf.mxu3  ;;  %v3960_v44 = vpop.f32.mrf.mxu0 }
 0x5c0   : > { %v4357_v28 = vadd.f32 %v8085_v31, %v4324_v42  ;;  %v4187_v45 = vpop.f32.mrf.mxu2  ;;  %v3988_v51 = vadd.f32 %v3960_v44, %v8056_v61 }
 0x5c1   : > { %v4065_v0 = vpop.f32.mrf.mxu1 }
 0x5c2   : > { %v4373_v48 = vadd.f32 %v4760_v12, %v4357_v28  ;;  %v4099_v55 = vadd.f32 %v4065_v0, %v3985_v9  ;;  %v4766_v0 = vld [vmem:[%s5035_s25 + $0xe0] sm:$0xff] }
 0x5c4   : > { %4776 = vst.msk [vmem:[%s7366_s29 + $0xb0] sm:$0xff] %vm225_vm0, %v4373_v48  ;;  %v4212_v26 = vadd.f32 %v4178_v49, %v4099_v55 }
 0x5c6   : > { %v4325_v39 = vadd.f32 %v4291_v29, %v4212_v26 }
 0x5c7   : > { %v4297_v1 = vpop.f32.mrf.mxu3  ;;  %v3963_v37 = vpop.f32.mrf.mxu0 }
 0x5c8   : > { %v4358_v52 = vadd.f32 %v8085_v31, %v4325_v39  ;;  %v4190_v60 = vpop.f32.mrf.mxu2  ;;  %v3989_v16 = vadd.f32 %v3963_v37, %v8060_v47 }
 0x5c9   : > { %v4068_v30 = vpop.f32.mrf.mxu1 }
 0x5ca   : > { %v4374_v40 = vadd.f32 %v4761_v18, %v4358_v52  ;;  %v4100_v59 = vadd.f32 %v4068_v30, %v3986_v43  ;;  %v4767_v52 = vld [vmem:[%s5035_s25 + $0xe8] sm:$0xff] }
 0x5cc   : > { %4777 = vst.msk [vmem:[%s7366_s29 + $0xb8] sm:$0xff] %vm225_vm0, %v4374_v40  ;;  %v4213_v62 = vadd.f32 %v4181_v56, %v4100_v59 }
 0x5ce   : > { %v4326_v8 = vadd.f32 %v4294_v33, %v4213_v62 }
 0x5cf   : > { %v4300_v34 = vpop.f32.mrf.mxu3  ;;  %v3966_v20 = vpop.f32.mrf.mxu0 }
 0x5d0   : > { %v4359_v35 = vadd.f32 %v8085_v31, %v4326_v8  ;;  %v4193_v46 = vpop.f32.mrf.mxu2  ;;  %v3990_v56 = vadd.f32 %v3966_v20, %v8064_v15  ;;  %v4754_v20 = vld [vmem:[%s5035_s25 + $0x80] sm:$0xff] }
 0x5d1   : > { %v4071_v27 = vpop.f32.mrf.mxu1 }
 0x5d2   : > { %v4375_v57 = vadd.f32 %v4762_v6, %v4359_v35  ;;  %v4101_v21 = vadd.f32 %v4071_v27, %v3987_v23 }
 0x5d4   : > { %4778 = vst.msk [vmem:[%s7366_s29 + $0xc0] sm:$0xff] %vm225_vm0, %v4375_v57  ;;  %v4214_v10 = vadd.f32 %v4184_v63, %v4101_v21 }
 0x5d6   : > { %v4327_v13 = vadd.f32 %v4297_v1, %v4214_v10 }
 0x5d7   : > { %v4303_v38 = vpop.f32.mrf.mxu3  ;;  %v3969_v14 = vpop.f32.mrf.mxu0 }
 0x5d8   : > { %v4360_v5 = vadd.f32 %v8085_v31, %v4327_v13  ;;  %v4196_v28 = vpop.f32.mrf.mxu2  ;;  %v3991_v48 = vadd.f32 %v3969_v14, %v8069_v17 }
 0x5d9   : > { %v4074_v36 = vpop.f32.mrf.mxu1 }
 0x5da   : > { %v4376_v58 = vadd.f32 %v4763_v25, %v4360_v5  ;;  %v4102_v2 = vadd.f32 %v4074_v36, %v3988_v51  ;;  %v4769_v5 = vld [vmem:[%s5035_s25 + $0xf8] sm:$0xff] }
 0x5dc   : > { %4779 = vst.msk [vmem:[%s7366_s29 + $0xc8] sm:$0xff] %vm225_vm0, %v4376_v58  ;;  %v4215_v50 = vadd.f32 %v4187_v45, %v4102_v2  ;;  %v4768_v45 = vld [vmem:[%s5035_s25 + $0xf0] sm:$0xff] }
 0x5de   : > { %v4328_v49 = vadd.f32 %v4300_v34, %v4215_v50 }
 0x5df   : > { %v4306_v22 = vpop.f32.mrf.mxu3  ;;  %v3972_v55 = vpop.f32.mrf.mxu0 }
 0x5e0   : > { %v4361_v41 = vadd.f32 %v8085_v31, %v4328_v49  ;;  %v4199_v1 = vpop.f32.mrf.mxu2  ;;  %v3992_v30 = vadd.f32 %v3972_v55, %v8072_v53 }
 0x5e1   : > { %v4077_v61 = vpop.f32.mrf.mxu1 }
 0x5e2   : > { %v4377_v32 = vadd.f32 %v4764_v7, %v4361_v41  ;;  %v4103_v29 = vadd.f32 %v4077_v61, %v3989_v16 }
 0x5e4   : > { %4780 = vst.msk [vmem:[%s7366_s29 + $0xd0] sm:$0xff] %vm225_vm0, %v4377_v32  ;;  %v4216_v4 = vadd.f32 %v4190_v60, %v4103_v29 }
 0x5e6   : > { %v4329_v54 = vadd.f32 %v4303_v38, %v4216_v4 }
 0x5e7   : > { %v4309_v39 = vpop.f32.mrf.mxu3  ;;  %v3975_v6 = vpop.f32.mrf.mxu0 }
 0x5e8   : > { %v4362_v24 = vadd.f32 %v8085_v31, %v4329_v54  ;;  %v3993_v27 = vadd.f32 %v3975_v6, %v8075_v19  ;;  %v4202_v57 = vpop.f32.mrf.mxu2 }
 0x5e9   : > { %v4080_v47 = vpop.f32.mrf.mxu1 }
 0x5ea   : > { %v4378_v42 = vadd.f32 %v4765_v3, %v4362_v24  ;;  %v4104_v12 = vadd.f32 %v4080_v47, %v3990_v56 }
 0x5ec   : > { %4781 = vst.msk [vmem:[%s7366_s29 + $0xd8] sm:$0xff] %vm225_vm0, %v4378_v42  ;;  %v4217_v33 = vadd.f32 %v4193_v46, %v4104_v12 }
 0x5ee   : > { %v4330_v9 = vadd.f32 %v4306_v22, %v4217_v33 }
 0x5ef   : > { %v4312_v59 = vpop.f32.mrf.mxu3  ;;  %v4157_v25 = vpop.f32.mrf.mxu0 }
 0x5f0   : > { %v4363_v26 = vadd.f32 %v8085_v31, %v4330_v9  ;;  %v4205_v36 = vadd.f32 %v4157_v25, %v8077_v11 }
 0x5f1   : > { %v4083_v15 = vpop.f32.mrf.mxu1 }
 0x5f2   : > { %v4379_v63 = vadd.f32 %v4766_v0, %v4363_v26  ;;  %v4105_v18 = vadd.f32 %v4083_v15, %v3991_v48 }
 0x5f4   : > { %4782 = vst.msk [vmem:[%s7366_s29 + $0xe0] sm:$0xff] %vm225_vm0, %v4379_v63  ;;  %v4218_v43 = vadd.f32 %v4196_v28, %v4105_v18 }
 0x5f6   : > { %v4331_v44 = vadd.f32 %v4309_v39, %v4218_v43 }
 0x5f7   : > { %v4315_v10 = vpop.f32.mrf.mxu3 }
 0x5f8   : > { %v4364_v40 = vadd.f32 %v8085_v31, %v4331_v44 }
 0x5f9   : > { %v4086_v17 = vpop.f32.mrf.mxu1 }
 0x5fa   : > { %v4380_v62 = vadd.f32 %v4767_v52, %v4364_v40  ;;  %v4106_v8 = vadd.f32 %v4086_v17, %v3992_v30 }
 0x5fc   : > { %4783 = vst.msk [vmem:[%s7366_s29 + $0xe8] sm:$0xff] %vm225_vm0, %v4380_v62  ;;  %v4219_v23 = vadd.f32 %v4199_v1, %v4106_v8 }
 0x5fe   : > { %v4332_v35 = vadd.f32 %v4312_v59, %v4219_v23 }
 0x600   : > { %v4365_v37 = vadd.f32 %v8085_v31, %v4332_v35 }
 0x601   : > { %v4089_v53 = vpop.f32.mrf.mxu1 }
 0x602   : > { %v4381_v21 = vadd.f32 %v4768_v45, %v4365_v37  ;;  %v4107_v34 = vadd.f32 %v4089_v53, %v3993_v27 }
 0x604   : > { %4784 = vst.msk [vmem:[%s7366_s29 + $0xf0] sm:$0xff] %vm225_vm0, %v4381_v21  ;;  %v4220_v13 = vadd.f32 %v4202_v57, %v4107_v34 }
 0x606   : > { %v4333_v51 = vadd.f32 %v4315_v10, %v4220_v13 }
 0x608   : > { %v4366_v19 = vadd.f32 %v8085_v31, %v4333_v51 }
 0x609   : > { %v4270_v58 = vpop.f32.mrf.mxu1 }
 0x60a   : > { %v4382_v2 = vadd.f32 %v4769_v5, %v4366_v19  ;;  %v4318_v60 = vadd.f32 %v4270_v58, %v4205_v36 }
 0x60c   : > { %4785 = vst.msk [vmem:[%s7366_s29 + $0xf8] sm:$0xff] %vm225_vm0, %v4382_v2  ;;  %v4351_v50 = vadd.f32 %v8085_v31, %v4318_v60 }
 0x60e   : > { %v4367_v38 = vadd.f32 %v4754_v20, %v4351_v50 }
 0x610   : > { %4770 = vst.msk [vmem:[%s7366_s29 + $0x80] sm:$0xff] %vm225_vm0, %v4367_v38 }
 0x611 PF: > { %s15_s18 = sadd.s32 1, %s4851_s18  }
 0x612   : > { %p12_p4 = scmp.ge.s32.totalorder %s15_s18, 4  }
 0x614   :  { %14 = sbr.rel (!%p12_p4) target bundleno = 1 (0x1), region = 90 }

</bundles_post_ra>
